<compile_context>
chip_gen: v5e
topology: v5e:2x2
jax: 0.10.0
libtpu: 0.0.40
codegen_flags: <defaults>
</compile_context>

<pallas_src>
import functools

import jax
import jax.numpy as jnp
from jax import lax
from jax.experimental import pallas as pl
from jax.experimental.pallas import tpu as pltpu


# ----------------------------------------------------------------------------
# Device-dependent sizing helpers
# ----------------------------------------------------------------------------
def _vmem_capacity_bytes():
    try:
        return int(pltpu.get_tpu_info().vmem_capacity_bytes)
    except Exception:
        return 64 * 1024 * 1024


def _vmem_limit_bytes():
    """~3/4 of physical VMEM: ~96 MiB on v5e/v6e, ~48 MiB on v7x."""
    cap = _vmem_capacity_bytes()
    return max(32 * 1024 * 1024, (cap * 3) // 4)


def _tile_cap():
    """Lane-tile upper bound: 4096 on 128-MiB-VMEM parts, 2048 on 64-MiB (v7x)."""
    return 4096 if _vmem_capacity_bytes() >= 100 * 1024 * 1024 else 2048


def _pick_tile(N, cap):
    """Lane tile for the output-pixel axis: full if it fits, else the largest
    divisor that is a multiple of 256 (preferred) or 128."""
    if N <= cap:
        return N
    for step in (256, 128):
        tn = (min(cap, N) // step) * step
        while tn >= step:
            if N % tn == 0:
                return tn
            tn -= step
    return N  # fallback: single tile (block == full array dim is legal)


# ----------------------------------------------------------------------------
# Pallas kernel
# ----------------------------------------------------------------------------
def _warp_loss_kernel(params_ref,   # SMEM prefetch (B*R*12,): A=K·R·K⁻¹ (9) then K·t (3)
                      uv_ref,       # VMEM (2, tn)      target pixel coords (x, y)
                      tgt_ref,      # VMEM (1, C, tn)
                      refs_ref,     # VMEM (1, 1, C*Sp, L) bf16 — resident across tile axis
                      depth_ref,    # VMEM (1, 1, tn)
                      expl_ref,     # VMEM (1, 1, 1, tn)
                      loss_ref,     # VMEM (1, 1, 1, 1)
                      flow_ref,     # VMEM (1, 1, 2, tn)
                      acc_ref,      # VMEM (1, tn) — per-lane loss accumulator over tiles
                      *, R, Sp, L, C, contract_x, inv_cn):
    b = pl.program_id(0)
    r = pl.program_id(1)
    tile = pl.program_id(2)

    @pl.when(tile == 0)
    def _():
        acc_ref[...] = jnp.zeros_like(acc_ref)

    u = uv_ref[0:1, :]                      # (1, tn)  target pixel x
    v = uv_ref[1:2, :]                      # (1, tn)  target pixel y
    d = depth_ref[0]                        # (1, tn)

    base = (b * R + r) * 12
    a00 = params_ref[base + 0]
    a01 = params_ref[base + 1]
    a02 = params_ref[base + 2]
    a10 = params_ref[base + 3]
    a11 = params_ref[base + 4]
    a12 = params_ref[base + 5]
    a20 = params_ref[base + 6]
    a21 = params_ref[base + 7]
    a22 = params_ref[base + 8]
    t0 = params_ref[base + 9]
    t1 = params_ref[base + 10]
    t2 = params_ref[base + 11]

    # project: p = A @ ([u, v, 1] * depth) + K t
    X = (a00 * u + a01 * v + a02) * d + t0
    Y = (a10 * u + a11 * v + a12) * d + t1
    Z = (a20 * u + a21 * v + a22) * d + t2
    Zs = jnp.maximum(Z, 1e-3)
    sx = X / Zs                             # (1, tn) source x coord
    sy = Y / Zs                             # (1, tn) source y coord

    # ego flow — single lane-dense store
    flow_ref[0, 0, :, :] = jnp.concatenate([sx - u, sy - v], axis=0)   # (2, tn)

    # long (MXU) axis vs short (sublane-reduce) axis
    if contract_x:
        sL, sS = sx, sy      # contract over W, reduce over H
    else:
        sL, sS = sy, sx      # contract over H, reduce over W

    li = lax.broadcasted_iota(jnp.int32, (L, 1), 0).astype(jnp.float32)
    si = lax.broadcasted_iota(jnp.int32, (Sp, 1), 0).astype(jnp.float32)
    # separable bilinear weights (zeros padding falls out naturally: fully
    # out-of-bound samples get all-zero weight columns; padded ref rows are 0)
    wL = jnp.maximum(1.0 - jnp.abs(li - sL), 0.0)       # (L, tn)  f32
    wS = jnp.maximum(1.0 - jnp.abs(si - sS), 0.0)       # (Sp, tn) f32

    ref_sl = refs_ref[0, 0]                             # (C*Sp, L) bf16
    tx = jnp.dot(ref_sl, wL.astype(jnp.bfloat16),
                 preferred_element_type=jnp.float32)    # (C*Sp, tn) f32 accum

    tgt = tgt_ref[0]                                    # (C, tn)
    absdiff = jnp.zeros_like(d)                         # (1, tn)
    zero_all = jnp.ones_like(d)                         # (1, tn)
    for c in range(C):                                  # C is tiny (e.g. 3)
        tc = tx[c * Sp:(c + 1) * Sp, :]                 # (Sp, tn) aligned static slice
        warped_c = jnp.sum(tc * wS, axis=0, keepdims=True)          # (1, tn)
        absdiff = absdiff + jnp.abs(tgt[c:c + 1, :] - warped_c)
        zero_all = zero_all * (warped_c == 0.0).astype(jnp.float32)

    # out_of_bound = 1 - prod_c(warped == 0)  (exact zeros-padding semantics)
    oob = 1.0 - zero_all                                # (1, tn)
    expl = expl_ref[0, 0]                               # (1, tn)
    acc_ref[...] = acc_ref[...] + absdiff * oob * jnp.abs(expl)

    @pl.when(tile == pl.num_programs(2) - 1)
    def _():
        loss_ref[...] = (jnp.sum(acc_ref[...]) * inv_cn).reshape(1, 1, 1, 1)


def _run_warp_loss(params_flat, uv, tgt, refs, depth, expl,
                   *, B, R, N, Sp, L, C, contract_x, tn):
    n_tiles = N // tn
    kernel = functools.partial(_warp_loss_kernel, R=R, Sp=Sp, L=L, C=C,
                               contract_x=contract_x,
                               inv_cn=1.0 / float(C * N))
    grid_spec = pltpu.PrefetchScalarGridSpec(
        num_scalar_prefetch=1,
        grid=(B, R, n_tiles),
        in_specs=[
            pl.BlockSpec((2, tn), lambda b, r, t, p: (0, t)),                 # uv    (2, N)
            pl.BlockSpec((1, C, tn), lambda b, r, t, p: (b, 0, t)),           # tgt   (B, C, N)
            pl.BlockSpec((1, 1, C * Sp, L), lambda b, r, t, p: (r, b, 0, 0)), # refs  (R, B, C*Sp, L)
            pl.BlockSpec((1, 1, tn), lambda b, r, t, p: (b, 0, t)),           # depth (B, 1, N)
            pl.BlockSpec((1, 1, 1, tn), lambda b, r, t, p: (b, r, 0, t)),     # expl  (B, R, 1, N)
        ],
        out_specs=[
            pl.BlockSpec((1, 1, 1, 1), lambda b, r, t, p: (b, r, 0, 0)),      # loss  (B, R, 1, 1)
            pl.BlockSpec((1, 1, 2, tn), lambda b, r, t, p: (b, r, 0, t)),     # flow  (B, R, 2, N)
        ],
        scratch_shapes=[pltpu.VMEM((1, tn), jnp.float32)],
    )
    loss, flow = pl.pallas_call(
        kernel,
        grid_spec=grid_spec,
        out_shape=(jax.ShapeDtypeStruct((B, R, 1, 1), jnp.float32),
                   jax.ShapeDtypeStruct((B, R, 2, N), jnp.float32)),
        compiler_params=pltpu.CompilerParams(
            dimension_semantics=("parallel", "parallel", "arbitrary"),
            vmem_limit_bytes=_vmem_limit_bytes()),
    )(params_flat, uv, tgt, refs, depth, expl)
    return loss[:, :, 0, 0], flow


# ----------------------------------------------------------------------------
# Plain-jnp path (coarse scales / reference)
# ----------------------------------------------------------------------------
def _warp_loss_jnp(params, uv, tgt, refs, depth, expl, H, W, C):
    # params (B,R,12), uv (2,N), tgt (B,C,N), refs (R,B,C,H,W),
    # depth (B,1,N), expl (B,R,1,N)
    B, R = params.shape[0], params.shape[1]
    N = H * W
    A = params[..., :9].reshape(B, R, 3, 3)
    t = params[..., 9:12]
    u, v = uv[0], uv[1]
    pix = jnp.stack([u, v, jnp.ones_like(u)], axis=0)                  # (3, N)
    p = jnp.einsum('brij,jn->brin', A, pix) * depth[:, None] + t[..., None]
    X, Y, Z = p[:, :, 0], p[:, :, 1], p[:, :, 2]
    Zs = jnp.maximum(Z, 1e-3)
    sx, sy = X / Zs, Y / Zs                                            # (B, R, N)
    flow = jnp.stack([sx - u, sy - v], axis=2)                         # (B, R, 2, N)
    xi = jnp.arange(W, dtype=jnp.float32)
    yi = jnp.arange(H, dtype=jnp.float32)
    wx = jnp.maximum(1.0 - jnp.abs(xi[None, None, :, None] - sx[:, :, None, :]), 0.0)
    wy = jnp.maximum(1.0 - jnp.abs(yi[None, None, :, None] - sy[:, :, None, :]), 0.0)
    warped = jnp.einsum('rbchw,brwn,brhn->brcn', refs, wx, wy)         # (B, R, C, N)
    oob = 1.0 - jnp.min((warped == 0.0).astype(jnp.float32), axis=2, keepdims=True)
    diff = jnp.abs((tgt[:, None] - warped) * oob * expl)
    loss_br = jnp.sum(diff, axis=(2, 3)) * (1.0 / float(C * N))        # (B, R)
    return loss_br, flow


# ----------------------------------------------------------------------------
# Wrapper (module forward)
# ----------------------------------------------------------------------------
def _adaptive_avg_pool(x, h, w):
    B, C, H, W = x.shape
    # TODO(synk): F.adaptive_avg_pool2d handles non-divisible sizes; only integer
    # downscale is supported here.
    assert H % h == 0 and W % w == 0, "adaptive pool only for integer downscale"
    return x.reshape(B, C, h, H // h, w, W // w).mean(axis=(3, 5))


def _euler2mat(ang):
    # ang: (B, 3) -> (B, 3, 3); convention R = Rx @ Ry @ Rz
    x, y, z = ang[:, 0], ang[:, 1], ang[:, 2]
    cx, sx = jnp.cos(x), jnp.sin(x)
    cy, sy = jnp.cos(y), jnp.sin(y)
    cz, sz = jnp.cos(z), jnp.sin(z)
    zeros = jnp.zeros_like(x)
    ones = jnp.ones_like(x)
    Rx = jnp.stack([ones, zeros, zeros,
                    zeros, cx, -sx,
                    zeros, sx, cx], axis=-1).reshape(-1, 3, 3)
    Ry = jnp.stack([cy, zeros, sy,
                    zeros, ones, zeros,
                    -sy, zeros, cy], axis=-1).reshape(-1, 3, 3)
    Rz = jnp.stack([cz, -sz, zeros,
                    sz, cz, zeros,
                    zeros, zeros, ones], axis=-1).reshape(-1, 3, 3)
    return Rx @ Ry @ Rz


def photometric_reconstruction_loss(tgt_img, ref_imgs, intrinsics, intrinsics_inv,
                                    depth, explainability_mask, pose,
                                    ssim_w=0.0, padding_mode='zeros',
                                    force_jnp=False, min_pallas_pixels=2048):
    # TODO(synk): SSIM branch (ssim_w > 0, gaussian-window conv2d) not implemented
    # in the Pallas path; the module default ssim_w=0.0 never exercises it.
    assert ssim_w == 0.0, "ssim_w > 0 not supported in this Pallas implementation"
    assert padding_mode == 'zeros'

    if not isinstance(explainability_mask, (list, tuple)):
        explainability_mask = [explainability_mask]
    if not isinstance(depth, (list, tuple)):
        depth = [depth]
    if isinstance(pose, (list, tuple)):
        assert len(pose) == len(depth)
        pose_list = list(pose)
    else:
        pose_list = [pose for _ in range(len(depth))]

    B, C, H_full, W_full = tgt_img.shape
    R = len(ref_imgs)

    total_loss = jnp.zeros((B,), jnp.float32)
    ego_flows = []
    for d, mask, p in zip(depth, explainability_mask, pose_list):
        _, _, h, w = d.shape
        downscale = H_full / h
        N = h * w

        tgt_s = _adaptive_avg_pool(tgt_img, h, w).reshape(B, C, N).astype(jnp.float32)
        refs_scaled = [_adaptive_avg_pool(ri, h, w).astype(jnp.float32) for ri in ref_imgs]

        # precomputed target pixel coordinates (x fastest, row-major)
        q = jnp.arange(N, dtype=jnp.int32)
        uv = jnp.stack([(q % w).astype(jnp.float32),
                        (q // w).astype(jnp.float32)], axis=0)          # (2, N)

        K_s = jnp.concatenate([intrinsics[:, 0:2] / downscale, intrinsics[:, 2:]], axis=1)
        Kinv_s = jnp.concatenate([intrinsics_inv[:, :, 0:2] * downscale,
                                  intrinsics_inv[:, :, 2:]], axis=2)

        pp = p.reshape(B, R, 6) if p.ndim == 2 else p
        params = []
        for i in range(R):
            cur = pp[:, i]                          # (B, 6)
            t = cur[:, :3]
            Rm = _euler2mat(cur[:, 3:])
            A = jnp.einsum('bij,bjk,bkl->bil', K_s, Rm, Kinv_s)
            bvec = jnp.einsum('bij,bj->bi', K_s, t)
            params.append(jnp.concatenate([A.reshape(B, 9), bvec], axis=1))
        params = jnp.stack(params, axis=1).astype(jnp.float32)          # (B, R, 12)

        if mask is None:
            expl = jnp.ones((B, R, 1, N), jnp.float32)
        else:
            expl = mask.reshape(B, R, 1, N).astype(jnp.float32)
        depth_flat = d.reshape(B, 1, N).astype(jnp.float32)

        if force_jnp or N <= min_pallas_pixels:
            # Coarse scales: launch overhead dominates; let XLA fuse it.
            refs_rb = jnp.stack(refs_scaled, axis=0)                     # (R, B, C, h, w)
            loss_br, flow = _warp_loss_jnp(params, uv, tgt_s, refs_rb,
                                           depth_flat, expl, h, w, C)
        else:
            # Contract over the longer spatial axis on the MXU; reduce the
            # shorter (8-padded) axis on sublanes.
            contract_x = (w >= h)
            if contract_x:
                S, L = h, w
                refs_nat = refs_scaled                                   # (B, C, h, w)
            else:
                S, L = w, h
                refs_nat = [jnp.transpose(ri, (0, 1, 3, 2)) for ri in refs_scaled]
            Sp = ((S + 7) // 8) * 8
            refs_mx = jnp.stack(
                [jnp.pad(rn, ((0, 0), (0, 0), (0, Sp - S), (0, 0)))
                   .reshape(B, C * Sp, L) for rn in refs_nat],
                axis=0).astype(jnp.bfloat16)                             # (R, B, C*Sp, L)
            tn = _pick_tile(N, _tile_cap())
            loss_br, flow = _run_warp_loss(
                params.reshape(-1), uv, tgt_s, refs_mx, depth_flat, expl,
                B=B, R=R, N=N, Sp=Sp, L=L, C=C, contract_x=contract_x, tn=tn)

        total_loss = total_loss + jnp.sum(loss_br, axis=1)               # per-batch loss
        ego_flows.append([flow[:, i].reshape(B, 2, h, w) for i in range(R)])

    return total_loss, ego_flows


if __name__ == "__main__":
    key = jax.random.PRNGKey(0)
    B, C, H, W, R = 2, 3, 64, 64, 2
    k = jax.random.split(key, 8)

    tgt_img = jax.random.uniform(k[0], (B, C, H, W), jnp.float32)
    ref_imgs = [jax.random.uniform(k[1], (B, C, H, W), jnp.float32),
                jax.random.uniform(k[2], (B, C, H, W), jnp.float32)]

    fx = fy = float(W) / 2.0
    cx = (W - 1) / 2.0
    cy = (H - 1) / 2.0
    K = jnp.array([[fx, 0.0, cx], [0.0, fy, cy], [0.0, 0.0, 1.0]], jnp.float32)
    intrinsics = jnp.broadcast_to(K, (B, 3, 3))
    intrinsics_inv = jnp.broadcast_to(jnp.linalg.inv(K), (B, 3, 3)).astype(jnp.float32)

    # two scales: fine scale exercises the Pallas kernel, coarse scale the jnp path
    depth = [1.0 + jax.random.uniform(k[3], (B, 1, H, W), jnp.float32),
             1.0 + jax.random.uniform(k[4], (B, 1, H // 2, W // 2), jnp.float32)]
    explainability_mask = [
        jax.random.uniform(k[5], (B, R, H, W), jnp.float32),
        jax.random.uniform(k[6], (B, R, H // 2, W // 2), jnp.float32)]
    pose = 0.01 * jax.random.normal(k[7], (B, R, 6), jnp.float32)

    loss, ego_flows = photometric_reconstruction_loss(
        tgt_img, ref_imgs, intrinsics, intrinsics_inv,
        depth, explainability_mask, pose, ssim_w=0.0)

    jax.block_until_ready(loss)
    for scale_flows in ego_flows:
        for f in scale_flows:
            jax.block_until_ready(f)

    # pure-jnp reference on identical inputs (forces fallback at all scales)
    loss_ref, _ = photometric_reconstruction_loss(
        tgt_img, ref_imgs, intrinsics, intrinsics_inv,
        depth, explainability_mask, pose, ssim_w=0.0, force_jnp=True)
    jax.block_until_ready(loss_ref)

    assert loss.shape == (B,)
    assert bool(jnp.all(jnp.isfinite(loss)))
    assert bool(jnp.allclose(loss, loss_ref, rtol=5e-2, atol=1e-3)), (loss, loss_ref)
    print("KERNEL_OK")
</pallas_src>

<mosaic_0001>
module attributes {stable_mosaic.version = 11 : i64} {
  func.func @_warp_loss_kernel(%arg0: i32, %arg1: i32, %arg2: i32, %arg3: memref<48xf32, #tpu.memory_space<smem>>, %arg4: memref<2x2048xf32, #tpu.memory_space<vmem>>, %arg5: memref<1x3x2048xf32, #tpu.memory_space<vmem>>, %arg6: memref<1x1x192x64xbf16, #tpu.memory_space<vmem>>, %arg7: memref<1x1x2048xf32, #tpu.memory_space<vmem>>, %arg8: memref<1x1x1x2048xf32, #tpu.memory_space<vmem>>, %arg9: memref<1x1x1x1xf32, #tpu.memory_space<vmem>>, %arg10: memref<1x1x2x2048xf32, #tpu.memory_space<vmem>>, %arg11: memref<1x2048xf32, #tpu.memory_space<vmem>>) attributes {dimension_semantics = [#tpu.dimension_semantics<parallel>, #tpu.dimension_semantics<parallel>, #tpu.dimension_semantics<arbitrary>], iteration_bounds = array<i64: 2, 2, 2>, scalar_prefetch = 1 : i64, scratch_operands = 1 : i64, tpu.core_type = #tpu.core_type<tc>, window_params = [{transform_indices = @transform_0, window_bounds = array<i64: 2, 2048>}, {transform_indices = @transform_1, window_bounds = array<i64: 1, 3, 2048>}, {transform_indices = @transform_2, window_bounds = array<i64: 1, 1, 192, 64>}, {transform_indices = @transform_3, window_bounds = array<i64: 1, 1, 2048>}, {transform_indices = @transform_4, window_bounds = array<i64: 1, 1, 1, 2048>}, {transform_indices = @transform_5, window_bounds = array<i64: 1, 1, 1, 1>}, {transform_indices = @transform_6, window_bounds = array<i64: 1, 1, 2, 2048>}]} {
    %c0_i32 = arith.constant 0 : i32
    %0 = arith.cmpi eq, %arg2, %c0_i32 : i32
    %1 = arith.extui %0 : i1 to i32
    %c0_i32_0 = arith.constant 0 : i32
    %2 = arith.cmpi ne, %1, %c0_i32_0 : i32
    scf.if %2 {
      %cst_43 = arith.constant 0.000000e+00 : f32
      %166 = vector.broadcast %cst_43 : f32 to vector<1x2048xf32>
      %c0_44 = arith.constant 0 : index
      %c0_45 = arith.constant 0 : index
      %167 = vector.load %arg11[%c0_44, %c0_45] : memref<1x2048xf32, #tpu.memory_space<vmem>>, vector<1x2048xf32>
      tpu.vector_store %arg11[%c0_44, %c0_45], %166 {strides = array<i32>} : memref<1x2048xf32, #tpu.memory_space<vmem>>, vector<1x2048xf32>,
    } else {
    }
    %c0 = arith.constant 0 : index
    %c0_1 = arith.constant 0 : index
    %3 = vector.load %arg4[%c0, %c0_1] : memref<2x2048xf32, #tpu.memory_space<vmem>>, vector<1x2048xf32>
    %c1 = arith.constant 1 : index
    %c0_2 = arith.constant 0 : index
    %4 = vector.load %arg4[%c1, %c0_2] : memref<2x2048xf32, #tpu.memory_space<vmem>>, vector<1x2048xf32>
    %c0_3 = arith.constant 0 : index
    %c0_4 = arith.constant 0 : index
    %c0_5 = arith.constant 0 : index
    %5 = vector.load %arg7[%c0_3, %c0_4, %c0_5] : memref<1x1x2048xf32, #tpu.memory_space<vmem>>, vector<1x1x2048xf32>
    %6 = vector.shape_cast %5 : vector<1x1x2048xf32> to vector<1x2048xf32>
    %c2_i32 = arith.constant 2 : i32
    %7 = arith.muli %arg0, %c2_i32 : i32
    %8 = arith.addi %7, %arg1 : i32
    %c12_i32 = arith.constant 12 : i32
    %9 = arith.muli %8, %c12_i32 : i32
    %c0_i32_6 = arith.constant 0 : i32
    %10 = arith.addi %9, %c0_i32_6 : i32
    %11 = arith.index_cast %10 : i32 to index
    %12 = memref.load %arg3[%11] : memref<48xf32, #tpu.memory_space<smem>>
    %c1_i32 = arith.constant 1 : i32
    %13 = arith.addi %9, %c1_i32 : i32
    %14 = arith.index_cast %13 : i32 to index
    %15 = memref.load %arg3[%14] : memref<48xf32, #tpu.memory_space<smem>>
    %c2_i32_7 = arith.constant 2 : i32
    %16 = arith.addi %9, %c2_i32_7 : i32
    %17 = arith.index_cast %16 : i32 to index
    %18 = memref.load %arg3[%17] : memref<48xf32, #tpu.memory_space<smem>>
    %c3_i32 = arith.constant 3 : i32
    %19 = arith.addi %9, %c3_i32 : i32
    %20 = arith.index_cast %19 : i32 to index
    %21 = memref.load %arg3[%20] : memref<48xf32, #tpu.memory_space<smem>>
    %c4_i32 = arith.constant 4 : i32
    %22 = arith.addi %9, %c4_i32 : i32
    %23 = arith.index_cast %22 : i32 to index
    %24 = memref.load %arg3[%23] : memref<48xf32, #tpu.memory_space<smem>>
    %c5_i32 = arith.constant 5 : i32
    %25 = arith.addi %9, %c5_i32 : i32
    %26 = arith.index_cast %25 : i32 to index
    %27 = memref.load %arg3[%26] : memref<48xf32, #tpu.memory_space<smem>>
    %c6_i32 = arith.constant 6 : i32
    %28 = arith.addi %9, %c6_i32 : i32
    %29 = arith.index_cast %28 : i32 to index
    %30 = memref.load %arg3[%29] : memref<48xf32, #tpu.memory_space<smem>>
    %c7_i32 = arith.constant 7 : i32
    %31 = arith.addi %9, %c7_i32 : i32
    %32 = arith.index_cast %31 : i32 to index
    %33 = memref.load %arg3[%32] : memref<48xf32, #tpu.memory_space<smem>>
    %c8_i32 = arith.constant 8 : i32
    %34 = arith.addi %9, %c8_i32 : i32
    %35 = arith.index_cast %34 : i32 to index
    %36 = memref.load %arg3[%35] : memref<48xf32, #tpu.memory_space<smem>>
    %c9_i32 = arith.constant 9 : i32
    %37 = arith.addi %9, %c9_i32 : i32
    %38 = arith.index_cast %37 : i32 to index
    %39 = memref.load %arg3[%38] : memref<48xf32, #tpu.memory_space<smem>>
    %c10_i32 = arith.constant 10 : i32
    %40 = arith.addi %9, %c10_i32 : i32
    %41 = arith.index_cast %40 : i32 to index
    %42 = memref.load %arg3[%41] : memref<48xf32, #tpu.memory_space<smem>>
    %c11_i32 = arith.constant 11 : i32
    %43 = arith.addi %9, %c11_i32 : i32
    %44 = arith.index_cast %43 : i32 to index
    %45 = memref.load %arg3[%44] : memref<48xf32, #tpu.memory_space<smem>>
    %46 = vector.broadcast %12 : f32 to vector<1x2048xf32>
    %47 = arith.mulf %46, %3 : vector<1x2048xf32>
    %48 = vector.broadcast %15 : f32 to vector<1x2048xf32>
    %49 = arith.mulf %48, %4 : vector<1x2048xf32>
    %50 = arith.addf %47, %49 : vector<1x2048xf32>
    %51 = vector.broadcast %18 : f32 to vector<1x2048xf32>
    %52 = arith.addf %50, %51 : vector<1x2048xf32>
    %53 = arith.mulf %52, %6 : vector<1x2048xf32>
    %54 = vector.broadcast %39 : f32 to vector<1x2048xf32>
    %55 = arith.addf %53, %54 : vector<1x2048xf32>
    %56 = vector.broadcast %21 : f32 to vector<1x2048xf32>
    %57 = arith.mulf %56, %3 : vector<1x2048xf32>
    %58 = vector.broadcast %24 : f32 to vector<1x2048xf32>
    %59 = arith.mulf %58, %4 : vector<1x2048xf32>
    %60 = arith.addf %57, %59 : vector<1x2048xf32>
    %61 = vector.broadcast %27 : f32 to vector<1x2048xf32>
    %62 = arith.addf %60, %61 : vector<1x2048xf32>
    %63 = arith.mulf %62, %6 : vector<1x2048xf32>
    %64 = vector.broadcast %42 : f32 to vector<1x2048xf32>
    %65 = arith.addf %63, %64 : vector<1x2048xf32>
    %66 = vector.broadcast %30 : f32 to vector<1x2048xf32>
    %67 = arith.mulf %66, %3 : vector<1x2048xf32>
    %68 = vector.broadcast %33 : f32 to vector<1x2048xf32>
    %69 = arith.mulf %68, %4 : vector<1x2048xf32>
    %70 = arith.addf %67, %69 : vector<1x2048xf32>
    %71 = vector.broadcast %36 : f32 to vector<1x2048xf32>
    %72 = arith.addf %70, %71 : vector<1x2048xf32>
    %73 = arith.mulf %72, %6 : vector<1x2048xf32>
    %74 = vector.broadcast %45 : f32 to vector<1x2048xf32>
    %75 = arith.addf %73, %74 : vector<1x2048xf32>
    %cst = arith.constant 1.000000e-03 : f32
    %76 = vector.broadcast %cst : f32 to vector<1x2048xf32>
    %77 = arith.maximumf %75, %76 : vector<1x2048xf32>
    %78 = arith.divf %55, %77 : vector<1x2048xf32>
    %79 = arith.divf %65, %77 : vector<1x2048xf32>
    %80 = arith.subf %78, %3 : vector<1x2048xf32>
    %81 = arith.subf %79, %4 : vector<1x2048xf32>
    %82 = tpu.concatenate %80, %81 in 0 : vector<1x2048xf32>, vector<1x2048xf32> -> vector<2x2048xf32>
    %c0_8 = arith.constant 0 : index
    %c0_9 = arith.constant 0 : index
    %c0_10 = arith.constant 0 : index
    %c0_11 = arith.constant 0 : index
    %83 = vector.load %arg10[%c0_8, %c0_9, %c0_10, %c0_11] : memref<1x1x2x2048xf32, #tpu.memory_space<vmem>>, vector<1x1x2x2048xf32>
    %84 = vector.shape_cast %83 : vector<1x1x2x2048xf32> to vector<2x2048xf32>
    %85 = vector.shape_cast %82 : vector<2x2048xf32> to vector<1x1x2x2048xf32>
    tpu.vector_store %arg10[%c0_8, %c0_9, %c0_10, %c0_11], %85 {strides = array<i32>} : memref<1x1x2x2048xf32, #tpu.memory_space<vmem>>, vector<1x1x2x2048xf32>,
    %86 = tpu.iota {dimensions = array<i32: 0>} : vector<64x1xi32>
    %87 = arith.sitofp %86 : vector<64x1xi32> to vector<64x1xf32>
    %88 = tpu.iota {dimensions = array<i32: 0>} : vector<64x1xi32>
    %89 = arith.sitofp %88 : vector<64x1xi32> to vector<64x1xf32>
    %90 = vector.broadcast %87 : vector<64x1xf32> to vector<64x2048xf32>
    %91 = vector.broadcast %78 : vector<1x2048xf32> to vector<64x2048xf32>
    %92 = arith.subf %90, %91 : vector<64x2048xf32>
    %93 = math.absf %92 : vector<64x2048xf32>
    %cst_12 = arith.constant 1.000000e+00 : f32
    %94 = vector.broadcast %cst_12 : f32 to vector<64x2048xf32>
    %95 = arith.subf %94, %93 : vector<64x2048xf32>
    %cst_13 = arith.constant 0.000000e+00 : f32
    %96 = vector.broadcast %cst_13 : f32 to vector<64x2048xf32>
    %97 = arith.maximumf %95, %96 : vector<64x2048xf32>
    %98 = vector.broadcast %89 : vector<64x1xf32> to vector<64x2048xf32>
    %99 = vector.broadcast %79 : vector<1x2048xf32> to vector<64x2048xf32>
    %100 = arith.subf %98, %99 : vector<64x2048xf32>
    %101 = math.absf %100 : vector<64x2048xf32>
    %cst_14 = arith.constant 1.000000e+00 : f32
    %102 = vector.broadcast %cst_14 : f32 to vector<64x2048xf32>
    %103 = arith.subf %102, %101 : vector<64x2048xf32>
    %cst_15 = arith.constant 0.000000e+00 : f32
    %104 = vector.broadcast %cst_15 : f32 to vector<64x2048xf32>
    %105 = arith.maximumf %103, %104 : vector<64x2048xf32>
    %c0_16 = arith.constant 0 : index
    %c0_17 = arith.constant 0 : index
    %c0_18 = arith.constant 0 : index
    %c0_19 = arith.constant 0 : index
    %106 = vector.load %arg6[%c0_16, %c0_17, %c0_18, %c0_19] : memref<1x1x192x64xbf16, #tpu.memory_space<vmem>>, vector<1x1x192x64xbf16>
    %107 = vector.shape_cast %106 : vector<1x1x192x64xbf16> to vector<192x64xbf16>
    %108 = arith.truncf %97 : vector<64x2048xf32> to vector<64x2048xbf16>
    %cst_20 = arith.constant dense<0.000000e+00> : vector<192x2048xf32>
    %109 = tpu.matmul %107, %108, %cst_20 {dimension_numbers = #tpu.dot_dimension_numbers<[1], [0], [0], [1], [0, 0, 1, 1], [], []>} : vector<192x64xbf16>, vector<64x2048xbf16>, vector<192x2048xf32> -> vector<192x2048xf32>
    %c0_21 = arith.constant 0 : index
    %c0_22 = arith.constant 0 : index
    %c0_23 = arith.constant 0 : index
    %110 = vector.load %arg5[%c0_21, %c0_22, %c0_23] : memref<1x3x2048xf32, #tpu.memory_space<vmem>>, vector<1x3x2048xf32>
    %111 = vector.shape_cast %110 : vector<1x3x2048xf32> to vector<3x2048xf32>
    %cst_24 = arith.constant 0.000000e+00 : f32
    %112 = vector.broadcast %cst_24 : f32 to vector<1x2048xf32>
    %cst_25 = arith.constant 1.000000e+00 : f32
    %113 = vector.broadcast %cst_25 : f32 to vector<1x2048xf32>
    %114 = vector.extract_strided_slice %109 {offsets = [0, 0], sizes = [64, 2048], strides = [1, 1]} : vector<192x2048xf32> to vector<64x2048xf32>
    %115 = arith.mulf %114, %105 : vector<64x2048xf32>
    %cst_26 = arith.constant dense<0.000000e+00> : vector<2048xf32>
    %116 = vector.multi_reduction <add>, %115, %cst_26 [0] : vector<64x2048xf32> to vector<2048xf32>
    %117 = vector.shape_cast %116 : vector<2048xf32> to vector<1x2048xf32>
    %118 = vector.extract_strided_slice %111 {offsets = [0, 0], sizes = [1, 2048], strides = [1, 1]} : vector<3x2048xf32> to vector<1x2048xf32>
    %119 = arith.subf %118, %117 : vector<1x2048xf32>
    %120 = math.absf %119 : vector<1x2048xf32>
    %121 = arith.addf %112, %120 : vector<1x2048xf32>
    %cst_27 = arith.constant 0.000000e+00 : f32
    %122 = vector.broadcast %cst_27 : f32 to vector<1x2048xf32>
    %123 = arith.cmpf oeq, %117, %122 : vector<1x2048xf32>
    %124 = arith.extui %123 : vector<1x2048xi1> to vector<1x2048xi32>
    %125 = arith.sitofp %124 : vector<1x2048xi32> to vector<1x2048xf32>
    %126 = arith.mulf %113, %125 : vector<1x2048xf32>
    %127 = vector.extract_strided_slice %109 {offsets = [64, 0], sizes = [64, 2048], strides = [1, 1]} : vector<192x2048xf32> to vector<64x2048xf32>
    %128 = arith.mulf %127, %105 : vector<64x2048xf32>
    %cst_28 = arith.constant dense<0.000000e+00> : vector<2048xf32>
    %129 = vector.multi_reduction <add>, %128, %cst_28 [0] : vector<64x2048xf32> to vector<2048xf32>
    %130 = vector.shape_cast %129 : vector<2048xf32> to vector<1x2048xf32>
    %131 = vector.extract_strided_slice %111 {offsets = [1, 0], sizes = [1, 2048], strides = [1, 1]} : vector<3x2048xf32> to vector<1x2048xf32>
    %132 = arith.subf %131, %130 : vector<1x2048xf32>
    %133 = math.absf %132 : vector<1x2048xf32>
    %134 = arith.addf %121, %133 : vector<1x2048xf32>
    %cst_29 = arith.constant 0.000000e+00 : f32
    %135 = vector.broadcast %cst_29 : f32 to vector<1x2048xf32>
    %136 = arith.cmpf oeq, %130, %135 : vector<1x2048xf32>
    %137 = arith.extui %136 : vector<1x2048xi1> to vector<1x2048xi32>
    %138 = arith.sitofp %137 : vector<1x2048xi32> to vector<1x2048xf32>
    %139 = arith.mulf %126, %138 : vector<1x2048xf32>
    %140 = vector.extract_strided_slice %109 {offsets = [128, 0], sizes = [64, 2048], strides = [1, 1]} : vector<192x2048xf32> to vector<64x2048xf32>
    %141 = arith.mulf %140, %105 : vector<64x2048xf32>
    %cst_30 = arith.constant dense<0.000000e+00> : vector<2048xf32>
    %142 = vector.multi_reduction <add>, %141, %cst_30 [0] : vector<64x2048xf32> to vector<2048xf32>
    %143 = vector.shape_cast %142 : vector<2048xf32> to vector<1x2048xf32>
    %144 = vector.extract_strided_slice %111 {offsets = [2, 0], sizes = [1, 2048], strides = [1, 1]} : vector<3x2048xf32> to vector<1x2048xf32>
    %145 = arith.subf %144, %143 : vector<1x2048xf32>
    %146 = math.absf %145 : vector<1x2048xf32>
    %147 = arith.addf %134, %146 : vector<1x2048xf32>
    %cst_31 = arith.constant 0.000000e+00 : f32
    %148 = vector.broadcast %cst_31 : f32 to vector<1x2048xf32>
    %149 = arith.cmpf oeq, %143, %148 : vector<1x2048xf32>
    %150 = arith.extui %149 : vector<1x2048xi1> to vector<1x2048xi32>
    %151 = arith.sitofp %150 : vector<1x2048xi32> to vector<1x2048xf32>
    %152 = arith.mulf %139, %151 : vector<1x2048xf32>
    %cst_32 = arith.constant 1.000000e+00 : f32
    %153 = vector.broadcast %cst_32 : f32 to vector<1x2048xf32>
    %154 = arith.subf %153, %152 : vector<1x2048xf32>
    %c0_33 = arith.constant 0 : index
    %c0_34 = arith.constant 0 : index
    %c0_35 = arith.constant 0 : index
    %c0_36 = arith.constant 0 : index
    %155 = vector.load %arg8[%c0_33, %c0_34, %c0_35, %c0_36] : memref<1x1x1x2048xf32, #tpu.memory_space<vmem>>, vector<1x1x1x2048xf32>
    %156 = vector.shape_cast %155 : vector<1x1x1x2048xf32> to vector<1x2048xf32>
    %c0_37 = arith.constant 0 : index
    %c0_38 = arith.constant 0 : index
    %157 = vector.load %arg11[%c0_37, %c0_38] : memref<1x2048xf32, #tpu.memory_space<vmem>>, vector<1x2048xf32>
    %158 = arith.mulf %147, %154 : vector<1x2048xf32>
    %159 = math.absf %156 : vector<1x2048xf32>
    %160 = arith.mulf %158, %159 : vector<1x2048xf32>
    %161 = arith.addf %157, %160 : vector<1x2048xf32>
    %c0_39 = arith.constant 0 : index
    %c0_40 = arith.constant 0 : index
    %162 = vector.load %arg11[%c0_39, %c0_40] : memref<1x2048xf32, #tpu.memory_space<vmem>>, vector<1x2048xf32>
    tpu.vector_store %arg11[%c0_39, %c0_40], %161 {strides = array<i32>} : memref<1x2048xf32, #tpu.memory_space<vmem>>, vector<1x2048xf32>,
    %c1_i32_41 = arith.constant 1 : i32
    %163 = arith.cmpi eq, %arg2, %c1_i32_41 : i32
    %164 = arith.extui %163 : i1 to i32
    %c0_i32_42 = arith.constant 0 : i32
    %165 = arith.cmpi ne, %164, %c0_i32_42 : i32
    scf.if %165 {
      %c0_43 = arith.constant 0 : index
      %c0_44 = arith.constant 0 : index
      %166 = vector.load %arg11[%c0_43, %c0_44] : memref<1x2048xf32, #tpu.memory_space<vmem>>, vector<1x2048xf32>
      %167 = vector.shape_cast %166 : vector<1x2048xf32> to vector<1x1x2048xf32>
      %cst_45 = arith.constant dense<0.000000e+00> : vector<1xf32>
      %168 = vector.multi_reduction <add>, %167, %cst_45 [1, 2] : vector<1x1x2048xf32> to vector<1xf32>
      %169 = vector.shape_cast %168 : vector<1xf32> to vector<1x1x1xf32>
      %170 = vector.extract %169[0, 0, 0] : f32 from vector<1x1x1xf32>
      %cst_46 = arith.constant 8.13802107E-5 : f32
      %171 = arith.mulf %170, %cst_46 : f32
      %172 = vector.broadcast %171 : f32 to vector<1x1x1x1xf32>
      %c0_47 = arith.constant 0 : index
      %c0_48 = arith.constant 0 : index
      %c0_49 = arith.constant 0 : index
      %c0_50 = arith.constant 0 : index
      %173 = vector.load %arg9[%c0_47, %c0_48, %c0_49, %c0_50] : memref<1x1x1x1xf32, #tpu.memory_space<vmem>>, vector<1x1x1x1xf32>
      tpu.vector_store %arg9[%c0_47, %c0_48, %c0_49, %c0_50], %172 {strides = array<i32>} : memref<1x1x1x1xf32, #tpu.memory_space<vmem>>, vector<1x1x1x1xf32>,
    } else {
    }
    return
  }
  func.func @transform_0(%arg0: i32, %arg1: i32, %arg2: i32, %arg3: memref<48xf32, #tpu.memory_space<smem>>) -> (i32, i32) {
    %c0_i32 = arith.constant 0 : i32
    %c0_i32_0 = arith.constant 0 : i32
    return %c0_i32, %arg2 : i32, i32
  }
  func.func @transform_1(%arg0: i32, %arg1: i32, %arg2: i32, %arg3: memref<48xf32, #tpu.memory_space<smem>>) -> (i32, i32, i32) {
    %c0_i32 = arith.constant 0 : i32
    %c0_i32_0 = arith.constant 0 : i32
    return %arg0, %c0_i32, %arg2 : i32, i32, i32
  }
  func.func @transform_2(%arg0: i32, %arg1: i32, %arg2: i32, %arg3: memref<48xf32, #tpu.memory_space<smem>>) -> (i32, i32, i32, i32) {
    %c0_i32 = arith.constant 0 : i32
    %c0_i32_0 = arith.constant 0 : i32
    %c0_i32_1 = arith.constant 0 : i32
    return %arg1, %arg0, %c0_i32, %c0_i32_0 : i32, i32, i32, i32
  }
  func.func @transform_3(%arg0: i32, %arg1: i32, %arg2: i32, %arg3: memref<48xf32, #tpu.memory_space<smem>>) -> (i32, i32, i32) {
    %c0_i32 = arith.constant 0 : i32
    %c0_i32_0 = arith.constant 0 : i32
    return %arg0, %c0_i32, %arg2 : i32, i32, i32
  }
  func.func @transform_4(%arg0: i32, %arg1: i32, %arg2: i32, %arg3: memref<48xf32, #tpu.memory_space<smem>>) -> (i32, i32, i32, i32) {
    %c0_i32 = arith.constant 0 : i32
    %c0_i32_0 = arith.constant 0 : i32
    return %arg0, %arg1, %c0_i32, %arg2 : i32, i32, i32, i32
  }
  func.func @transform_5(%arg0: i32, %arg1: i32, %arg2: i32, %arg3: memref<48xf32, #tpu.memory_space<smem>>) -> (i32, i32, i32, i32) {
    %c0_i32 = arith.constant 0 : i32
    %c0_i32_0 = arith.constant 0 : i32
    %c0_i32_1 = arith.constant 0 : i32
    return %arg0, %arg1, %c0_i32, %c0_i32_0 : i32, i32, i32, i32
  }
  func.func @transform_6(%arg0: i32, %arg1: i32, %arg2: i32, %arg3: memref<48xf32, #tpu.memory_space<smem>>) -> (i32, i32, i32, i32) {
    %c0_i32 = arith.constant 0 : i32
    %c0_i32_0 = arith.constant 0 : i32
    return %arg0, %arg1, %c0_i32, %arg2 : i32, i32, i32, i32
  }
}

</mosaic_0001>

<bundles_post_ra>
// kernel: tpu_custom_call.1
= control target key start
LH: loop header
LB: loop body
LE: loop exit
PB: predicated region body
PF: predicated region fallthrough
CT: control target
= control target key end

     0   :  { %s5663_s27 = smov [#allocation4]   ;;  %s8384_s0 = inlined_call_operand.vmem [shape: f32[48], index: 0, kind: input, shape index: {}]   ;;  %s8385_s1 = inlined_call_operand.vmem [shape: f32[2,4096], index: 1, kind: input, shape index: {}]   ;;  %s8386_s2 = inlined_call_operand.vmem [shape: f32[2,3,4096], index: 2, kind: input, shape index: {}]   ;;  %s8387_s3 = inlined_call_operand.vmem [shape: bf16[2,2,192,64], index: 3, kind: input, shape index: {}]   ;;  %s8388_s4 = inlined_call_operand.vmem [shape: f32[2,1,4096], index: 4, kind: input, shape index: {}]   ;;  %s8389_s5 = inlined_call_operand.vmem [shape: f32[2,2,1,4096], index: 5, kind: input, shape index: {}]   ;;  %s8390_s6 = inlined_call_operand.vmem [shape: f32[2,2,1,1], index: 6, kind: output, shape index: {0}]   ;;  %s8391_s7 = inlined_call_operand.hbm [shape: f32[2,2,2,4096], index: 7, kind: output, shape index: {1}]  }
   0x1   :  { %8524 = sst [smem:[#allocation61_spill]] %s8385_s1  ;;  %s14_s26 = sshll.u32 %s8384_s0, 4  ;;  %s15_s26 = int_to_ptr.vmem [resolvable:$true] %s14_s26 }
   0x2   :  { %8525 = sst [smem:[#allocation62_spill]] %s8386_s2 }
   0x3   :  { %8526 = sst [smem:[#allocation63_spill]] %s8388_s4 }
   0x4   :  { %8527 = sst [smem:[#allocation64_spill]] %s8391_s7 }
   0x5   :  { %17 = dma.vmem_to_smem %s15_s26, 16, %s5663_s27, [#allocation3] }
   0x6   :  { %5617 = dma.done.wait [#allocation3], 16 }
   0x7   :  { %5618 = vsyncadd [#allocation3], 4294967280 }
   0x8   :  { %20 = sfence }
   0x9   :  { %21 = vsyncpa [#allocation6], 0 }
   0xa   :  { %23 = vsyncpa [#allocation6 + $0x1], 0  ;;  %s5713_s28 = smov 0   ;;  %s5715_s29 = smov 0  }
   0xb   :  { %s5717_s30 = smov 0   ;;  %s5719_s8 = smov 0  }
   0xc   :  { %s5721_s9 = smov 0   ;;  %s5723_s10 = smov 0  }
   0xd   :  { %s5725_s0 = smov 0   ;;  %s5727_s11 = smov 0  }
   0xe   :  { %s5729_s12 = smov 0   ;;  %s5731_s13 = smov 0  }
   0xf LB: > { %8528 = sst [smem:[#allocation9_spill]] %s5625_s28  ;;  %s5047_s14 = sadd.s32 4294967295, %s5661_s13   ;;  %s5661_s13 = sphi %s5731_s13, %s29_s13   ;;  %s5657_s12 = sphi %s5729_s12, %s8740_s12   ;;  %s5653_s11 = sphi %s5727_s11, %s8739_s11   ;;  %s5649_s0 = sphi %s5725_s0, %s8738_s0   ;;  %s5645_s10 = sphi %s5723_s10, %s8737_s10   ;;  %s5641_s9 = sphi %s5721_s9, %s8736_s9   ;;  %s5637_s8 = sphi %s5719_s8, %s8735_s8   ;;  %s5633_s30 = sphi %s5717_s30, %s8734_s30   ;;  %s5629_s29 = sphi %s5715_s29, %s8733_s29   ;;  %s5625_s28 = sphi %s5713_s28, %s8732_s28  }
  0x10   : > { %8529 = sst [smem:[#allocation10_spill]] %s5629_s29  ;;  %s41_s15 = sadd.s32 1, %s5649_s0 }
  0x11   : > { %8530 = sst [smem:[#allocation11_spill]] %s5633_s30  ;;  %p42_p0 = scmp.ge.s32.totalorder %s41_s15, 2 }
  0x12   : > { %8531 = sst [smem:[#allocation12_spill]] %s5649_s0  ;;  %s44_s16 = sadd.s32 1, %s5653_s11 }
  0x13   : > { %8532 = sst [smem:[#allocation13_spill]] %s5653_s11  ;;  %s5048_s17 = sadd.s32 4294967294, %s5661_s13  }
  0x14   : > { %8533 = sst [smem:[#allocation14_spill]] %s5657_s12  ;;  %p237_p1 = scmp.ne.s32.totalorder %s5633_s30, %s5629_s29 }
  0x15   : > { %8534 = sst [smem:[#allocation15_spill]] %s5661_s13  ;;  %s8742_s15 = smov (%p42_p0, %s41_s15), 0 }
  0x16   : > { %8535 = sst [smem:[#allocation16_spill]] %s8742_s15  ;;  %s8744_s16 = smov (!%p42_p0, %s44_s16), %s5653_s11 }
  0x17   : > { %s48_s18 = sadd.s32 1, %s5657_s12  ;;  %p238_p2 = scmp.eq.s32.totalorder %s5047_s14, 7 }
  0x18   : > { %p46_p3 = scmp.ge.s32.totalorder %s8744_s16, 2  ;;  %p243_p4 = scmp.ne.s32.totalorder %s5629_s29, %s5625_s28 }
  0x19   : > { %p5775_p5 = por %p238_p2, %p237_p1  ;;  %p244_p6 = scmp.eq.s32.totalorder %s5048_s17, 7 }
  0x1a   : > { %s8746_s16 = smov (%p46_p3, %s8744_s16), 0  ;;  %s8748_s18 = smov (!%p46_p3, %s48_s18), %s5657_s12 }
  0x1b   : > { %s8536_s19 = scalar_select %p5775_p5, 1, 0 }
  0x1c   : > { %8538 = sst [smem:[#allocation18_spill]] %s8746_s16  ;;  %p5782_p7 = por %p244_p6, %p243_p4 }
  0x1d   : > { %8537 = sst [smem:[#allocation17_spill]] %s8536_s19  ;;  %p50_p8 = scmp.ge.s32.totalorder %s8748_s18, 2 }
  0x1e   : > { %s8539_s20 = scalar_select %p5782_p7, 1, 0 }
  0x1f   : > { %p5051_p9 = scmp.ge.s32.totalorder %s5661_s13, 1  ;;  %s221_s21 = ssub.s32 %s5653_s11, %s8746_s16 }
  0x20   : > { %8540 = sst [smem:[#allocation19_spill]] %s8539_s20  ;;  %p324_p10 = scmp.lt.s32.totalorder %s5661_s13, 9 }
  0x21   : > { %s8750_s18 = smov (%p50_p8, %s8748_s18), 0  ;;  %s223_s22 = ssub.s32 %s5649_s0, %s8742_s15 }
  0x22   : > { %8541 = sst [smem:[#allocation20_spill]] %s8750_s18  ;;  %p325_p11 = pnand %p5051_p9, %p324_p10 }
  0x23   : > { %s220_s23 = ssub.s32 %s5657_s12, %s8750_s18  ;;  %s227_s26 = sadd.s32 1, %s5633_s30 }
  0x24   : > { %s222_s24 = sor.u32 %s221_s21, %s220_s23 }
  0x25   : > { %s224_s25 = sor.u32 %s223_s22, %s222_s24 }
  0x26   : > { %p225_p12 = scmp.eq.s32.totalorder %s224_s25, 0  ;;  %328 = sbr.rel (%p325_p11) target bundleno = 1338 (0x53a), region = 40 }
  0x28   : > { %s5798_s27 = scalar_select %p225_p12, %s5633_s30, %s227_s26  }
  0x2a   : > { %8542 = sst [smem:[#allocation21_spill]] %s5798_s27 }
  0x2b   : > { %s8398_s14 = sand.u32 1, %s5629_s29   ;;  %s5802_s17 = sshll.u32 %s5637_s8, 4 }
  0x2c   : > { %s5052_s21 = sshll.u32 %s8398_s14, 5  ;;  %p400_p13 = scmp.lt.s32.totalorder %s5802_s17, 31 }
  0x2d   : > { %p406_p0 = scmp.lt.s32.totalorder %s5645_s10, 1  ;;  %p415_p1 = scmp.lt.s32.totalorder %s5641_s9, 1 }
  0x2e   : > { %s401_s22 = scalar_select %p400_p13, %s5802_s17, 31 }
  0x2f   : > { %s407_s23 = scalar_select %p406_p0, %s5645_s10, 1 }
  0x30   : > { %s5054_s24 = sshll.u32 %s401_s22, 1  ;;  %s8543_s1 = sld [smem:[#allocation61_spill]] }
  0x31   : > { %s5056_s16 = sshll.u32 %s407_s23, 5  ;;  %s8544_s4 = sld [smem:[#allocation63_spill]] }
  0x32   : > { %s411_s15 = sadd.s32 %s5056_s16, %s401_s22  ;;  %s8545_s2 = sld [smem:[#allocation62_spill]] }
  0x33   : > { %s5057_s12 = sshll.u32 %s411_s15, 2  ;;  %s5394_s28 = smul.u32 24, %s407_s23 }
  0x34   : > { %s416_s13 = scalar_select %p415_p1, %s5641_s9, 1 }
  0x35   : > { %s5063_s7 = sshll.u32 %s407_s23, 6  ;;  %s5064_s19 = sshll.u32 %s407_s23, 1 }
  0x36   : > { %s5814_s18 = scalar_lea.vmem %s8543_s1, %s5054_s24  ;;  %s5395_s25 = smul.u32 48, %s416_s13 }
  0x37   : > { %s5819_s27 = scalar_lea.vmem %s8544_s4, %s411_s15  ;;  %s5062_s24 = sshll.u32 %s416_s13, 5 }
  0x38   : > { %s5824_s20 = scalar_lea.vmem %s8545_s2, %s5057_s12  ;;  %s441_s26 = sadd.s32 %s5062_s24, %s401_s22 }
  0x39   : > { %s5827_s1 = sadd.s32 %s5064_s19, %s416_s13  ;;  %s421_s16 = sadd.s32 %s5395_s25, %s5394_s28 }
  0x3a   : > { %s443_s29 = sadd.s32 %s5063_s7, %s441_s26  ;;  %s5058_s0 = sshll.u32 %s421_s16, 2 }
  0x3b   : > { %s5832_s4 = scalar_lea.vmem %s8389_s5, %s443_s29  ;;  %s5837_s14 = scalar_lea.vmem %s8387_s3, %s5058_s0 }
  0x3c   : > { %s452_s22 = scalar_lea.vmem %s8390_s6, %s5827_s1  ;;  %s5843_s13 = scalar_lea.vmem [#allocation5], %s5052_s21 }
  0x3d   : > { %p5065_p2 = scmp.ne.s32.totalorder %s5637_s8, 0 }
  0x3f   : > { %458 = sbr.rel (%p5065_p2) target bundleno = 71 (0x47), region = 44 }
  0x44   : > { %v5664_v0 = vmov 0.0  }
  0x45   : > { %459 = vst [vmem:[#allocation2] sm:$0xff] %v5664_v0 }
  0x46   : > { %460 = vst [vmem:[#allocation2 + $0x8] sm:$0xff] %v5664_v0 }
  0x47 PF: > { %s5069_s7 = sshll.u32 %s5645_s10, 1  ;;  %v5066_v1 = vld [vmem:[%s5814_s18 + $0x10] ss:$2 sm:$0xff]  ;;  %v5068_v3 = vld [vmem:[%s5814_s18 + $0x11] ss:$2 sm:$0xff]  ;;  %v469_v18 = vld [vmem:[%s5819_s27 + $0x8] sm:$0xff]  ;;  %v718_v48 = vlaneseq }
  0x48   : > { %s471_s28 = sadd.s32 %s5641_s9, %s5069_s7  ;;  %v461_v7 = vld [vmem:[%s5814_s18] ss:$2 sm:$0xff]  ;;  %v5067_v9 = vld [vmem:[%s5814_s18 + $0x1] ss:$2 sm:$0xff]  ;;  %vm1975_vm4 = vcmask 523264   ;;  %vm699_vm9 = vcmask 1043456  }
  0x49   : > { %s5848_s29 = smul.u32 12, %s471_s28  ;;  %v468_v29 = vld [vmem:[%s5819_s27] sm:$0xff]  ;;  %v719_v53 = vshrl.u32 %v718_v48, 7  ;;  %p5374_p3 = scmp.ne.s32.totalorder %s5637_s8, 1 }
  0x4b   : > { %s5851_s2 = sld [smem:[#allocation4 + %s5848_s29]]  ;;  %s474_s19 = sadd.s32 1, %s5848_s29  ;;  %v725_v58 = vadd.s32 48, %v719_v53  ;;  %v726_v61 = vadd.s32 56, %v719_v53  ;;  %v723_v62 = vadd.s32 32, %v719_v53  ;;  %v724_v63 = vadd.s32 40, %v719_v53 }
  0x4c   : > { %s5854_s21 = sld [smem:[#allocation4 + %s474_s19]]  ;;  %s476_s25 = sadd.s32 2, %s5848_s29 }
  0x4d   : > { %s5857_s24 = sld [smem:[#allocation4 + %s476_s25]]  ;;  %s478_s26 = sadd.s32 3, %s5848_s29 }
  0x4e   : > { %s5860_s16 = sld [smem:[#allocation4 + %s478_s26]]  ;;  %s480_s0 = sadd.s32 4, %s5848_s29 }
  0x4f   : > { %s5863_s11 = sld [smem:[#allocation4 + %s480_s0]]  ;;  %s482_s15 = sadd.s32 5, %s5848_s29 }
  0x50   : > { %s5866_s30 = sld [smem:[#allocation4 + %s482_s15]]  ;;  %s484_s12 = sadd.s32 6, %s5848_s29 }
  0x51   : > { %s485_s23 = sld [smem:[#allocation4 + %s484_s12]]  ;;  %s486_s7 = sadd.s32 7, %s5848_s29  ;;  %v496_v2 = vstv %s5851_s2 }
  0x52   : > { %s487_s28 = sld [smem:[#allocation4 + %s486_s7]]  ;;  %s488_s19 = sadd.s32 8, %s5848_s29  ;;  %v498_v4 = vmul.f32 %v5066_v1, %v496_v2  ;;  %v499_v5 = vstv %s5854_s21  ;;  %v497_v41 = vmul.f32 %v496_v2, %v461_v7  ;;  %v721_v2 = vadd.s32 16, %v719_v53 }
  0x53   : > { %s5875_s25 = sld [smem:[#allocation4 + %s488_s19]]  ;;  %s490_s26 = sadd.s32 9, %s5848_s29  ;;  %v501_v6 = vmul.f32 %v5068_v3, %v499_v5  ;;  %v504_v13 = vstv %s5857_s24  ;;  %v500_v42 = vmul.f32 %v5067_v9, %v499_v5 }
  0x54   : > { %s5879_s0 = sld [smem:[#allocation4 + %s490_s26]]  ;;  %s492_s15 = sadd.s32 10, %s5848_s29  ;;  %v8411_v8 = vstv %s5860_s16 }
  0x55   : > { %s5884_s2 = sld [smem:[#allocation4 + %s492_s15]]  ;;  %s494_s12 = sadd.s32 11, %s5848_s29  ;;  %v503_v10 = vadd.f32 %v501_v6, %v498_v4  ;;  %v513_v11 = vmul.f32 %v8411_v8, %v461_v7  ;;  %v8410_v12 = vstv %s5863_s11  ;;  %v502_v46 = vadd.f32 %v500_v42, %v497_v41 }
  0x56   : > { %s5890_s21 = sld [smem:[#allocation4 + %s494_s12]]  ;;  %v516_v14 = vmul.f32 %v5067_v9, %v8410_v12  ;;  %v8409_v16 = vstv %s5866_s30  ;;  %v720_v4 = vadd.s32 8, %v719_v53 }
  0x57   : > { %v506_v15 = vadd.f32 %v504_v13, %v503_v10  ;;  %v528_v17 = vstv %s485_s23  ;;  %v505_v47 = vadd.f32 %v504_v13, %v502_v46  ;;  %v5918_v10 = vcvt.s32.f32 %v723_v62 }
  0x58   : > { %v518_v19 = vadd.f32 %v516_v14, %v513_v11  ;;  %v529_v20 = vmul.f32 %v528_v17, %v461_v7  ;;  %v530_v21 = vmul.f32 %v5066_v1, %v528_v17  ;;  %v531_v22 = vstv %s487_s28 }
  0x59   : > { %v508_v23 = vmul.f32 %v506_v15, %v469_v18  ;;  %v532_v24 = vmul.f32 %v5067_v9, %v531_v22  ;;  %v533_v25 = vmul.f32 %v5068_v3, %v531_v22  ;;  %v536_v28 = vstv %s5875_s25  ;;  %8550 = vst [vmem:[#allocation26_spill] sm:$0xff] %v5918_v10 }
  0x5a   : > { %v509_v26 = vstv %s5879_s0  ;;  %v521_v27 = vadd.f32 %v8409_v16, %v518_v19  ;;  %v507_v51 = vmul.f32 %v505_v47, %v468_v29  ;;  %v722_v3 = vadd.s32 24, %v719_v53 }
  0x5b   : > { %v5902_v30 = vadd.f32 %v509_v26, %v508_v23  ;;  %v8408_v31 = vstv %s5884_s2  ;;  %v534_v32 = vadd.f32 %v532_v24, %v529_v20  ;;  %v535_v34 = vadd.f32 %v533_v25, %v530_v21 }
  0x5c   : > { %v523_v33 = vmul.f32 %v521_v27, %v468_v29  ;;  %v541_v38 = vstv %s5890_s21  ;;  %v510_v59 = vadd.f32 %v509_v26, %v507_v51  ;;  %v5914_v7 = vcvt.s32.f32 %v725_v58 }
  0x5d   : > { %v537_v35 = vadd.f32 %v536_v28, %v534_v32  ;;  %v538_v37 = vadd.f32 %v536_v28, %v535_v34  ;;  %v5916_v9 = vcvt.s32.f32 %v726_v61  ;;  %v5920_v11 = vcvt.s32.f32 %v724_v63 }
  0x5e   : > { %v526_v36 = vadd.f32 %v8408_v31, %v523_v33  ;;  %8548 = vst [vmem:[#allocation24_spill] sm:$0xff] %v5914_v7  ;;  %v5936_v19 = vcvt.s32.f32 %v722_v3  ;;  %v5938_v20 = vcvt.s32.f32 %v719_v53  ;;  %v5940_v21 = vcvt.s32.f32 %v720_v4 }
  0x5f   : > { %v539_v39 = vmul.f32 %v537_v35, %v468_v29  ;;  %v540_v40 = vmul.f32 %v538_v37, %v469_v18  ;;  %8549 = vst [vmem:[#allocation25_spill] sm:$0xff] %v5916_v9  ;;  %v5934_v18 = vcvt.s32.f32 %v721_v2 }
  0x60   : > { %8551 = vst [vmem:[#allocation27_spill] sm:$0xff] %v5920_v11 }
  0x61   : > { %v542_v43 = vadd.f32 %v541_v38, %v539_v39  ;;  %v5908_v44 = vadd.f32 %v541_v38, %v540_v40  ;;  %8552 = vst [vmem:[#allocation28_spill] sm:$0xff] %v5934_v18 }
  0x62   : > { %8553 = vst [vmem:[#allocation29_spill] sm:$0xff] %v5936_v19 }
  0x63   : > { %v544_v45 = vmax.f32 %v542_v43, 0.001  ;;  %8554 = vst [vmem:[#allocation30_spill] sm:$0xff] %v5938_v20 }
  0x64   : > { %8555 = vst [vmem:[#allocation31_spill] sm:$0xff] %v5940_v21 }
  0x65   : > { %5492 = vrcp.f32 %v544_v45  ;;  %v557_v52 = vand.u32 2147483648, %v544_v45  ;;  %vm551_vm0 = vweird.f32 %v544_v45  ;;  %v555_v55 = vand.u32 2147483647, %v544_v45 }
  0x67   : > { %v558_v57 = vor.u32 1.1754944e-38, %v557_v52  ;;  %vm556_vm3 = vcmp.eq.f32.partialorder %v555_v55, 8.507059e+37 }
  0x6b   : > { %v5493_v49 = vpop.eup %5492 }
  0x6c   : > { %v547_v50 = vmul.f32 %v5493_v49, %v544_v45  ;;  %vm552_vm1 = vweird.f32 %v5493_v49 }
  0x6d   : > { %vm553_vm2 = vmor %vm551_vm0, %vm552_vm1 }
  0x6e   : > { %v548_v54 = vsub.f32 1.0, %v547_v50 }
  0x70   : > { %v549_v56 = vmul.f32 %v5493_v49, %v548_v54 }
  0x72   : > { %v550_v60 = vadd.f32 %v5493_v49, %v549_v56 }
  0x74   : > { %v554_v0 = vsel %vm553_vm2, %v5493_v49, %v550_v60 }
  0x75   : > { %v559_v1 = vsel %vm556_vm3, %v558_v57, %v554_v0 }
  0x76   : > { %v5910_v5 = vmul.f32 %v559_v1, %v510_v59  ;;  %v5912_v6 = vmul.f32 %v559_v1, %v526_v36 }
  0x78   : > { %8546 = vst [vmem:[#allocation22_spill] sm:$0xff] %v5910_v5  ;;  %v5923_v13 = vperm.slane %v5910_v5, 0  ;;  %v5926_v14 = vperm.slane %v5910_v5, 1  ;;  %v5929_v15 = vperm.slane %v5910_v5, 2  ;;  %v5932_v17 = vperm.slane %v5910_v5, 3 }
  0x79   : > { %8547 = vst [vmem:[#allocation23_spill] sm:$0xff] %v5912_v6 }
  0x7a   : > { %v865_v22 = vsub.f32 %v5914_v7, %v5923_v13  ;;  %v881_v23 = vsub.f32 %v5916_v9, %v5923_v13  ;;  %v866_v24 = vsub.f32 %v5914_v7, %v5926_v14  ;;  %v882_v25 = vsub.f32 %v5916_v9, %v5926_v14 }
  0x7b   : > { %v867_v26 = vsub.f32 %v5914_v7, %v5929_v15  ;;  %v883_v27 = vsub.f32 %v5916_v9, %v5929_v15  ;;  %v868_v28 = vsub.f32 %v5914_v7, %v5932_v17  ;;  %v884_v29 = vsub.f32 %v5916_v9, %v5932_v17 }
  0x7c   : > { %v993_v32 = vand.u32 2147483647, %v865_v22  ;;  %v1009_v33 = vand.u32 2147483647, %v881_v23  ;;  %v994_v34 = vand.u32 2147483647, %v866_v24  ;;  %v833_v35 = vsub.f32 %v5918_v10, %v5923_v13 }
  0x7d   : > { %v1010_v36 = vand.u32 2147483647, %v882_v25  ;;  %v995_v37 = vand.u32 2147483647, %v867_v26  ;;  %v1011_v38 = vand.u32 2147483647, %v883_v27  ;;  %v849_v39 = vsub.f32 %v5920_v11, %v5923_v13 }
  0x7e   : > { %v1121_v40 = vsub.f32 1.0, %v993_v32  ;;  %v1137_v41 = vsub.f32 1.0, %v1009_v33  ;;  %v1122_v42 = vsub.f32 1.0, %v994_v34  ;;  %v996_v43 = vand.u32 2147483647, %v868_v28 }
  0x7f   : > { %v1138_v45 = vsub.f32 1.0, %v1010_v36  ;;  %v1123_v46 = vsub.f32 1.0, %v995_v37  ;;  %v1139_v47 = vsub.f32 1.0, %v1011_v38  ;;  %v1012_v48 = vand.u32 2147483647, %v884_v29 }
  0x80   : > { %v1249_v49 = vmax.f32 %v1121_v40, 0.0  ;;  %v1265_v50 = vmax.f32 %v1137_v41, 0.0  ;;  %v1250_v51 = vmax.f32 %v1122_v42, 0.0  ;;  %v1124_v52 = vsub.f32 1.0, %v996_v43 }
  0x81   : > { %v1266_v53 = vmax.f32 %v1138_v45, 0.0  ;;  %v1251_v54 = vmax.f32 %v1123_v46, 0.0  ;;  %v1267_v55 = vmax.f32 %v1139_v47, 0.0  ;;  %v1140_v56 = vsub.f32 1.0, %v1012_v48 }
  0x82   : > { %v1899_v57 = vpack.c.bf16 %v1265_v50, %v1249_v49  ;;  %v1252_v58 = vmax.f32 %v1124_v52, 0.0  ;;  %v961_v59 = vand.u32 2147483647, %v833_v35  ;;  %v977_v60 = vand.u32 2147483647, %v849_v39 }
  0x83   : > { %v1900_v61 = vpack.c.bf16 %v1266_v53, %v1250_v51  ;;  %v1901_v62 = vpack.c.bf16 %v1267_v55, %v1251_v54  ;;  %v1268_v63 = vmax.f32 %v1140_v56, 0.0  ;;  %v834_v0 = vsub.f32 %v5918_v10, %v5926_v14 }
  0x84   : > { %2016 = vmatpush.bf16.msra.mxu0 %v1899_v57  ;;  %v1089_v1 = vsub.f32 1.0, %v961_v59  ;;  %v1105_v2 = vsub.f32 1.0, %v977_v60  ;;  %v850_v3 = vsub.f32 %v5920_v11, %v5926_v14  ;;  %v835_v4 = vsub.f32 %v5918_v10, %v5929_v15 }
  0x85   : > { %2085 = vmatpush.bf16.msra.mxu1 %v1900_v61  ;;  %2154 = vmatpush.bf16.msra.mxu2 %v1901_v62  ;;  %v1902_v22 = vpack.c.bf16 %v1268_v63, %v1252_v58  ;;  %v962_v23 = vand.u32 2147483647, %v834_v0  ;;  %v851_v24 = vsub.f32 %v5920_v11, %v5929_v15  ;;  %v836_v25 = vsub.f32 %v5918_v10, %v5932_v17 }
  0x86   : > { %v1217_v26 = vmax.f32 %v1089_v1, 0.0  ;;  %v1233_v27 = vmax.f32 %v1105_v2, 0.0  ;;  %v978_v28 = vand.u32 2147483647, %v850_v3  ;;  %v963_v29 = vand.u32 2147483647, %v835_v4 }
  0x87   : > { %2223 = vmatpush.bf16.msra.mxu3 %v1902_v22  ;;  %v1090_v32 = vsub.f32 1.0, %v962_v23  ;;  %v979_v33 = vand.u32 2147483647, %v851_v24  ;;  %v852_v34 = vsub.f32 %v5920_v11, %v5932_v17  ;;  %v964_v35 = vand.u32 2147483647, %v836_v25 }
  0x88   : > { %v1883_v36 = vpack.c.bf16 %v1233_v27, %v1217_v26  ;;  %v1106_v37 = vsub.f32 1.0, %v978_v28  ;;  %v1091_v38 = vsub.f32 1.0, %v963_v29  ;;  %v801_v39 = vsub.f32 %v5934_v18, %v5923_v13 }
  0x89   : > { %v1218_v40 = vmax.f32 %v1090_v32, 0.0  ;;  %v1107_v41 = vsub.f32 1.0, %v979_v33  ;;  %v980_v42 = vand.u32 2147483647, %v852_v34  ;;  %v1092_v43 = vsub.f32 1.0, %v964_v35 }
  0x8a   : > { %2017 = vmatpush.bf16.msra.mxu0 %v1883_v36  ;;  %v1234_v45 = vmax.f32 %v1106_v37, 0.0  ;;  %v1219_v46 = vmax.f32 %v1091_v38, 0.0  ;;  %v817_v47 = vsub.f32 %v5936_v19, %v5923_v13  ;;  %v929_v48 = vand.u32 2147483647, %v801_v39 }
  0x8b   : > { %v1235_v49 = vmax.f32 %v1107_v41, 0.0  ;;  %v1108_v50 = vsub.f32 1.0, %v980_v42  ;;  %v1220_v51 = vmax.f32 %v1092_v43, 0.0  ;;  %v802_v52 = vsub.f32 %v5934_v18, %v5926_v14 }
  0x8c   : > { %v1884_v53 = vpack.c.bf16 %v1234_v45, %v1218_v40  ;;  %v945_v54 = vand.u32 2147483647, %v817_v47  ;;  %v1057_v55 = vsub.f32 1.0, %v929_v48  ;;  %v818_v56 = vsub.f32 %v5936_v19, %v5926_v14 }
  0x8d   : > { %v1885_v57 = vpack.c.bf16 %v1235_v49, %v1219_v46  ;;  %v1236_v58 = vmax.f32 %v1108_v50, 0.0  ;;  %v930_v59 = vand.u32 2147483647, %v802_v52  ;;  %v803_v60 = vsub.f32 %v5934_v18, %v5929_v15 }
  0x8e   : > { %2086 = vmatpush.bf16.msra.mxu1 %v1884_v53  ;;  %v1073_v61 = vsub.f32 1.0, %v945_v54  ;;  %v1185_v62 = vmax.f32 %v1057_v55, 0.0  ;;  %v946_v63 = vand.u32 2147483647, %v818_v56  ;;  %v819_v0 = vsub.f32 %v5936_v19, %v5929_v15 }
  0x8f   : > { %2155 = vmatpush.bf16.msra.mxu2 %v1885_v57  ;;  %v1886_v1 = vpack.c.bf16 %v1236_v58, %v1220_v51  ;;  %v1058_v2 = vsub.f32 1.0, %v930_v59  ;;  %v931_v3 = vand.u32 2147483647, %v803_v60  ;;  %v804_v4 = vsub.f32 %v5934_v18, %v5932_v17 }
  0x90   : > { %v1201_v22 = vmax.f32 %v1073_v61, 0.0  ;;  %v1074_v23 = vsub.f32 1.0, %v946_v63  ;;  %v947_v24 = vand.u32 2147483647, %v819_v0  ;;  %v820_v25 = vsub.f32 %v5936_v19, %v5932_v17 }
  0x91   : > { %2224 = vmatpush.bf16.msra.mxu3 %v1886_v1  ;;  %v1186_v26 = vmax.f32 %v1058_v2, 0.0  ;;  %v1059_v27 = vsub.f32 1.0, %v931_v3  ;;  %v932_v28 = vand.u32 2147483647, %v804_v4  ;;  %v769_v29 = vsub.f32 %v5938_v20, %v5923_v13 }
  0x92   : > { %v1867_v32 = vpack.c.bf16 %v1201_v22, %v1185_v62  ;;  %v1202_v33 = vmax.f32 %v1074_v23, 0.0  ;;  %v1075_v34 = vsub.f32 1.0, %v947_v24  ;;  %v948_v35 = vand.u32 2147483647, %v820_v25  ;;  %v6007_v24 = vld [vmem:[%s5837_s14] sm:$0xff] }
  0x93   : > { %v1187_v36 = vmax.f32 %v1059_v27, 0.0  ;;  %v1060_v37 = vsub.f32 1.0, %v932_v28  ;;  %v785_v38 = vsub.f32 %v5940_v21, %v5923_v13  ;;  %v897_v39 = vand.u32 2147483647, %v769_v29 }
  0x94   : > { %2018 = vmatpush.bf16.msra.mxu0 %v1867_v32  ;;  %v1868_v40 = vpack.c.bf16 %v1202_v33, %v1186_v26  ;;  %v1203_v41 = vmax.f32 %v1075_v34, 0.0  ;;  %v1076_v42 = vsub.f32 1.0, %v948_v35  ;;  %v770_v43 = vsub.f32 %v5938_v20, %v5926_v14 }
  0x95   : > { %v1188_v45 = vmax.f32 %v1060_v37, 0.0  ;;  %v913_v46 = vand.u32 2147483647, %v785_v38  ;;  %v1025_v47 = vsub.f32 1.0, %v897_v39  ;;  %v786_v48 = vsub.f32 %v5940_v21, %v5926_v14 }
  0x96   : > { %2087 = vmatpush.bf16.msra.mxu1 %v1868_v40  ;;  %v1869_v49 = vpack.c.bf16 %v1203_v41, %v1187_v36  ;;  %v1204_v50 = vmax.f32 %v1076_v42, 0.0  ;;  %v898_v51 = vand.u32 2147483647, %v770_v43  ;;  %v771_v13 = vsub.f32 %v5938_v20, %v5929_v15 }
  0x97   : > { %v1041_v52 = vsub.f32 1.0, %v913_v46  ;;  %v1153_v53 = vmax.f32 %v1025_v47, 0.0  ;;  %v914_v54 = vand.u32 2147483647, %v786_v48  ;;  %v787_v55 = vsub.f32 %v5940_v21, %v5929_v15 }
  0x98   : > { %2156 = vmatpush.bf16.msra.mxu2 %v1869_v49  ;;  %v1870_v56 = vpack.c.bf16 %v1204_v50, %v1188_v45  ;;  %v1026_v57 = vsub.f32 1.0, %v898_v51  ;;  %v899_v58 = vand.u32 2147483647, %v771_v13  ;;  %v772_v14 = vsub.f32 %v5938_v20, %v5932_v17 }
  0x99   : > { %v1169_v59 = vmax.f32 %v1041_v52, 0.0  ;;  %v1042_v60 = vsub.f32 1.0, %v914_v54  ;;  %v915_v61 = vand.u32 2147483647, %v787_v55  ;;  %v788_v62 = vsub.f32 %v5940_v21, %v5932_v17 }
  0x9a   : > { %2225 = vmatpush.bf16.msra.mxu3 %v1870_v56  ;;  %v1154_v63 = vmax.f32 %v1026_v57, 0.0  ;;  %v1027_v0 = vsub.f32 1.0, %v899_v58  ;;  %v900_v1 = vand.u32 2147483647, %v772_v14  ;;  %v6010_v25 = vperm.slane %v5910_v5, 7 }
  0x9b   : > { %v1851_v15 = vpack.c.bf16 %v1169_v59, %v1153_v53  ;;  %v1170_v2 = vmax.f32 %v1042_v60, 0.0  ;;  %v1043_v3 = vsub.f32 1.0, %v915_v61  ;;  %v916_v4 = vand.u32 2147483647, %v788_v62 }
  0x9c   : > { %v1155_v22 = vmax.f32 %v1027_v0, 0.0  ;;  %v1028_v23 = vsub.f32 1.0, %v900_v1  ;;  %v6013_v26 = vperm.slane %v5910_v5, 6  ;;  %v6016_v29 = vperm.slane %v5910_v5, 5 }
  0x9d   : > { %2019 = vmatpush.bf16.msra.mxu0 %v1851_v15  ;;  %v1852_v17 = vpack.c.bf16 %v1170_v2, %v1154_v63  ;;  %v1171_v27 = vmax.f32 %v1043_v3, 0.0  ;;  %v1044_v28 = vsub.f32 1.0, %v916_v4  ;;  %v872_v33 = vsub.f32 %v5914_v7, %v6010_v25 }
  0x9e   : > { %v1156_v32 = vmax.f32 %v1028_v23, 0.0  ;;  %v888_v34 = vsub.f32 %v5916_v9, %v6010_v25  ;;  %v871_v35 = vsub.f32 %v5914_v7, %v6013_v26  ;;  %v887_v38 = vsub.f32 %v5916_v9, %v6013_v26 }
  0x9f   : > { %2088 = vmatpush.bf16.msra.mxu1 %v1852_v17  ;;  %v1853_v36 = vpack.c.bf16 %v1171_v27, %v1155_v22  ;;  %v1172_v37 = vmax.f32 %v1044_v28, 0.0  ;;  %v870_v39 = vsub.f32 %v5914_v7, %v6016_v29  ;;  %v1000_v40 = vand.u32 2147483647, %v872_v33  ;;  %v6046_v17 = vld [vmem:[%s5837_s14 + $0x8] sm:$0xff] }
  0xa0   : > { %5118 = vmatmul.msk.bf16.vlgmr.msra.gmra.mxu0 %vm1975_vm4, %v6007_v24  ;;  %v1016_v41 = vand.u32 2147483647, %v888_v34  ;;  %v999_v42 = vand.u32 2147483647, %v871_v35  ;;  %v886_v43 = vsub.f32 %v5916_v9, %v6016_v29  ;;  %v1015_v46 = vand.u32 2147483647, %v887_v38 }
  0xa1   : > { %2157 = vmatpush.bf16.msra.mxu2 %v1853_v36  ;;  %v1854_v45 = vpack.c.bf16 %v1172_v37, %v1156_v32  ;;  %v998_v47 = vand.u32 2147483647, %v870_v39  ;;  %v6033_v48 = vperm.slane %v5910_v5, 4  ;;  %v1128_v49 = vsub.f32 1.0, %v1000_v40 }
  0xa2   : > { %5130 = vmatmul.msk.bf16.vlgmr.msra.gmra.mxu1 %vm1975_vm4, %v6007_v24  ;;  %v1144_v50 = vsub.f32 1.0, %v1016_v41  ;;  %v1127_v51 = vsub.f32 1.0, %v999_v42  ;;  %v1014_v13 = vand.u32 2147483647, %v886_v43  ;;  %v1143_v52 = vsub.f32 1.0, %v1015_v46 }
  0xa3   : > { %2226 = vmatpush.bf16.msra.mxu3 %v1854_v45  ;;  %v1126_v53 = vsub.f32 1.0, %v998_v47  ;;  %v869_v54 = vsub.f32 %v5914_v7, %v6033_v48  ;;  %v885_v55 = vsub.f32 %v5916_v9, %v6033_v48  ;;  %v1256_v56 = vmax.f32 %v1128_v49, 0.0 }
  0xa4   : > { %5142 = vmatmul.msk.bf16.vlgmr.msra.gmra.mxu2 %vm1975_vm4, %v6007_v24  ;;  %v1272_v57 = vmax.f32 %v1144_v50, 0.0  ;;  %v1255_v58 = vmax.f32 %v1127_v51, 0.0  ;;  %v1142_v14 = vsub.f32 1.0, %v1014_v13  ;;  %v1271_v59 = vmax.f32 %v1143_v52, 0.0 }
  0xa5   : > { %v1254_v60 = vmax.f32 %v1126_v53, 0.0  ;;  %v997_v61 = vand.u32 2147483647, %v869_v54  ;;  %v1013_v62 = vand.u32 2147483647, %v885_v55  ;;  %v840_v27 = vsub.f32 %v5918_v10, %v6010_v25  ;;  %v5384_v53 = vld [vmem:[%s5837_s14 + $0x10] sm:$0xff] }
  0xa6   : > { %5154 = vmatmul.msk.bf16.vlgmr.msra.gmra.mxu3 %vm1975_vm4, %v6007_v24  ;;  %v1906_v63 = vpack.c.bf16 %v1272_v57, %v1256_v56  ;;  %v1270_v0 = vmax.f32 %v1142_v14, 0.0  ;;  %v1905_v1 = vpack.c.bf16 %v1271_v59, %v1255_v58  ;;  %v856_v28 = vsub.f32 %v5920_v11, %v6010_v25 }
  0xa7   : > { %v1125_v15 = vsub.f32 1.0, %v997_v61  ;;  %v1141_v2 = vsub.f32 1.0, %v1013_v62  ;;  %v839_v32 = vsub.f32 %v5918_v10, %v6013_v26  ;;  %v855_v33 = vsub.f32 %v5920_v11, %v6013_v26 }
  0xa8   : > { %2499 = vmatpush.bf16.msrb.mxu3 %v1906_v63  ;;  %v1904_v3 = vpack.c.bf16 %v1270_v0, %v1254_v60  ;;  %2430 = vmatpush.bf16.msrb.mxu2 %v1905_v1  ;;  %v838_v34 = vsub.f32 %v5918_v10, %v6016_v29  ;;  %v854_v35 = vsub.f32 %v5920_v11, %v6016_v29  ;;  %v968_v38 = vand.u32 2147483647, %v840_v27 }
  0xa9   : > { %v1253_v4 = vmax.f32 %v1125_v15, 0.0  ;;  %v1269_v22 = vmax.f32 %v1141_v2, 0.0  ;;  %v837_v36 = vsub.f32 %v5918_v10, %v6033_v48  ;;  %v853_v37 = vsub.f32 %v5920_v11, %v6033_v48  ;;  %v5385_v2 = vld [vmem:[%s5837_s14 + $0x18] sm:$0xff] }
  0xaa   : > { %2361 = vmatpush.bf16.msrb.mxu1 %v1904_v3  ;;  %v984_v39 = vand.u32 2147483647, %v856_v28  ;;  %v967_v40 = vand.u32 2147483647, %v839_v32  ;;  %v983_v41 = vand.u32 2147483647, %v855_v33  ;;  %v823_v27 = vsub.f32 %v5936_v19, %v6013_v26 }
  0xab   : > { %v1903_v23 = vpack.c.bf16 %v1269_v22, %v1253_v4  ;;  %v966_v42 = vand.u32 2147483647, %v838_v34  ;;  %v982_v43 = vand.u32 2147483647, %v854_v35  ;;  %v1096_v45 = vsub.f32 1.0, %v968_v38  ;;  %v5386_v3 = vld [vmem:[%s5837_s14 + $0x20] sm:$0xff] }
  0xac   : > { %v1112_v46 = vsub.f32 1.0, %v984_v39  ;;  %v1095_v47 = vsub.f32 1.0, %v967_v40  ;;  %v965_v49 = vand.u32 2147483647, %v837_v36  ;;  %v1111_v50 = vsub.f32 1.0, %v983_v41 }
  0xad   : > { %2292 = vmatpush.bf16.msrb.mxu0 %v1903_v23  ;;  %v1094_v51 = vsub.f32 1.0, %v966_v42  ;;  %v1110_v13 = vsub.f32 1.0, %v982_v43  ;;  %v981_v52 = vand.u32 2147483647, %v853_v37  ;;  %v1224_v54 = vmax.f32 %v1096_v45, 0.0 }
  0xae   : > { %v1240_v55 = vmax.f32 %v1112_v46, 0.0  ;;  %v1223_v56 = vmax.f32 %v1095_v47, 0.0  ;;  %v1093_v57 = vsub.f32 1.0, %v965_v49  ;;  %v1239_v58 = vmax.f32 %v1111_v50, 0.0 }
  0xaf   : > { %v1222_v14 = vmax.f32 %v1094_v51, 0.0  ;;  %v1238_v59 = vmax.f32 %v1110_v13, 0.0  ;;  %v1109_v60 = vsub.f32 1.0, %v981_v52  ;;  %v808_v4 = vsub.f32 %v5934_v18, %v6010_v25  ;;  %v5387_v51 = vld [vmem:[%s5837_s14 + $0x28] sm:$0xff] }
  0xb0   : > { %5119 = vmatmul.msk.bf16.gmra.mxu0 %vm1975_vm4, %v6046_v17  ;;  %v1890_v61 = vpack.c.bf16 %v1240_v55, %v1224_v54  ;;  %v1221_v62 = vmax.f32 %v1093_v57, 0.0  ;;  %v1889_v63 = vpack.c.bf16 %v1239_v58, %v1223_v56  ;;  %v824_v22 = vsub.f32 %v5936_v19, %v6010_v25 }
  0xb1   : > { %v1888_v0 = vpack.c.bf16 %v1238_v59, %v1222_v14  ;;  %v1237_v1 = vmax.f32 %v1109_v60, 0.0  ;;  %v807_v23 = vsub.f32 %v5934_v18, %v6013_v26  ;;  %v806_v28 = vsub.f32 %v5934_v18, %v6016_v29 }
  0xb2   : > { %5131 = vmatmul.msk.bf16.gmra.mxu1 %vm1975_vm4, %v6046_v17  ;;  %2500 = vmatpush.bf16.msrb.mxu3 %v1890_v61  ;;  %v822_v32 = vsub.f32 %v5936_v19, %v6016_v29  ;;  %v805_v33 = vsub.f32 %v5934_v18, %v6033_v48  ;;  %v821_v34 = vsub.f32 %v5936_v19, %v6033_v48  ;;  %v936_v35 = vand.u32 2147483647, %v808_v4 }
  0xb3   : > { %2431 = vmatpush.bf16.msrb.mxu2 %v1889_v63  ;;  %2362 = vmatpush.bf16.msrb.mxu1 %v1888_v0  ;;  %v1887_v15 = vpack.c.bf16 %v1237_v1, %v1221_v62  ;;  %v952_v36 = vand.u32 2147483647, %v824_v22  ;;  %v935_v37 = vand.u32 2147483647, %v807_v23  ;;  %v951_v38 = vand.u32 2147483647, %v823_v27 }
  0xb4   : > { %5143 = vmatmul.msk.bf16.gmra.mxu2 %vm1975_vm4, %v6046_v17  ;;  %v934_v39 = vand.u32 2147483647, %v806_v28  ;;  %v950_v40 = vand.u32 2147483647, %v822_v32  ;;  %v1064_v41 = vsub.f32 1.0, %v936_v35  ;;  %v5388_v0 = vld [vmem:[%s5837_s14 + $0x30] sm:$0xff] }
  0xb5   : > { %2293 = vmatpush.bf16.msrb.mxu0 %v1887_v15  ;;  %v1080_v42 = vsub.f32 1.0, %v952_v36  ;;  %v1063_v43 = vsub.f32 1.0, %v935_v37  ;;  %v933_v45 = vand.u32 2147483647, %v805_v33  ;;  %v1079_v46 = vsub.f32 1.0, %v951_v38 }
  0xb6   : > { %5155 = vmatmul.msk.bf16.gmra.mxu3 %vm1975_vm4, %v6046_v17  ;;  %v1062_v47 = vsub.f32 1.0, %v934_v39  ;;  %v1078_v49 = vsub.f32 1.0, %v950_v40  ;;  %v949_v50 = vand.u32 2147483647, %v821_v34  ;;  %v1192_v13 = vmax.f32 %v1064_v41, 0.0 }
  0xb7   : > { %v1208_v52 = vmax.f32 %v1080_v42, 0.0  ;;  %v1061_v54 = vsub.f32 1.0, %v933_v45  ;;  %v1207_v55 = vmax.f32 %v1079_v46, 0.0  ;;  %v6114_v1 = vperm.slane %v5912_v6, 0 }
  0xb8   : > { %v1190_v56 = vmax.f32 %v1062_v47, 0.0  ;;  %v1206_v57 = vmax.f32 %v1078_v49, 0.0  ;;  %v1077_v58 = vsub.f32 1.0, %v949_v50  ;;  %v6117_v15 = vperm.slane %v5912_v6, 1 }
  0xb9   : > { %v1874_v14 = vpack.c.bf16 %v1208_v52, %v1192_v13  ;;  %v1189_v59 = vmax.f32 %v1061_v54, 0.0  ;;  %v6125_v22 = vperm.slane %v5912_v6, 3  ;;  %v6129_v28 = vperm.slane %v5912_v6, 2 }
  0xba   : > { %v1872_v61 = vpack.c.bf16 %v1206_v57, %v1190_v56  ;;  %v1205_v62 = vmax.f32 %v1077_v58, 0.0  ;;  %v1316_v4 = vsub.f32 %v5938_v20, %v6117_v15  ;;  %v1331_v33 = vsub.f32 %v5940_v21, %v6114_v1  ;;  %v5390_v58 = vld [vmem:[%s5837_s14 + $0x40] sm:$0xff] }
  0xbb   : > { %2501 = vmatpush.bf16.msrb.mxu3 %v1874_v14  ;;  %v1318_v32 = vsub.f32 %v5938_v20, %v6125_v22  ;;  %v1317_v36 = vsub.f32 %v5938_v20, %v6129_v28  ;;  %v776_v38 = vsub.f32 %v5938_v20, %v6010_v25  ;;  %v792_v39 = vsub.f32 %v5940_v21, %v6010_v25 }
  0xbc   : > { %2363 = vmatpush.bf16.msrb.mxu1 %v1872_v61  ;;  %v1871_v63 = vpack.c.bf16 %v1205_v62, %v1189_v59  ;;  %v1444_v27 = vand.u32 2147483647, %v1316_v4  ;;  %v775_v40 = vsub.f32 %v5938_v20, %v6013_v26  ;;  %v791_v41 = vsub.f32 %v5940_v21, %v6013_v26 }
  0xbd   : > { %v6139_v37 = vand.u32 2147483647, %v1318_v32  ;;  %v1459_v42 = vand.u32 2147483647, %v1331_v33  ;;  %v904_v45 = vand.u32 2147483647, %v776_v38  ;;  %v1333_v56 = vsub.f32 %v5940_v21, %v6129_v28 }
  0xbe   : > { %2294 = vmatpush.bf16.msrb.mxu0 %v1871_v63  ;;  %v1572_v35 = vsub.f32 1.0, %v1444_v27  ;;  %v920_v46 = vand.u32 2147483647, %v792_v39  ;;  %v903_v47 = vand.u32 2147483647, %v775_v40  ;;  %v1347_v14 = vsub.f32 %v5934_v18, %v6114_v1 }
  0xbf   : > { %v919_v25 = vand.u32 2147483647, %v791_v41  ;;  %v1574_v13 = vsub.f32 1.0, %v6139_v37  ;;  %v1032_v52 = vsub.f32 1.0, %v904_v45  ;;  %v1587_v26 = vsub.f32 1.0, %v1459_v42 }
  0xc0   : > { %5120 = vmatmul.msk.bf16.gmra.mxu0 %vm1975_vm4, %v5384_v53  ;;  %v6154_v50 = vmax.f32 %v1572_v35, 0.0  ;;  %v1031_v54 = vsub.f32 1.0, %v903_v47  ;;  %v789_v32 = vsub.f32 %v5940_v21, %v6033_v48  ;;  %v1334_v41 = vsub.f32 %v5940_v21, %v6125_v22 }
  0xc1   : > { %v1047_v57 = vsub.f32 1.0, %v919_v25  ;;  %v1160_v59 = vmax.f32 %v1032_v52, 0.0  ;;  %v6178_v45 = vmax.f32 %v1587_v26, 0.0  ;;  %v1475_v47 = vand.u32 2147483647, %v1347_v14 }
  0xc2   : > { %5132 = vmatmul.msk.bf16.gmra.mxu1 %vm1975_vm4, %v5384_v53  ;;  %v1159_v61 = vmax.f32 %v1031_v54, 0.0  ;;  %v917_v40 = vand.u32 2147483647, %v789_v32 }
  0xc3   : > { %v1175_v63 = vmax.f32 %v1047_v57, 0.0  ;;  %v1603_v14 = vsub.f32 1.0, %v1475_v47  ;;  %v6208_v47 = vmax.f32 %v5908_v44, 0.001  ;;  %v1380_v44 = vsub.f32 %v5918_v10, %v6117_v15 }
  0xc4   : > { %5144 = vmatmul.msk.bf16.gmra.mxu2 %vm1975_vm4, %v5384_v53  ;;  %v1045_v25 = vsub.f32 1.0, %v917_v40 }
  0xc5   : > { %v6200_v40 = vmax.f32 %v1603_v14, 0.0  ;;  %5494 = vrcp.f32 %v6208_v47  ;;  %vm566_vm5 = vweird.f32 %v6208_v47 }
  0xc6   : > { %5156 = vmatmul.msk.bf16.gmra.mxu3 %vm1975_vm4, %v5384_v53  ;;  %v1191_v53 = vmax.f32 %v1063_v43, 0.0  ;;  %v1332_v43 = vsub.f32 %v5940_v21, %v6117_v15 }
  0xc8   : > { %v1873_v60 = vpack.c.bf16 %v1207_v55, %v1191_v53  ;;  %v1048_v53 = vsub.f32 1.0, %v920_v46  ;;  %v1460_v55 = vand.u32 2147483647, %v1332_v43  ;;  %v1461_v46 = vand.u32 2147483647, %v1333_v56 }
  0xca   : > { %2432 = vmatpush.bf16.msrb.mxu2 %v1873_v60  ;;  %v1176_v60 = vmax.f32 %v1048_v53, 0.0  ;;  %v1588_v39 = vsub.f32 1.0, %v1460_v55 }
  0xcc   : > { %v1858_v27 = vpack.c.bf16 %v1176_v60, %v1160_v59  ;;  %v6183_v57 = vmax.f32 %v1588_v39, 0.0  ;;  %v1173_v59 = vmax.f32 %v1045_v25, 0.0  ;;  %v6185_v60 = vmax.f32 %v1574_v13, 0.0 }
  0xcd   : > { %v1349_v13 = vsub.f32 %v5934_v18, %v6129_v28 }
  0xce   : > { %2502 = vmatpush.bf16.msrb.mxu3 %v1858_v27 }
  0xd0   : > { %5121 = vmatmul.msk.bf16.gmra.mxu0 %vm1975_vm4, %v5385_v2 }
  0xd2   : > { %5133 = vmatmul.msk.bf16.gmra.mxu1 %vm1975_vm4, %v5385_v2 }
  0xd4   : > { %5145 = vmatmul.msk.bf16.gmra.mxu2 %vm1975_vm4, %v5385_v2 }
  0xd6   : > { %5157 = vmatmul.msk.bf16.gmra.mxu3 %vm1975_vm4, %v5385_v2  ;;  %v5389_v2 = vld [vmem:[%s5837_s14 + $0x38] sm:$0xff] }
  0xe0   : > { %5122 = vmatmul.msk.bf16.gmra.mxu0 %vm1975_vm4, %v5386_v3 }
  0xe2   : > { %5134 = vmatmul.msk.bf16.gmra.mxu1 %vm1975_vm4, %v5386_v3 }
  0xe4   : > { %5146 = vmatmul.msk.bf16.gmra.mxu2 %vm1975_vm4, %v5386_v3 }
  0xe6   : > { %5158 = vmatmul.msk.bf16.gmra.mxu3 %vm1975_vm4, %v5386_v3  ;;  %v1315_v3 = vsub.f32 %v5938_v20, %v6114_v1 }
  0xe8   : > { %v1443_v23 = vand.u32 2147483647, %v1315_v3  ;;  %v773_v3 = vsub.f32 %v5938_v20, %v6033_v48 }
  0xea   : > { %v1571_v34 = vsub.f32 1.0, %v1443_v23  ;;  %v1348_v23 = vsub.f32 %v5934_v18, %v6117_v15  ;;  %v901_v37 = vand.u32 2147483647, %v773_v3 }
  0xec   : > { %v6152_v49 = vmax.f32 %v1571_v34, 0.0  ;;  %v1857_v34 = vpack.c.bf16 %v1175_v63, %v1159_v61  ;;  %v1029_v48 = vsub.f32 1.0, %v901_v37  ;;  %v1476_v52 = vand.u32 2147483647, %v1348_v23 }
  0xed   : > { %v1363_v63 = vsub.f32 %v5936_v19, %v6114_v1  ;;  %v1589_v23 = vsub.f32 1.0, %v1461_v46  ;;  %v1350_v37 = vsub.f32 %v5934_v18, %v6125_v22 }
  0xee   : > { %2433 = vmatpush.bf16.msrb.mxu2 %v1857_v34  ;;  %v1157_v54 = vmax.f32 %v1029_v48, 0.0  ;;  %v1604_v27 = vsub.f32 1.0, %v1476_v52  ;;  %v1364_v34 = vsub.f32 %v5936_v19, %v6117_v15  ;;  %v5391_v48 = vld [vmem:[%s5837_s14 + $0x48] sm:$0xff] }
  0xef   : > { %v1478_v52 = vand.u32 2147483647, %v1350_v37 }
  0xf0   : > { %5123 = vmatmul.msk.bf16.gmra.mxu0 %vm1975_vm4, %v5387_v51  ;;  %v1492_v46 = vand.u32 2147483647, %v1364_v34 }
  0xf2   : > { %5135 = vmatmul.msk.bf16.gmra.mxu1 %vm1975_vm4, %v5387_v51 }
  0xf4   : > { %5147 = vmatmul.msk.bf16.gmra.mxu2 %vm1975_vm4, %v5387_v51 }
  0xf6   : > { %5159 = vmatmul.msk.bf16.gmra.mxu3 %vm1975_vm4, %v5387_v51  ;;  %v1445_v51 = vand.u32 2147483647, %v1317_v36 }
 0x100   : > { %5124 = vmatmul.msk.bf16.gmra.mxu0 %vm1975_vm4, %v5388_v0 }
 0x102   : > { %5136 = vmatmul.msk.bf16.gmra.mxu1 %vm1975_vm4, %v5388_v0 }
 0x104   : > { %5148 = vmatmul.msk.bf16.gmra.mxu2 %vm1975_vm4, %v5388_v0 }
 0x106   : > { %5160 = vmatmul.msk.bf16.gmra.mxu3 %vm1975_vm4, %v5388_v0  ;;  %v774_v0 = vsub.f32 %v5938_v20, %v6016_v29 }
 0x108   : > { %v902_v35 = vand.u32 2147483647, %v774_v0  ;;  %v1855_v0 = vpack.c.bf16 %v1173_v59, %v1157_v54 }
 0x10a   : > { %v1030_v42 = vsub.f32 1.0, %v902_v35  ;;  %2295 = vmatpush.bf16.msrb.mxu0 %v1855_v0  ;;  %v1620_v0 = vsub.f32 1.0, %v1492_v46 }
 0x10c   : > { %v1158_v53 = vmax.f32 %v1030_v42, 0.0  ;;  %v1477_v42 = vand.u32 2147483647, %v1349_v13 }
 0x110   : > { %5125 = vmatmul.msk.bf16.gmra.mxu0 %vm1975_vm4, %v5389_v2 }
 0x112   : > { %5137 = vmatmul.msk.bf16.gmra.mxu1 %vm1975_vm4, %v5389_v2 }
 0x114   : > { %5149 = vmatmul.msk.bf16.gmra.mxu2 %vm1975_vm4, %v5389_v2 }
 0x116   : > { %5161 = vmatmul.msk.bf16.gmra.mxu3 %vm1975_vm4, %v5389_v2  ;;  %v790_v2 = vsub.f32 %v5940_v21, %v6016_v29  ;;  %v1573_v29 = vsub.f32 1.0, %v1445_v51 }
 0x118   : > { %v918_v36 = vand.u32 2147483647, %v790_v2  ;;  %v6181_v55 = vmax.f32 %v1573_v29, 0.0 }
 0x11a   : > { %v1046_v43 = vsub.f32 1.0, %v918_v36 }
 0x11c   : > { %v1174_v51 = vmax.f32 %v1046_v43, 0.0  ;;  %v6202_v43 = vmax.f32 %v1589_v23, 0.0  ;;  %v1366_v23 = vsub.f32 %v5936_v19, %v6125_v22 }
 0x11d   : > { %v2021_v62 = vpop.f32.mrf.mxu0 }
 0x11e   : > { %v3124_v4 = vmul.f32 %v2021_v62, %v6152_v49  ;;  %v1462_v62 = vand.u32 2147483647, %v1334_v41  ;;  %v1856_v26 = vpack.c.bf16 %v1174_v51, %v1158_v53  ;;  %v1491_v41 = vand.u32 2147483647, %v1363_v63 }
 0x11f   : > { %v2090_v33 = vpop.f32.mrf.mxu1  ;;  %v1379_v53 = vsub.f32 %v5918_v10, %v6114_v1 }
 0x120   : > { %v3125_v38 = vmul.f32 %v2090_v33, %v6154_v50  ;;  %5126 = vmatmul.msk.bf16.gmra.mxu0 %vm1975_vm4, %v5390_v58  ;;  %2364 = vmatpush.bf16.msrb.mxu1 %v1856_v26  ;;  %v1590_v36 = vsub.f32 1.0, %v1462_v62  ;;  %v1619_v54 = vsub.f32 1.0, %v1491_v41  ;;  %v1605_v62 = vsub.f32 1.0, %v1477_v42 }
 0x121   : > { %v1365_v26 = vsub.f32 %v5936_v19, %v6129_v28  ;;  %v6232_v42 = vmax.f32 %v1620_v0, 0.0 }
 0x122   : > { %5138 = vmatmul.msk.bf16.gmra.mxu1 %vm1975_vm4, %v5390_v58  ;;  %v6212_v51 = vmax.f32 %v1590_v36, 0.0  ;;  %v1508_v36 = vand.u32 2147483647, %v1380_v44  ;;  %v6230_v41 = vmax.f32 %v1605_v62, 0.0  ;;  %v1381_v62 = vsub.f32 %v5918_v10, %v6129_v28 }
 0x124   : > { %5150 = vmatmul.msk.bf16.gmra.mxu2 %vm1975_vm4, %v5390_v58  ;;  %8556 = vst [vmem:[#allocation32_spill] sm:$0xff] %v6212_v51 }
 0x125   : > { %v2023_v61 = vpop.f32.mrf.mxu0 }
 0x126   : > { %5162 = vmatmul.msk.bf16.gmra.mxu3 %vm1975_vm4, %v5390_v58  ;;  %v3140_v56 = vmul.f32 %v2023_v61, %v6178_v45 }
 0x127   : > { %v2159_v2 = vpop.f32.mrf.mxu2  ;;  %v2092_v3 = vpop.f32.mrf.mxu1 }
 0x128   : > { %v3126_v32 = vmul.f32 %v2159_v2, %v6181_v55  ;;  %v3252_v33 = vadd.f32 %v3140_v56, %v3124_v4  ;;  %v3141_v58 = vmul.f32 %v2092_v3, %v6183_v57  ;;  %v6204_v4 = vmax.f32 %v1604_v27, 0.0 }
 0x129   : > { %v2228_v35 = vpop.f32.mrf.mxu3  ;;  %v1606_v3 = vsub.f32 1.0, %v1478_v52  ;;  %v1507_v27 = vand.u32 2147483647, %v1379_v53  ;;  %v1395_v53 = vsub.f32 %v5920_v11, %v6114_v1 }
 0x12a   : > { %v3127_v29 = vmul.f32 %v2228_v35, %v6185_v60  ;;  %v3265_v39 = vadd.f32 %v3141_v58, %v3125_v38  ;;  %v1493_v35 = vand.u32 2147483647, %v1365_v26 }
 0x12b   : > { %v1635_v52 = vsub.f32 1.0, %v1507_v27 }
 0x12d   : > { %v2026_v25 = vpop.f32.mrf.mxu0 }
 0x12e   : > { %v3156_v38 = vmul.f32 %v2026_v25, %v6200_v40  ;;  %v1494_v25 = vand.u32 2147483647, %v1366_v23 }
 0x12f   : > { %v2161_v59 = vpop.f32.mrf.mxu2  ;;  %v2095_v61 = vpop.f32.mrf.mxu1 }
 0x130   : > { %v3142_v56 = vmul.f32 %v2161_v59, %v6202_v43  ;;  %v3253_v14 = vadd.f32 %v3252_v33, %v3156_v38  ;;  %v3157_v63 = vmul.f32 %v2095_v61, %v6204_v4  ;;  %5127 = vmatmul.msk.bf16.gmra.mxu0 %vm1975_vm4, %v5391_v48  ;;  %v6227_v33 = vmax.f32 %v1619_v54, 0.0  ;;  %v6240_v38 = vpop.eup %5494 }
 0x131   : > { %v2230_v2 = vpop.f32.mrf.mxu3  ;;  %v1621_v59 = vsub.f32 1.0, %v1493_v35  ;;  %v1636_v61 = vsub.f32 1.0, %v1508_v36  ;;  %v1622_v0 = vsub.f32 1.0, %v1494_v25  ;;  %v1523_v35 = vand.u32 2147483647, %v1395_v53  ;;  %v5392_v25 = vld [vmem:[%s5837_s14 + $0x50] sm:$0xff] }
 0x132   : > { %v3278_v13 = vadd.f32 %v3142_v56, %v3126_v32  ;;  %v3143_v58 = vmul.f32 %v2230_v2, %v6212_v51  ;;  %v3266_v34 = vadd.f32 %v3265_v39, %v3157_v63  ;;  %5139 = vmatmul.msk.bf16.gmra.mxu1 %vm1975_vm4, %v5391_v48  ;;  %8557 = vst [vmem:[#allocation33_spill] sm:$0xff] %v6227_v33  ;;  %v6235_v32 = vmax.f32 %v1606_v3, 0.0 }
 0x133   : > { %v1396_v56 = vsub.f32 %v5920_v11, %v6117_v15  ;;  %v6248_v2 = vmax.f32 %v1635_v52, 0.0  ;;  %v1382_v3 = vsub.f32 %v5918_v10, %v6125_v22  ;;  %v1509_v36 = vand.u32 2147483647, %v1381_v62 }
 0x134   : > { %v3291_v37 = vadd.f32 %v3143_v58, %v3127_v29  ;;  %5151 = vmatmul.msk.bf16.gmra.mxu2 %vm1975_vm4, %v5391_v48  ;;  %v1651_v53 = vsub.f32 1.0, %v1523_v35  ;;  %v570_v35 = vand.u32 2147483647, %v6208_v47  ;;  %vm567_vm6 = vweird.f32 %v6240_v38 }
 0x135   : > { %v2028_v46 = vpop.f32.mrf.mxu0  ;;  %v1524_v52 = vand.u32 2147483647, %v1396_v56  ;;  %v1510_v31 = vand.u32 2147483647, %v1382_v3  ;;  %vm6305_vm8 = vmor %vm566_vm5, %vm567_vm6  ;;  %vm650_vm5 = vcmask 1040384  }
 0x136   : > { %5163 = vmatmul.msk.bf16.gmra.mxu3 %vm1975_vm4, %v5391_v48  ;;  %v3172_v39 = vmul.f32 %v2028_v46, %v6227_v33  ;;  %vm6289_vm7 = vcmp.eq.f32.partialorder %v570_v35, 8.507059e+37 }
 0x137   : > { %v2164_v29 = vpop.f32.mrf.mxu2  ;;  %v2097_v54 = vpop.f32.mrf.mxu1 }
 0x138   : > { %v3158_v26 = vmul.f32 %v2164_v29, %v6230_v41  ;;  %v3254_v44 = vadd.f32 %v3253_v14, %v3172_v39  ;;  %v3173_v48 = vmul.f32 %v2097_v54, %v6232_v42  ;;  %v562_v14 = vmul.f32 %v6240_v38, %v6208_v47 }
 0x139   : > { %v2233_v63 = vpop.f32.mrf.mxu3  ;;  %v6255_v39 = vmax.f32 %v1621_v59, 0.0  ;;  %v6257_v29 = vmax.f32 %v1636_v61, 0.0  ;;  %v1397_v59 = vsub.f32 %v5920_v11, %v6129_v28  ;;  %v1412_v61 = vsub.f32 %v5914_v7, %v6117_v15 }
 0x13a   : > { %v3279_v23 = vadd.f32 %v3278_v13, %v3158_v26  ;;  %v3159_v27 = vmul.f32 %v2233_v63, %v6235_v32  ;;  %v3267_v58 = vadd.f32 %v3266_v34, %v3173_v48  ;;  %v1411_v13 = vsub.f32 %v5914_v7, %v6114_v1 }
 0x13b   : > { %v6262_v26 = vmax.f32 %v1622_v0, 0.0  ;;  %v563_v48 = vsub.f32 1.0, %v562_v14  ;;  %v1652_v0 = vsub.f32 1.0, %v1524_v52  ;;  %v1540_v52 = vand.u32 2147483647, %v1412_v61 }
 0x13c   : > { %v3292_v46 = vadd.f32 %v3291_v37, %v3159_v27  ;;  %v1637_v37 = vsub.f32 1.0, %v1509_v36  ;;  %v1398_v36 = vsub.f32 %v5920_v11, %v6125_v22  ;;  %v1539_v16 = vand.u32 2147483647, %v1411_v13 }
 0x13d   : > { %v2031_v54 = vpop.f32.mrf.mxu0  ;;  %v6284_v13 = vmax.f32 %v1652_v0, 0.0  ;;  %v1668_v0 = vsub.f32 1.0, %v1540_v52 }
 0x13e   : > { %v3188_v34 = vmul.f32 %v2031_v54, %v6248_v2  ;;  %v1638_v54 = vsub.f32 1.0, %v1510_v31  ;;  %v6282_v31 = vmax.f32 %v1637_v37, 0.0 }
 0x13f   : > { %v2166_v63 = vpop.f32.mrf.mxu2  ;;  %v2100_v62 = vpop.f32.mrf.mxu1 }
 0x140   : > { %v3174_v56 = vmul.f32 %v2166_v63, %v6255_v39  ;;  %v3255_v3 = vadd.f32 %v3254_v44, %v3188_v34  ;;  %v3189_v27 = vmul.f32 %v2100_v62, %v6257_v29  ;;  %5128 = vmatmul.msk.bf16.gmra.mxu0 %vm1975_vm4, %v5392_v25  ;;  %v6277_v44 = vmax.f32 %v1651_v53, 0.0 }
 0x141   : > { %v2235_v14 = vpop.f32.mrf.mxu3  ;;  %v564_v34 = vmul.f32 %v6240_v38, %v563_v48  ;;  %v1525_v63 = vand.u32 2147483647, %v1397_v59  ;;  %v1427_v53 = vsub.f32 %v5916_v9, %v6114_v1  ;;  %v1413_v1 = vsub.f32 %v5914_v7, %v6129_v28 }
 0x142   : > { %v3280_v12 = vadd.f32 %v3279_v23, %v3174_v56  ;;  %v3175_v8 = vmul.f32 %v2235_v14, %v6262_v26  ;;  %v3268_v5 = vadd.f32 %v3267_v58, %v3189_v27  ;;  %5140 = vmatmul.msk.bf16.gmra.mxu1 %vm1975_vm4, %v5392_v25  ;;  %v1526_v58 = vand.u32 2147483647, %v1398_v36 }
 0x143   : > { %v1667_v56 = vsub.f32 1.0, %v1539_v16  ;;  %v565_v59 = vadd.f32 %v6240_v38, %v564_v34  ;;  %v1653_v16 = vsub.f32 1.0, %v1525_v63  ;;  %v1428_v36 = vsub.f32 %v5916_v9, %v6117_v15 }
 0x144   : > { %v3293_v62 = vadd.f32 %v3292_v46, %v3175_v8  ;;  %5152 = vmatmul.msk.bf16.gmra.mxu2 %vm1975_vm4, %v5392_v25  ;;  %v572_v8 = vand.u32 2147483648, %v6208_v47  ;;  %v6295_v46 = vmax.f32 %v1638_v54, 0.0  ;;  %v1654_v63 = vsub.f32 1.0, %v1526_v58 }
 0x145   : > { %v2033_v23 = vpop.f32.mrf.mxu0  ;;  %v6313_v52 = vmax.f32 %v1667_v56, 0.0  ;;  %v1414_v47 = vsub.f32 %v5914_v7, %v6125_v22  ;;  %v569_v15 = vsel %vm6305_vm8, %v6240_v38, %v565_v59  ;;  %v1430_v58 = vsub.f32 %v5916_v9, %v6125_v22 }
 0x146   : > { %5164 = vmatmul.msk.bf16.gmra.mxu3 %vm1975_vm4, %v5392_v25  ;;  %v3204_v37 = vmul.f32 %v2033_v23, %v6277_v44  ;;  %v1555_v23 = vand.u32 2147483647, %v1427_v53  ;;  %v6327_v53 = vmax.f32 %v1668_v0, 0.0  ;;  %vm4723_vm8 = vcmask 1042434  }
 0x147   : > { %v2169_v61 = vpop.f32.mrf.mxu2  ;;  %v2102_v27 = vpop.f32.mrf.mxu1  ;;  %v1558_v59 = vand.u32 2147483647, %v1430_v58 }
 0x148   : > { %v3190_v25 = vmul.f32 %v2169_v61, %v6282_v31  ;;  %v3256_v14 = vadd.f32 %v3255_v3, %v3204_v37  ;;  %v3205_v54 = vmul.f32 %v2102_v27, %v6284_v13  ;;  %v1429_v3 = vsub.f32 %v5916_v9, %v6129_v28  ;;  %8563 = vst [vmem:[#allocation35_spill] sm:$0xff] %v6327_v53 }
 0x149   : > { %v2238_v34 = vpop.f32.mrf.mxu3  ;;  %v573_v37 = vor.u32 1.1754944e-38, %v572_v8  ;;  %v1541_v61 = vand.u32 2147483647, %v1413_v1  ;;  %v6325_v27 = vmax.f32 %v1653_v16, 0.0  ;;  %v6330_v28 = vmax.f32 %v1654_v63, 0.0 }
 0x14a   : > { %v3281_v21 = vadd.f32 %v3280_v12, %v3190_v25  ;;  %v3191_v20 = vmul.f32 %v2238_v34, %v6295_v46  ;;  %v3269_v6 = vadd.f32 %v3268_v5, %v3205_v54  ;;  %v5393_v12 = vld [vmem:[%s5837_s14 + $0x58] sm:$0xff]  ;;  %v1556_v25 = vand.u32 2147483647, %v1428_v36 }
 0x14b   : > { %8562 = vst [vmem:[#allocation34_spill] sm:$0xff] %v6325_v27  ;;  %v1542_v54 = vand.u32 2147483647, %v1414_v47  ;;  %v1683_v34 = vsub.f32 1.0, %v1555_v23  ;;  %v1557_v38 = vand.u32 2147483647, %v1429_v3  ;;  %v6335_v8 = vsel %vm6289_vm7, %v573_v37, %v569_v15 }
 0x14c   : > { %v3294_v56 = vadd.f32 %v3293_v62, %v3191_v20  ;;  %8564 = vst [vmem:[#allocation36_spill] sm:$0xff] %v6330_v28  ;;  %v1669_v62 = vsub.f32 1.0, %v1541_v61  ;;  %v1684_v36 = vsub.f32 1.0, %v1556_v25  ;;  %v6346_v61 = vmul.f32 %v6335_v8, %v5902_v30 }
 0x14d   : > { %v2036_v5 = vpop.f32.mrf.mxu0  ;;  %8565 = vst [vmem:[#allocation37_spill] sm:$0xff] %v6335_v8  ;;  %v1670_v47 = vsub.f32 1.0, %v1542_v54  ;;  %v6340_v23 = vmax.f32 %v1683_v34, 0.0  ;;  %v1685_v37 = vsub.f32 1.0, %v1557_v38 }
 0x14e   : > { %v3220_v35 = vmul.f32 %v2036_v5, %v6313_v52  ;;  %8567 = vst [vmem:[#allocation39_spill] sm:$0xff] %v6346_v61  ;;  %v6349_v25 = vmax.f32 %v1669_v62, 0.0  ;;  %v6351_v5 = vmax.f32 %v1684_v36, 0.0 }
 0x14f   : > { %v2171_v22 = vpop.f32.mrf.mxu2  ;;  %v2105_v20 = vpop.f32.mrf.mxu1  ;;  %8566 = vst [vmem:[#allocation38_spill] sm:$0xff] %v6340_v23  ;;  %v6357_v34 = vmax.f32 %v1685_v37, 0.0 }
 0x150   : > { %v3206_v16 = vmul.f32 %v2171_v22, %v6325_v27  ;;  %v3257_v0 = vadd.f32 %v3256_v14, %v3220_v35  ;;  %v3221_v1 = vmul.f32 %v2105_v20, %v6327_v53  ;;  %5129 = vmatmul.msk.bf16.gmra.mxu0 %vm1975_vm4, %v5393_v12  ;;  %v1686_v14 = vsub.f32 1.0, %v1558_v59  ;;  %8568 = vst [vmem:[#allocation40_spill] sm:$0xff] %v6349_v25 }
 0x151   : > { %v2240_v63 = vpop.f32.mrf.mxu3  ;;  %8569 = vst [vmem:[#allocation41_spill] sm:$0xff] %v6351_v5  ;;  %v6365_v22 = vperm.slane %v6346_v61, 2  ;;  %v6368_v20 = vperm.slane %v6346_v61, 1 }
 0x152   : > { %v3282_v3 = vadd.f32 %v3281_v21, %v3206_v16  ;;  %v3207_v48 = vmul.f32 %v2240_v63, %v6330_v28  ;;  %v3270_v15 = vadd.f32 %v3269_v6, %v3221_v1  ;;  %5141 = vmatmul.msk.bf16.gmra.mxu1 %vm1975_vm4, %v5393_v12  ;;  %v6354_v21 = vmax.f32 %v1670_v47, 0.0 }
 0x153   : > { %v6359_v38 = vmax.f32 %v1686_v14, 0.0  ;;  %v6373_v16 = vperm.slane %v6346_v61, 0  ;;  %v875_v47 = vsub.f32 %v5914_v7, %v6365_v22  ;;  %v874_v8 = vsub.f32 %v5914_v7, %v6368_v20 }
 0x154   : > { %v3295_v58 = vadd.f32 %v3294_v56, %v3207_v48  ;;  %5153 = vmatmul.msk.bf16.gmra.mxu2 %vm1975_vm4, %v5393_v12  ;;  %8570 = vst [vmem:[#allocation42_spill] sm:$0xff] %v6354_v21  ;;  %v6362_v56 = vperm.slane %v6346_v61, 3  ;;  %v891_v48 = vsub.f32 %v5916_v9, %v6365_v22 }
 0x155   : > { %v2038_v54 = vpop.f32.mrf.mxu0 }
 0x156   : > { %5165 = vmatmul.msk.bf16.gmra.mxu3 %vm1975_vm4, %v5393_v12  ;;  %v3236_v6 = vmul.f32 %v2038_v54, %v6340_v23  ;;  %8571 = vst [vmem:[#allocation43_spill] sm:$0xff] %v6362_v56  ;;  %v876_v36 = vsub.f32 %v5914_v7, %v6362_v56  ;;  %v892_v63 = vsub.f32 %v5916_v9, %v6362_v56 }
 0x157   : > { %v2174_v35 = vpop.f32.mrf.mxu2  ;;  %v2107_v30 = vpop.f32.mrf.mxu1 }
 0x158   : > { %v3222_v12 = vmul.f32 %v2174_v35, %v6349_v25  ;;  %v3258_v62 = vadd.f32 %v3257_v0, %v3236_v6  ;;  %v3237_v59 = vmul.f32 %v2107_v30, %v6351_v5  ;;  %v1004_v6 = vand.u32 2147483647, %v876_v36 }
 0x159   : > { %v2243_v1 = vpop.f32.mrf.mxu3  ;;  %v1020_v35 = vand.u32 2147483647, %v892_v63  ;;  %v1003_v30 = vand.u32 2147483647, %v875_v47  ;;  %v1019_v5 = vand.u32 2147483647, %v891_v48 }
 0x15a   : > { %v3283_v37 = vadd.f32 %v3282_v3, %v3222_v12  ;;  %v3223_v0 = vmul.f32 %v2243_v1, %v6354_v21  ;;  %v3259_v14 = vrot.slane %v3258_v62, 4  ;;  %v3271_v54 = vadd.f32 %v3270_v15, %v3237_v59 }
 0x15b   : > { %v1132_v23 = vsub.f32 1.0, %v1004_v6  ;;  %v1148_v28 = vsub.f32 1.0, %v1020_v35  ;;  %v1131_v53 = vsub.f32 1.0, %v1003_v30  ;;  %v890_v3 = vsub.f32 %v5916_v9, %v6368_v20 }
 0x15c   : > { %v3296_v61 = vadd.f32 %v3295_v58, %v3223_v0  ;;  %v3260_v19 = vadd.f32 %v3259_v14, %v3258_v62  ;;  %v3272_v18 = vrot.slane %v3271_v54, 4  ;;  %v1147_v59 = vsub.f32 1.0, %v1019_v5 }
 0x15d   : > { %v2041_v25 = vpop.f32.mrf.mxu0  ;;  %v1260_v47 = vmax.f32 %v1132_v23, 0.0  ;;  %v1276_v21 = vmax.f32 %v1148_v28, 0.0  ;;  %v1259_v58 = vmax.f32 %v1131_v53, 0.0  ;;  %v1002_v62 = vand.u32 2147483647, %v874_v8  ;;  %v5496_v53 = vld [vmem:[%s5837_s14] sm:$0xff] }
 0x15e   : > { %v3261_v12 = vrot.slane %v3260_v19, 2  ;;  %v3273_v1 = vadd.f32 %v3272_v18, %v3271_v54  ;;  %v3572_v15 = vmul.f32 %v2041_v25, %v6152_v49  ;;  %v1275_v25 = vmax.f32 %v1147_v59, 0.0 }
 0x15f   : > { %v2176_v36 = vpop.f32.mrf.mxu2  ;;  %v2110_v63 = vpop.f32.mrf.mxu1  ;;  %v1910_v54 = vpack.c.bf16 %v1276_v21, %v1260_v47  ;;  %v1018_v5 = vand.u32 2147483647, %v890_v3  ;;  %v1130_v35 = vsub.f32 1.0, %v1002_v62 }
 0x160   : > { %v3262_v48 = vadd.f32 %v3261_v12, %v3260_v19  ;;  %v3274_v0 = vrot.slane %v3273_v1, 2  ;;  %v3238_v14 = vmul.f32 %v2176_v36, %v6357_v34  ;;  %v3573_v6 = vmul.f32 %v2110_v63, %v6154_v50  ;;  %5166 = vmatmul.msk.bf16.vlgmr.msrb.gmra.mxu0 %vm1975_vm4, %v6007_v24 }
 0x161   : > { %v2245_v18 = vpop.f32.mrf.mxu3  ;;  %2775 = vmatpush.bf16.msra.mxu3 %v1910_v54  ;;  %v1909_v19 = vpack.c.bf16 %v1275_v25, %v1259_v58  ;;  %v1146_v8 = vsub.f32 1.0, %v1018_v5  ;;  %v1258_v12 = vmax.f32 %v1130_v35, 0.0  ;;  %v873_v36 = vsub.f32 %v5914_v7, %v6373_v16 }
 0x162   : > { %v3275_v30 = vadd.f32 %v3274_v0, %v3273_v1  ;;  %v3284_v23 = vadd.f32 %v3283_v37, %v3238_v14  ;;  %v3239_v28 = vmul.f32 %v2245_v18, %v6359_v38  ;;  %5178 = vmatmul.msk.bf16.vlgmr.msrb.gmra.mxu1 %vm1975_vm4, %v5496_v53  ;;  %v3263_v24 = vrot.slane %v3262_v48, 1 }
 0x163   : > { %2706 = vmatpush.bf16.msra.mxu2 %v1909_v19  ;;  %v1274_v3 = vmax.f32 %v1146_v8, 0.0  ;;  %v889_v1 = vsub.f32 %v5916_v9, %v6373_v16  ;;  %v1001_v54 = vand.u32 2147483647, %v873_v36 }
 0x164   : > { %v3276_v63 = vrot.slane %v3275_v30, 1  ;;  %v3285_v21 = vrot.slane %v3284_v23, 4  ;;  %v3297_v59 = vadd.f32 %v3296_v61, %v3239_v28  ;;  %5190 = vmatmul.msk.bf16.vlgmr.msrb.gmra.mxu2 %vm1975_vm4, %v5496_v53  ;;  %v6405_v5 = vadd.f32 %v3263_v24, %v3262_v48 }
 0x165   : > { %v2043_v37 = vpop.f32.mrf.mxu0  ;;  %v1908_v61 = vpack.c.bf16 %v1274_v3, %v1258_v12  ;;  %v1017_v25 = vand.u32 2147483647, %v889_v1 }
 0x166   : > { %v6401_v47 = vadd.f32 %v3276_v63, %v3275_v30  ;;  %v3286_v58 = vadd.f32 %v3285_v21, %v3284_v23  ;;  %v3298_v62 = vrot.slane %v3297_v59, 4  ;;  %5202 = vmatmul.msk.bf16.vlgmr.msrb.gmra.mxu3 %vm1975_vm4, %v5496_v53  ;;  %v3588_v14 = vmul.f32 %v2043_v37, %v6178_v45 }
 0x167   : > { %v2179_v0 = vpop.f32.mrf.mxu2  ;;  %v2112_v18 = vpop.f32.mrf.mxu1  ;;  %2637 = vmatpush.bf16.msra.mxu1 %v1908_v61  ;;  %v1129_v21 = vsub.f32 1.0, %v1001_v54  ;;  %v1145_v37 = vsub.f32 1.0, %v1017_v25  ;;  %vm3524_vm10 = vcmp.eq.f32.partialorder %v6405_v5, 0.0 }
 0x168   : > { %v3476_v35 = vrot.slane %v6401_v47, 4  ;;  %v3287_v28 = vrot.slane %v3286_v58, 2  ;;  %v3299_v19 = vadd.f32 %v3298_v62, %v3297_v59  ;;  %v3574_v30 = vmul.f32 %v2179_v0, %v6181_v55 }
 0x169   : > { %v2248_v8 = vpop.f32.mrf.mxu3  ;;  %v3700_v23 = vadd.f32 %v3588_v14, %v3572_v15  ;;  %v3589_v63 = vmul.f32 %v2112_v18, %v6183_v57  ;;  %v1257_v59 = vmax.f32 %v1129_v21, 0.0  ;;  %v1273_v1 = vmax.f32 %v1145_v37, 0.0 }
 0x16a   : > { %v6412_v53 = vsel %vm699_vm9, %v6405_v5, %v3476_v35  ;;  %v3288_v12 = vadd.f32 %v3287_v28, %v3286_v58  ;;  %v3300_v36 = vrot.slane %v3299_v19, 2  ;;  %v3575_v48 = vmul.f32 %v2248_v8, %v6185_v60 }
 0x16b   : > { %v3713_v24 = vadd.f32 %v3589_v63, %v3573_v6  ;;  %v1907_v18 = vpack.c.bf16 %v1273_v1, %v1257_v59  ;;  %vm3525_vm11 = vcmp.eq.f32.partialorder %v6401_v47, 0.0 }
 0x16c   : > { %v3301_v3 = vadd.f32 %v3300_v36, %v3299_v19  ;;  %v3289_v0 = vrot.slane %v3288_v12, 1  ;;  %v5497_v36 = vld [vmem:[%s5837_s14 + $0x8] sm:$0xff] }
 0x16d   : > { %v2046_v62 = vpop.f32.mrf.mxu0  ;;  %2568 = vmatpush.bf16.msra.mxu0 %v1907_v18 }
 0x16e   : > { %v3302_v15 = vrot.slane %v3301_v3, 1  ;;  %v3604_v14 = vmul.f32 %v2046_v62, %v6200_v40  ;;  %v6422_v25 = vadd.f32 %v3289_v0, %v3288_v12 }
 0x16f   : > { %v2181_v61 = vpop.f32.mrf.mxu2  ;;  %v2115_v35 = vpop.f32.mrf.mxu1 }
 0x170   : > { %v6416_v9 = vadd.f32 %v3302_v15, %v3301_v3  ;;  %v3590_v58 = vmul.f32 %v2181_v61, %v6202_v43  ;;  %v3701_v28 = vadd.f32 %v3700_v23, %v3604_v14  ;;  %5167 = vmatmul.msk.bf16.gmra.mxu0 %vm1975_vm4, %v6046_v17  ;;  %v3605_v54 = vmul.f32 %v2115_v35, %v6204_v4 }
 0x171   : > { %v2250_v6 = vpop.f32.mrf.mxu3  ;;  %v860_v3 = vsub.f32 %v5920_v11, %v6362_v56  ;;  %vm3526_vm12 = vcmp.eq.f32.partialorder %v6422_v25, 0.0 }
 0x172   : > { %v3477_v19 = vrot.slane %v6416_v9, 4  ;;  %v3726_v8 = vadd.f32 %v3590_v58, %v3574_v30  ;;  %v3591_v63 = vmul.f32 %v2250_v6, %v6212_v51  ;;  %5179 = vmatmul.msk.bf16.gmra.mxu1 %vm1975_vm4, %v5497_v36  ;;  %v3714_v21 = vadd.f32 %v3713_v24, %v3605_v54 }
 0x173   : > { %v844_v30 = vsub.f32 %v5918_v10, %v6362_v56  ;;  %v843_v24 = vsub.f32 %v5918_v10, %v6365_v22  ;;  %v988_v61 = vand.u32 2147483647, %v860_v3  ;;  %vm3527_vm13 = vcmp.eq.f32.partialorder %v6416_v9, 0.0  ;;  %v8579_v9 = vld [vmem:[#allocation29_spill] sm:$0xff] }
 0x174   : > { %v6430_v23 = vsel %vm699_vm9, %v6422_v25, %v3477_v19  ;;  %v3739_v17 = vadd.f32 %v3591_v63, %v3575_v48  ;;  %5191 = vmatmul.msk.bf16.gmra.mxu2 %vm1975_vm4, %v5497_v36  ;;  %v859_v48 = vsub.f32 %v5920_v11, %v6365_v22 }
 0x175   : > { %v2048_v37 = vpop.f32.mrf.mxu0  ;;  %v972_v14 = vand.u32 2147483647, %v844_v30  ;;  %v971_v35 = vand.u32 2147483647, %v843_v24 }
 0x176   : > { %5203 = vmatmul.msk.bf16.gmra.mxu3 %vm1975_vm4, %v5497_v36  ;;  %v3620_v12 = vmul.f32 %v2048_v37, %v6227_v33  ;;  %v987_v58 = vand.u32 2147483647, %v859_v48  ;;  %v1116_v36 = vsub.f32 1.0, %v988_v61 }
 0x177   : > { %v2184_v59 = vpop.f32.mrf.mxu2  ;;  %v2117_v1 = vpop.f32.mrf.mxu1  ;;  %v1100_v63 = vsub.f32 1.0, %v972_v14  ;;  %v1099_v37 = vsub.f32 1.0, %v971_v35  ;;  %v5498_v14 = vld [vmem:[%s5837_s14 + $0x10] sm:$0xff] }
 0x178   : > { %v3606_v62 = vmul.f32 %v2184_v59, %v6230_v41  ;;  %v3702_v0 = vadd.f32 %v3701_v28, %v3620_v12  ;;  %v3621_v15 = vmul.f32 %v2117_v1, %v6232_v42  ;;  %v1115_v7 = vsub.f32 1.0, %v987_v58 }
 0x179   : > { %v2253_v18 = vpop.f32.mrf.mxu3  ;;  %v1228_v51 = vmax.f32 %v1100_v63, 0.0  ;;  %v1244_v28 = vmax.f32 %v1116_v36, 0.0  ;;  %v1227_v12 = vmax.f32 %v1099_v37, 0.0 }
 0x17a   : > { %v3727_v6 = vadd.f32 %v3726_v8, %v3606_v62  ;;  %v3607_v54 = vmul.f32 %v2253_v18, %v6235_v32  ;;  %v3715_v19 = vadd.f32 %v3714_v21, %v3621_v15  ;;  %v1243_v1 = vmax.f32 %v1115_v7, 0.0 }
 0x17b   : > { %v1894_v48 = vpack.c.bf16 %v1244_v28, %v1228_v51 }
 0x17c   : > { %v3740_v33 = vadd.f32 %v3739_v17, %v3607_v54  ;;  %v1893_v8 = vpack.c.bf16 %v1243_v1, %v1227_v12 }
 0x17d   : > { %v2051_v59 = vpop.f32.mrf.mxu0  ;;  %2776 = vmatpush.bf16.msra.mxu3 %v1894_v48 }
 0x17e   : > { %v3636_v30 = vmul.f32 %v2051_v59, %v6248_v2  ;;  %2707 = vmatpush.bf16.msra.mxu2 %v1893_v8  ;;  %v8572_v8 = vld [vmem:[#allocation35_spill] sm:$0xff] }
 0x17f   : > { %v2186_v3 = vpop.f32.mrf.mxu2  ;;  %v2120_v24 = vpop.f32.mrf.mxu1 }
 0x180   : > { %v3622_v62 = vmul.f32 %v2186_v3, %v6255_v39  ;;  %v3703_v21 = vadd.f32 %v3702_v0, %v3636_v30  ;;  %v3637_v15 = vmul.f32 %v2120_v24, %v6257_v29  ;;  %5168 = vmatmul.msk.bf16.gmra.mxu0 %vm1975_vm4, %v5498_v14 }
 0x181   : > { %v2255_v17 = vpop.f32.mrf.mxu3 }
 0x182   : > { %v3728_v18 = vadd.f32 %v3727_v6, %v3622_v62  ;;  %v3623_v7 = vmul.f32 %v2255_v17, %v6262_v26  ;;  %v3716_v61 = vadd.f32 %v3715_v19, %v3637_v15  ;;  %5180 = vmatmul.msk.bf16.gmra.mxu1 %vm1975_vm4, %v5498_v14  ;;  %v5499_v15 = vld [vmem:[%s5837_s14 + $0x18] sm:$0xff]  ;;  %v8573_v17 = vld [vmem:[#allocation36_spill] sm:$0xff] }
 0x184   : > { %v3741_v35 = vadd.f32 %v3740_v33, %v3623_v7  ;;  %5192 = vmatmul.msk.bf16.gmra.mxu2 %vm1975_vm4, %v5498_v14 }
 0x185   : > { %v2053_v51 = vpop.f32.mrf.mxu0 }
 0x186   : > { %5204 = vmatmul.msk.bf16.gmra.mxu3 %vm1975_vm4, %v5498_v14  ;;  %v3652_v0 = vmul.f32 %v2053_v51, %v6277_v44  ;;  %v841_v51 = vsub.f32 %v5918_v10, %v6373_v16 }
 0x187   : > { %v2189_v58 = vpop.f32.mrf.mxu2  ;;  %v2122_v54 = vpop.f32.mrf.mxu1 }
 0x188   : > { %v3638_v63 = vmul.f32 %v2189_v58, %v6282_v31  ;;  %v3704_v36 = vadd.f32 %v3703_v21, %v3652_v0  ;;  %v3653_v6 = vmul.f32 %v2122_v54, %v6284_v13  ;;  %v857_v0 = vsub.f32 %v5920_v11, %v6373_v16 }
 0x189   : > { %v2258_v37 = vpop.f32.mrf.mxu3 }
 0x18a   : > { %v3729_v19 = vadd.f32 %v3728_v18, %v3638_v63  ;;  %v3639_v59 = vmul.f32 %v2258_v37, %v6295_v46  ;;  %v3717_v33 = vadd.f32 %v3716_v61, %v3653_v6  ;;  %v842_v61 = vsub.f32 %v5918_v10, %v6368_v20  ;;  %v8574_v37 = vld [vmem:[#allocation38_spill] sm:$0xff] }
 0x18b   : > { %v969_v6 = vand.u32 2147483647, %v841_v51 }
 0x18c   : > { %v3742_v28 = vadd.f32 %v3741_v35, %v3639_v59  ;;  %v858_v35 = vsub.f32 %v5920_v11, %v6368_v20  ;;  %v970_v63 = vand.u32 2147483647, %v842_v61  ;;  %v985_v59 = vand.u32 2147483647, %v857_v0 }
 0x18d   : > { %v2056_v12 = vpop.f32.mrf.mxu0 }
 0x18e   : > { %v3668_v1 = vmul.f32 %v2056_v12, %v6313_v52  ;;  %v1113_v11 = vsub.f32 1.0, %v985_v59  ;;  %v6481_v59 = vld [vmem:[%s5824_s20] sm:$0x77] }
 0x18f   : > { %v2191_v30 = vpop.f32.mrf.mxu2  ;;  %v2125_v3 = vpop.f32.mrf.mxu1 }
 0x190   : > { %v3654_v24 = vmul.f32 %v2191_v30, %v6325_v27  ;;  %v3705_v48 = vadd.f32 %v3704_v36, %v3668_v1  ;;  %v3669_v62 = vmul.f32 %v2125_v3, %v8572_v8  ;;  %5169 = vmatmul.msk.bf16.gmra.mxu0 %vm1975_vm4, %v5499_v15  ;;  %v986_v36 = vand.u32 2147483647, %v858_v35 }
 0x191   : > { %v2260_v21 = vpop.f32.mrf.mxu3  ;;  %v1098_v1 = vsub.f32 1.0, %v970_v63  ;;  %v1097_v3 = vsub.f32 1.0, %v969_v6  ;;  %v1241_v63 = vmax.f32 %v1113_v11, 0.0 }
 0x192   : > { %v3730_v14 = vadd.f32 %v3729_v19, %v3654_v24  ;;  %v3655_v18 = vmul.f32 %v2260_v21, %v8573_v17  ;;  %v3718_v7 = vadd.f32 %v3717_v33, %v3669_v62  ;;  %5181 = vmatmul.msk.bf16.gmra.mxu1 %vm1975_vm4, %v5499_v15  ;;  %v1114_v30 = vsub.f32 1.0, %v986_v36  ;;  %v8575_v24 = vld [vmem:[#allocation40_spill] sm:$0xff]  ;;  %v8577_v17 = vld [vmem:[#allocation42_spill] sm:$0xff] }
 0x193   : > { %v1226_v61 = vmax.f32 %v1098_v1, 0.0  ;;  %v1225_v51 = vmax.f32 %v1097_v3, 0.0 }
 0x194   : > { %v3743_v58 = vadd.f32 %v3742_v28, %v3655_v18  ;;  %5193 = vmatmul.msk.bf16.gmra.mxu2 %vm1975_vm4, %v5499_v15  ;;  %v8576_v28 = vld [vmem:[#allocation41_spill] sm:$0xff]  ;;  %v1242_v35 = vmax.f32 %v1114_v30, 0.0  ;;  %v5500_v30 = vld [vmem:[%s5837_s14 + $0x20] sm:$0xff] }
 0x195   : > { %v2058_v54 = vpop.f32.mrf.mxu0 }
 0x196   : > { %5205 = vmatmul.msk.bf16.gmra.mxu3 %vm1975_vm4, %v5499_v15  ;;  %v3684_v19 = vmul.f32 %v2058_v54, %v8574_v37  ;;  %v1892_v8 = vpack.c.bf16 %v1242_v35, %v1226_v61 }
 0x197   : > { %v2194_v33 = vpop.f32.mrf.mxu2  ;;  %v2127_v12 = vpop.f32.mrf.mxu1 }
 0x198   : > { %v3670_v62 = vmul.f32 %v2194_v33, %v8575_v24  ;;  %v3706_v21 = vadd.f32 %v3705_v48, %v3684_v19  ;;  %v3685_v18 = vmul.f32 %v2127_v12, %v8576_v28  ;;  %2638 = vmatpush.bf16.msra.mxu1 %v1892_v8  ;;  %v1891_v48 = vpack.c.bf16 %v1241_v63, %v1225_v51 }
 0x199   : > { %v2263_v10 = vpop.f32.mrf.mxu3 }
 0x19a   : > { %v3731_v15 = vadd.f32 %v3730_v14, %v3670_v62  ;;  %v3671_v54 = vmul.f32 %v2263_v10, %v8577_v17  ;;  %v3707_v0 = vrot.slane %v3706_v21, 4  ;;  %v3719_v37 = vadd.f32 %v3718_v7, %v3685_v18  ;;  %2569 = vmatpush.bf16.msra.mxu0 %v1891_v48 }
 0x19c   : > { %v3744_v36 = vadd.f32 %v3743_v58, %v3671_v54  ;;  %v3708_v6 = vadd.f32 %v3707_v0, %v3706_v21  ;;  %v3720_v27 = vrot.slane %v3719_v37, 4 }
 0x19d   : > { %v2061_v19 = vpop.f32.mrf.mxu0 }
 0x19e   : > { %v3709_v33 = vrot.slane %v3708_v6, 2  ;;  %v3721_v12 = vadd.f32 %v3720_v27, %v3719_v37  ;;  %v4076_v1 = vmul.f32 %v2061_v19, %v6152_v49  ;;  %v3500_v49 = vsub.f32 %v6481_v59, %v6412_v53  ;;  %v6495_v37 = vld [vmem:[%s5824_s20 + $0x8] sm:$0x77] }
 0x19f   : > { %v2196_v10 = vpop.f32.mrf.mxu2  ;;  %v2130_v11 = vpop.f32.mrf.mxu1 }
 0x1a0   : > { %v3710_v14 = vadd.f32 %v3709_v33, %v3708_v6  ;;  %v3722_v7 = vrot.slane %v3721_v12, 2  ;;  %v3686_v8 = vmul.f32 %v2196_v10, %v6357_v34  ;;  %v4077_v58 = vmul.f32 %v2130_v11, %v6154_v50  ;;  %5170 = vmatmul.msk.bf16.gmra.mxu0 %vm1975_vm4, %v5500_v30  ;;  %v8578_v11 = vld [vmem:[#allocation28_spill] sm:$0xff] }
 0x1a1   : > { %v2265_v27 = vpop.f32.mrf.mxu3  ;;  %v8453_v50 = vmov 0.0  }
 0x1a2   : > { %v3711_v3 = vrot.slane %v3710_v14, 1  ;;  %v3723_v62 = vadd.f32 %v3722_v7, %v3721_v12  ;;  %v3732_v21 = vadd.f32 %v3731_v15, %v3686_v8  ;;  %v3687_v18 = vmul.f32 %v2265_v27, %v6359_v38  ;;  %5182 = vmatmul.msk.bf16.gmra.mxu1 %vm1975_vm4, %v5500_v30 }
 0x1a3   : > { %v5310_v61 = vsel %vm3524_vm10, 1.0, %v8453_v50  ;;  %v5311_v53 = vsel %vm3525_vm11, 1.0, %v8453_v50  ;;  %v6506_v15 = vand.u32 2147483647, %v3500_v49  ;;  %v5312_v63 = vsel %vm3526_vm12, 1.0, %v8453_v50 }
 0x1a4   : > { %v3712_v35 = vadd.f32 %v3711_v3, %v3710_v14  ;;  %v3724_v51 = vrot.slane %v3723_v62, 1  ;;  %v3733_v54 = vrot.slane %v3732_v21, 4  ;;  %v3745_v0 = vadd.f32 %v3744_v36, %v3687_v18  ;;  %5194 = vmatmul.msk.bf16.gmra.mxu2 %vm1975_vm4, %v5500_v30 }
 0x1a5   : > { %v6516_v47 = vsel %vm3527_vm13, 1.0, %v8453_v50  ;;  %v2063_v6 = vpop.f32.mrf.mxu0  ;;  %v812_v14 = vsub.f32 %v8578_v11, %v6362_v56  ;;  %v828_v7 = vsub.f32 %v8579_v9, %v6362_v56  ;;  %vm695_vm10 = vcmask 1041408  }
 0x1a6   : > { %vm4012_vm14 = vcmp.eq.f32.partialorder %v3712_v35, 0.0  ;;  %v3725_v48 = vadd.f32 %v3724_v51, %v3723_v62  ;;  %v3734_v36 = vadd.f32 %v3733_v54, %v3732_v21  ;;  %v3746_v19 = vrot.slane %v3745_v0, 4  ;;  %5206 = vmatmul.msk.bf16.gmra.mxu3 %vm1975_vm4, %v5500_v30 }
 0x1a7   : > { %v5334_v33 = vsel %vm4012_vm14, 1.0, %v8453_v50  ;;  %v2199_v12 = vpop.f32.mrf.mxu2  ;;  %v4092_v25 = vmul.f32 %v2063_v6, %v6178_v45  ;;  %v2132_v10 = vpop.f32.mrf.mxu1 }
 0x1a8   : > { %v6525_v8 = vmul.f32 %v5334_v33, %v5310_v61  ;;  %v3924_v49 = vrot.slane %v3725_v48, 4  ;;  %vm4013_vm15 = vcmp.eq.f32.partialorder %v3725_v48, 0.0  ;;  %v3735_v27 = vrot.slane %v3734_v36, 2 }
 0x1a9   : > { %v5335_v3 = vsel %vm4013_vm15, 1.0, %v8453_v50  ;;  %v3747_v30 = vadd.f32 %v3746_v19, %v3745_v0  ;;  %v4078_v62 = vmul.f32 %v2199_v12, %v6181_v55  ;;  %v2268_v21 = vpop.f32.mrf.mxu3  ;;  %v4204_v18 = vadd.f32 %v4092_v25, %v4076_v1 }
 0x1aa   : > { %8580 = vst [vmem:[#allocation40_spill] sm:$0xff] %v6525_v8  ;;  %v3932_v45 = vsel %vm699_vm9, %v3712_v35, %v3924_v49  ;;  %v6530_v51 = vmul.f32 %v5335_v3, %v5311_v53  ;;  %v3736_v54 = vadd.f32 %v3735_v27, %v3734_v36  ;;  %v4079_v6 = vmul.f32 %v2268_v21, %v6185_v60 }
 0x1ab   : > { %v3940_v5 = vrot.slane %v3932_v45, 7  ;;  %v3748_v61 = vrot.slane %v3747_v30, 2  ;;  %v4093_v33 = vmul.f32 %v2132_v10, %v6183_v57  ;;  %v940_v48 = vand.u32 2147483647, %v812_v14 }
 0x1ac   : > { %v3737_v56 = vrot.slane %v3736_v54, 1  ;;  %v956_v8 = vand.u32 2147483647, %v828_v7  ;;  %v811_v0 = vsub.f32 %v8578_v11, %v6365_v22  ;;  %v827_v55 = vsub.f32 %v8579_v9, %v6365_v22 }
 0x1ad   : > { %v3956_v1 = vsub.f32 %v6481_v59, %v3940_v5  ;;  %v3749_v53 = vadd.f32 %v3748_v61, %v3747_v30  ;;  %v4217_v35 = vadd.f32 %v4093_v33, %v4077_v58  ;;  %v2066_v36 = vpop.f32.mrf.mxu0  ;;  %v1068_v60 = vsub.f32 1.0, %v940_v48  ;;  %v5501_v30 = vld [vmem:[%s5837_s14 + $0x28] sm:$0xff]  ;;  %v8581_v48 = vld [vmem:[#allocation32_spill] sm:$0xff] }
 0x1ae   : > { %v3738_v19 = vadd.f32 %v3737_v56, %v3736_v54  ;;  %v4108_v12 = vmul.f32 %v2066_v36, %v6200_v40  ;;  %v1084_v57 = vsub.f32 1.0, %v956_v8  ;;  %v939_v25 = vand.u32 2147483647, %v811_v0 }
 0x1af   : > { %v3964_v10 = vand.u32 2147483647, %v3956_v1  ;;  %v3750_v14 = vrot.slane %v3749_v53, 1  ;;  %v2201_v7 = vpop.f32.mrf.mxu2  ;;  %v2135_v49 = vpop.f32.mrf.mxu1  ;;  %v1196_v27 = vmax.f32 %v1068_v60, 0.0  ;;  %v955_v3 = vand.u32 2147483647, %v827_v55 }
 0x1b0   : > { %vm4014_vm0 = vcmp.eq.f32.partialorder %v3738_v19, 0.0  ;;  %v4094_v21 = vmul.f32 %v2201_v7, %v6202_v43  ;;  %v4205_v5 = vadd.f32 %v4204_v18, %v4108_v12  ;;  %v4109_v58 = vmul.f32 %v2135_v49, %v6204_v4  ;;  %5171 = vmatmul.msk.bf16.gmra.mxu0 %vm1975_vm4, %v5501_v30 }
 0x1b1   : > { %v5326_v56 = vrot.slane %v3964_v10, 9  ;;  %v5336_v40 = vsel %vm4014_vm0, 1.0, %v8453_v50  ;;  %v3751_v8 = vadd.f32 %v3750_v14, %v3749_v53  ;;  %v2270_v45 = vpop.f32.mrf.mxu3  ;;  %v1212_v54 = vmax.f32 %v1084_v57, 0.0 }
 0x1b2   : > { %v6545_v61 = vmul.f32 %v5336_v40, %v5312_v63  ;;  %v4230_v33 = vadd.f32 %v4094_v21, %v4078_v62  ;;  %v4095_v0 = vmul.f32 %v2270_v45, %v8581_v48  ;;  %v4218_v55 = vadd.f32 %v4217_v35, %v4109_v58  ;;  %5183 = vmatmul.msk.bf16.gmra.mxu1 %vm1975_vm4, %v5501_v30 }
 0x1b3   : > { %v6550_v43 = vadd.f32 %v5326_v56, %v6506_v15  ;;  %v3925_v4 = vrot.slane %v3751_v8, 4  ;;  %vm4015_vm1 = vcmp.eq.f32.partialorder %v3751_v8, 0.0  ;;  %v1878_v18 = vpack.c.bf16 %v1212_v54, %v1196_v27 }
 0x1b4   : > { %v5337_v1 = vsel %vm4015_vm1, 1.0, %v8453_v50  ;;  %v4243_v36 = vadd.f32 %v4095_v0, %v4079_v6  ;;  %5195 = vmatmul.msk.bf16.gmra.mxu2 %vm1975_vm4, %v5501_v30  ;;  %v1067_v53 = vsub.f32 1.0, %v939_v25  ;;  %v1083_v63 = vsub.f32 1.0, %v955_v3  ;;  %v8582_v6 = vld [vmem:[#allocation33_spill] sm:$0xff] }
 0x1b5   : > { %v3933_v62 = vsel %vm699_vm9, %v3738_v19, %v3925_v4  ;;  %v6556_v60 = vmul.f32 %v5337_v1, %v6516_v47  ;;  %v2068_v35 = vpop.f32.mrf.mxu0  ;;  %2777 = vmatpush.bf16.msra.mxu3 %v1878_v18  ;;  %v810_v15 = vsub.f32 %v8578_v11, %v6368_v20  ;;  %v826_v12 = vsub.f32 %v8579_v9, %v6368_v20 }
 0x1b6   : > { %v3941_v57 = vrot.slane %v3933_v62, 7  ;;  %5207 = vmatmul.msk.bf16.gmra.mxu3 %vm1975_vm4, %v5501_v30  ;;  %v4124_v10 = vmul.f32 %v2068_v35, %v8582_v6  ;;  %v1195_v25 = vmax.f32 %v1067_v53, 0.0  ;;  %v1211_v14 = vmax.f32 %v1083_v63, 0.0 }
 0x1b7   : > { %v2204_v7 = vpop.f32.mrf.mxu2  ;;  %v2137_v19 = vpop.f32.mrf.mxu1  ;;  %v938_v49 = vand.u32 2147483647, %v810_v15  ;;  %v954_v47 = vand.u32 2147483647, %v826_v12  ;;  %v809_v27 = vsub.f32 %v8578_v11, %v6373_v16  ;;  %v825_v3 = vsub.f32 %v8579_v9, %v6373_v16 }
 0x1b8   : > { %v3957_v21 = vsub.f32 %v6495_v37, %v3941_v57  ;;  %v4110_v58 = vmul.f32 %v2204_v7, %v6230_v41  ;;  %v4206_v56 = vadd.f32 %v4205_v5, %v4124_v10  ;;  %v4125_v30 = vmul.f32 %v2137_v19, %v6232_v42 }
 0x1b9   : > { %v2273_v40 = vpop.f32.mrf.mxu3  ;;  %v1877_v8 = vpack.c.bf16 %v1211_v14, %v1195_v25  ;;  %v1066_v45 = vsub.f32 1.0, %v938_v49  ;;  %v1082_v54 = vsub.f32 1.0, %v954_v47  ;;  %v937_v48 = vand.u32 2147483647, %v809_v27  ;;  %v5502_v49 = vld [vmem:[%s5837_s14 + $0x30] sm:$0xff] }
 0x1ba   : > { %v3965_v0 = vand.u32 2147483647, %v3957_v21  ;;  %v4231_v4 = vadd.f32 %v4230_v33, %v4110_v58  ;;  %v4111_v18 = vmul.f32 %v2273_v40, %v6235_v32  ;;  %v4219_v1 = vadd.f32 %v4218_v55, %v4125_v30 }
 0x1bb   : > { %2708 = vmatpush.bf16.msra.mxu2 %v1877_v8  ;;  %v1194_v53 = vmax.f32 %v1066_v45, 0.0  ;;  %v1210_v63 = vmax.f32 %v1082_v54, 0.0  ;;  %v953_v62 = vand.u32 2147483647, %v825_v3  ;;  %v1065_v35 = vsub.f32 1.0, %v937_v48 }
 0x1bc   : > { %v8583_v41 = vsub.f32 %v6495_v37, %v6430_v23  ;;  %v5327_v42 = vrot.slane %v3965_v0, 9  ;;  %v4244_v15 = vadd.f32 %v4243_v36, %v4111_v18 }
 0x1bd   : > { %v2071_v12 = vpop.f32.mrf.mxu0  ;;  %v1876_v57 = vpack.c.bf16 %v1210_v63, %v1194_v53  ;;  %v1081_v6 = vsub.f32 1.0, %v953_v62  ;;  %v1193_v10 = vmax.f32 %v1065_v35, 0.0  ;;  %v8585_v35 = vld [vmem:[#allocation35_spill] sm:$0xff] }
 0x1be   : > { %v3509_v5 = vand.u32 2147483647, %v8583_v41  ;;  %v4140_v32 = vmul.f32 %v2071_v12, %v6248_v2  ;;  %v8587_v12 = vld [vmem:[#allocation23_spill] sm:$0xff] }
 0x1bf   : > { %v2206_v55 = vpop.f32.mrf.mxu2  ;;  %v2140_v25 = vpop.f32.mrf.mxu1  ;;  %2639 = vmatpush.bf16.msra.mxu1 %v1876_v57  ;;  %v1209_v14 = vmax.f32 %v1081_v6, 0.0  ;;  %v6598_v57 = vperm.slane %v8587_v12, 5 }
 0x1c0   : > { %v6575_v33 = vadd.f32 %v5327_v42, %v3509_v5  ;;  %v4126_v7 = vmul.f32 %v2206_v55, %v6255_v39  ;;  %v4207_v19 = vadd.f32 %v4206_v56, %v4140_v32  ;;  %v4141_v23 = vmul.f32 %v2140_v25, %v6257_v29  ;;  %5172 = vmatmul.msk.bf16.gmra.mxu0 %vm1975_vm4, %v5502_v49  ;;  %v8586_v42 = vld [vmem:[#allocation36_spill] sm:$0xff]  ;;  %v8588_v55 = vld [vmem:[#allocation38_spill] sm:$0xff] }
 0x1c1   : > { %v2275_v36 = vpop.f32.mrf.mxu3  ;;  %v1875_v47 = vpack.c.bf16 %v1209_v14, %v1193_v10  ;;  %v6602_v10 = vperm.slane %v8587_v12, 4  ;;  %v6605_v32 = vperm.slane %v8587_v12, 7 }
 0x1c2   : > { %v4232_v27 = vadd.f32 %v4231_v4, %v4126_v7  ;;  %v4127_v3 = vmul.f32 %v2275_v36, %v6262_v26  ;;  %v4220_v21 = vadd.f32 %v4219_v1, %v4141_v23  ;;  %5184 = vmatmul.msk.bf16.gmra.mxu1 %vm1975_vm4, %v5502_v49 }
 0x1c3   : > { %2570 = vmatpush.bf16.msra.mxu0 %v1875_v47 }
 0x1c4   : > { %v4245_v2 = vadd.f32 %v4244_v15, %v4127_v3  ;;  %5196 = vmatmul.msk.bf16.gmra.mxu2 %vm1975_vm4, %v5502_v49 }
 0x1c5   : > { %v2073_v58 = vpop.f32.mrf.mxu0 }
 0x1c6   : > { %5208 = vmatmul.msk.bf16.gmra.mxu3 %vm1975_vm4, %v5502_v49  ;;  %v4156_v39 = vmul.f32 %v2073_v58, %v6277_v44  ;;  %v8584_v44 = vld [vmem:[#allocation34_spill] sm:$0xff]  ;;  %v6612_v49 = vperm.slane %v8587_v12, 6 }
 0x1c7   : > { %v2209_v29 = vpop.f32.mrf.mxu2  ;;  %v2142_v56 = vpop.f32.mrf.mxu1 }
 0x1c8   : > { %v4142_v30 = vmul.f32 %v2209_v29, %v6282_v31  ;;  %v4208_v40 = vadd.f32 %v4207_v19, %v4156_v39  ;;  %v4157_v26 = vmul.f32 %v2142_v56, %v6284_v13  ;;  %v5503_v31 = vld [vmem:[%s5837_s14 + $0x38] sm:$0xff]  ;;  %v8589_v19 = vld [vmem:[#allocation30_spill] sm:$0xff] }
 0x1c9   : > { %v2278_v8 = vpop.f32.mrf.mxu3  ;;  %v1320_v23 = vsub.f32 %v8589_v19, %v6598_v57 }
 0x1ca   : > { %v4233_v45 = vadd.f32 %v4232_v27, %v4142_v30  ;;  %v4143_v54 = vmul.f32 %v2278_v8, %v6295_v46  ;;  %v4221_v48 = vadd.f32 %v4220_v21, %v4157_v26  ;;  %v1319_v21 = vsub.f32 %v8589_v19, %v6602_v10 }
 0x1cb   : > { %v1448_v30 = vand.u32 2147483647, %v1320_v23 }
 0x1cc   : > { %v4246_v0 = vadd.f32 %v4245_v2, %v4143_v54  ;;  %v1322_v2 = vsub.f32 %v8589_v19, %v6605_v32  ;;  %v1447_v8 = vand.u32 2147483647, %v1319_v21 }
 0x1cd   : > { %v2076_v4 = vpop.f32.mrf.mxu0 }
 0x1ce   : > { %v4172_v18 = vmul.f32 %v2076_v4, %v6313_v52  ;;  %v1450_v54 = vand.u32 2147483647, %v1322_v2 }
 0x1cf   : > { %v2211_v1 = vpop.f32.mrf.mxu2  ;;  %v2145_v53 = vpop.f32.mrf.mxu1 }
 0x1d0   : > { %v4158_v63 = vmul.f32 %v2211_v1, %v8584_v44  ;;  %v4209_v62 = vadd.f32 %v4208_v40, %v4172_v18  ;;  %v4173_v41 = vmul.f32 %v2145_v53, %v8585_v35  ;;  %5173 = vmatmul.msk.bf16.gmra.mxu0 %vm1975_vm4, %v5503_v31  ;;  %v1321_v40 = vsub.f32 %v8589_v19, %v6612_v49 }
 0x1d1   : > { %v2280_v13 = vpop.f32.mrf.mxu3  ;;  %v1576_v1 = vsub.f32 1.0, %v1448_v30 }
 0x1d2   : > { %v4234_v5 = vadd.f32 %v4233_v45, %v4158_v63  ;;  %v4159_v15 = vmul.f32 %v2280_v13, %v8586_v42  ;;  %v4222_v46 = vadd.f32 %v4221_v48, %v4173_v41  ;;  %5185 = vmatmul.msk.bf16.gmra.mxu1 %vm1975_vm4, %v5503_v31  ;;  %v8590_v48 = vld [vmem:[#allocation31_spill] sm:$0xff]  ;;  %v1449_v44 = vand.u32 2147483647, %v1321_v40  ;;  %v5504_v13 = vld [vmem:[%s5837_s14 + $0x40] sm:$0xff] }
 0x1d3   : > { %v1336_v63 = vsub.f32 %v8590_v48, %v6598_v57  ;;  %v1575_v42 = vsub.f32 1.0, %v1447_v8  ;;  %v5666_v40 = vmov 286326784  }
 0x1d4   : > { %v4247_v52 = vadd.f32 %v4246_v0, %v4159_v15  ;;  %5197 = vmatmul.msk.bf16.gmra.mxu2 %vm1975_vm4, %v5503_v31  ;;  %v1335_v0 = vsub.f32 %v8590_v48, %v6602_v10  ;;  %v1578_v15 = vsub.f32 1.0, %v1450_v54 }
 0x1d5   : > { %v2078_v6 = vpop.f32.mrf.mxu0 }
 0x1d6   : > { %5209 = vmatmul.msk.bf16.gmra.mxu3 %vm1975_vm4, %v5503_v31  ;;  %v4188_v25 = vmul.f32 %v2078_v6, %v8588_v55 }
 0x1d7   : > { %v2214_v14 = vpop.f32.mrf.mxu2  ;;  %v2147_v7 = vpop.f32.mrf.mxu1 }
 0x1d8   : > { %v4174_v36 = vmul.f32 %v2214_v14, %v8575_v24  ;;  %v4210_v47 = vadd.f32 %v4209_v62, %v4188_v25  ;;  %v4189_v27 = vmul.f32 %v2147_v7, %v8576_v28  ;;  %v1337_v62 = vsub.f32 %v8590_v48, %v6612_v49 }
 0x1d9   : > { %v2283_v3 = vpop.f32.mrf.mxu3  ;;  %v6639_v25 = vmax.f32 %v1576_v1, 0.0  ;;  %v1577_v14 = vsub.f32 1.0, %v1449_v44  ;;  %v1464_v7 = vand.u32 2147483647, %v1336_v63  ;;  %v4596_v1 = vld [vmem:[%s5832_s4] sm:$0xff] }
 0x1da   : > { %v4235_v58 = vadd.f32 %v4234_v5, %v4174_v36  ;;  %v4175_v39 = vmul.f32 %v2283_v3, %v8577_v17  ;;  %v4211_v29 = vrot.slane %v4210_v47, 4  ;;  %v4223_v56 = vadd.f32 %v4222_v46, %v4189_v27 }
 0x1db   : > { %v1463_v46 = vand.u32 2147483647, %v1335_v0  ;;  %8591 = vst [vmem:[#allocation41_spill] sm:$0xff] %v6639_v25  ;;  %v1465_v23 = vand.u32 2147483647, %v1337_v62  ;;  %v6642_v27 = vmax.f32 %v1575_v42, 0.0  ;;  %v1351_v42 = vsub.f32 %v8578_v11, %v6602_v10 }
 0x1dc   : > { %v6623_v24 = vadd.f32 %v4247_v52, %v4175_v39  ;;  %v4212_v26 = vadd.f32 %v4211_v29, %v4210_v47  ;;  %v4224_v28 = vrot.slane %v4223_v56, 4  ;;  %v6644_v3 = vmax.f32 %v1578_v15, 0.0 }
 0x1dd   : > { %v6625_v45 = vpop.f32.mrf.mxu0  ;;  %8592 = vst [vmem:[#allocation42_spill] sm:$0xff] %v6642_v27  ;;  %v1591_v21 = vsub.f32 1.0, %v1463_v46  ;;  %v1592_v8 = vsub.f32 1.0, %v1464_v7  ;;  %v1593_v0 = vsub.f32 1.0, %v1465_v23  ;;  %v6666_v46 = vand.u32 2147483647, %v4596_v1 }
 0x1de   : > { %v4213_v4 = vrot.slane %v4212_v26, 2  ;;  %v4225_v17 = vadd.f32 %v4224_v28, %v4223_v56 }
 0x1df   : > { %v2216_v18 = vpop.f32.mrf.mxu2  ;;  %v6629_v53 = vpop.f32.mrf.mxu1  ;;  %8596 = vst [vmem:[#allocation34_spill] sm:$0xff] %v6666_v46  ;;  %v6673_v23 = vmax.f32 %v1593_v0, 0.0 }
 0x1e0   : > { %v4214_v35 = vadd.f32 %v4213_v4, %v4212_v26  ;;  %v4226_v41 = vrot.slane %v4225_v17, 2  ;;  %v4190_v31 = vmul.f32 %v2216_v18, %v6357_v34  ;;  %5174 = vmatmul.msk.bf16.gmra.mxu0 %vm1975_vm4, %v5504_v13  ;;  %v6653_v26 = vunpack.c.l.s4 %v5666_v40  ;;  %v8594_v4 = vld [vmem:[#allocation40_spill] sm:$0xff] }
 0x1e1   : > { %v2285_v5 = vpop.f32.mrf.mxu3 }
 0x1e2   : > { %v4215_v52 = vrot.slane %v4214_v35, 1  ;;  %v4227_v6 = vadd.f32 %v4226_v41, %v4225_v17  ;;  %v4236_v55 = vadd.f32 %v4235_v58, %v4190_v31  ;;  %5186 = vmatmul.msk.bf16.gmra.mxu1 %vm1975_vm4, %v5504_v13  ;;  %v1338_v58 = vsub.f32 %v8590_v48, %v6605_v32  ;;  %8593 = vst [vmem:[#allocation32_spill] sm:$0xff] %v6653_v26 }
 0x1e3   : > { %v4191_v56 = vmul.f32 %v2285_v5, %v6359_v38  ;;  %v6658_v38 = vmax.f32 %v1577_v14, 0.0  ;;  %v8452_v14 = vunpack.c.0.s8 %v6653_v26 }
 0x1e4   : > { %v4216_v36 = vadd.f32 %v4215_v52, %v4214_v35  ;;  %v4228_v47 = vrot.slane %v4227_v6, 1  ;;  %v4237_v34 = vrot.slane %v4236_v55, 4  ;;  %5198 = vmatmul.msk.bf16.gmra.mxu2 %vm1975_vm4, %v5504_v13  ;;  %v6660_v35 = vmax.f32 %v1591_v21, 0.0 }
 0x1e5   : > { %v6646_v2 = vpop.f32.mrf.mxu0  ;;  %8595 = vst [vmem:[#allocation33_spill] sm:$0xff] %v6658_v38  ;;  %v1466_v41 = vand.u32 2147483647, %v1338_v58  ;;  %v6668_v52 = vmax.f32 %v1592_v8, 0.0  ;;  %v5667_v8 = vmov 858989090  }
 0x1e6   : > { %vm4516_vm2 = vcmp.eq.f32.partialorder %v4216_v36, 0.0  ;;  %v4229_v39 = vadd.f32 %v4228_v47, %v4227_v6  ;;  %v4238_v29 = vadd.f32 %v4237_v34, %v4236_v55  ;;  %5210 = vmatmul.msk.bf16.gmra.mxu3 %vm1975_vm4, %v5504_v13  ;;  %v1352_v6 = vsub.f32 %v8578_v11, %v6598_v57 }
 0x1e7   : > { %v5358_v30 = vsel %vm4516_vm2, 1.0, %v8453_v50  ;;  %v2435_v28 = vpop.f32.mrf.mxu2  ;;  %v2368_v54 = vpop.f32.mrf.mxu1  ;;  %v1594_v47 = vsub.f32 1.0, %v1466_v41 }
 0x1e8   : > { %v4564_v17 = vmul.f32 %v5358_v30, %v8594_v4  ;;  %v4428_v18 = vrot.slane %v4229_v39, 4  ;;  %vm4517_vm3 = vcmp.eq.f32.partialorder %v4229_v39, 0.0  ;;  %v4239_v44 = vrot.slane %v4238_v29, 2 }
 0x1e9   : > { %v5359_v63 = vsel %vm4517_vm3, 1.0, %v8453_v50  ;;  %v2504_v62 = vpop.f32.mrf.mxu3  ;;  %v6679_v4 = vunpack.c.l.s4 %v5667_v8  ;;  %v1480_v0 = vand.u32 2147483647, %v1352_v6 }
 0x1ea   : > { %v4436_v31 = vsel %vm699_vm9, %v4216_v36, %v4428_v18  ;;  %v4565_v13 = vmul.f32 %v5359_v63, %v6530_v51  ;;  %v4240_v5 = vadd.f32 %v4239_v44, %v4238_v29  ;;  %v4249_v36 = vadd.f32 %v6623_v24, %v4191_v56 }
 0x1eb   : > { %v4444_v15 = vrot.slane %v4436_v31, 6  ;;  %v4580_v21 = vsub.f32 1.0, %v4564_v17  ;;  %v1479_v29 = vand.u32 2147483647, %v1351_v42  ;;  %8597 = vst [vmem:[#allocation35_spill] sm:$0xff] %v6679_v4  ;;  %v4655_v24 = vperm.slane %v6666_v46, %v8452_v14  ;;  %v5505_v17 = vld [vmem:[%s5837_s14 + $0x48] sm:$0xff] }
 0x1ec   : > { %v4581_v55 = vsub.f32 1.0, %v4565_v13  ;;  %v4241_v7 = vrot.slane %v4240_v5, 1  ;;  %v4250_v40 = vrot.slane %v4249_v36, 4  ;;  %v3128_v56 = vmul.f32 %v6625_v45, %v6642_v27 }
 0x1ed   : > { %v4460_v51 = vsub.f32 %v6481_v59, %v4444_v15  ;;  %v2302_v34 = vpop.f32.mrf.mxu0  ;;  %v8451_v31 = vunpack.c.0.s8 %v6679_v4  ;;  %v3129_v42 = vmul.f32 %v6629_v53, %v6639_v25  ;;  %v3130_v15 = vmul.f32 %v2435_v28, %v6658_v38 }
 0x1ee   : > { %v4616_v58 = vrot.slane %v4581_v55, 4  ;;  %v6677_v39 = vadd.f32 %v4241_v7, %v4240_v5  ;;  %v4251_v41 = vadd.f32 %v4250_v40, %v4249_v36  ;;  %v3131_v45 = vmul.f32 %v2504_v62, %v6644_v3 }
 0x1ef   : > { %v4468_v30 = vand.u32 2147483647, %v4460_v51  ;;  %v2437_v18 = vpop.f32.mrf.mxu2  ;;  %v2371_v1 = vpop.f32.mrf.mxu1  ;;  %v6704_v7 = vperm.slane %v6666_v46, %v8451_v31  ;;  %v3145_v53 = vmul.f32 %v2368_v54, %v6668_v52  ;;  %v6711_v62 = vmax.f32 %v1594_v47, 0.0 }
 0x1f0   : > { %v4624_v59 = vsel %vm699_vm9, %v4580_v21, %v4616_v58  ;;  %vm4518_vm6 = vcmp.eq.f32.partialorder %v6677_v39, 0.0  ;;  %5175 = vmatmul.msk.bf16.gmra.mxu0 %vm1975_vm4, %v5505_v17  ;;  %v4252_v55 = vrot.slane %v4251_v41, 2  ;;  %v3146_v28 = vmul.f32 %v2437_v18, %v6673_v23 }
 0x1f1   : > { %v5350_v44 = vrot.slane %v4468_v30, 10  ;;  %v5360_v63 = vsel %vm4518_vm6, 1.0, %v8453_v50  ;;  %v2506_v13 = vpop.f32.mrf.mxu3  ;;  %v1607_v58 = vsub.f32 1.0, %v1479_v29  ;;  %v3317_v40 = vadd.f32 %v3145_v53, %v3129_v42 }
 0x1f2   : > { %v6693_v5 = vmul.f32 %v5360_v63, %v6545_v61  ;;  %5187 = vmatmul.msk.bf16.gmra.mxu1 %vm1975_vm4, %v5505_v17  ;;  %v3144_v61 = vmul.f32 %v6646_v2, %v6660_v35  ;;  %v4253_v36 = vadd.f32 %v4252_v55, %v4251_v41  ;;  %v6716_v8 = vadd.f32 %v3146_v28, %v3130_v15  ;;  %v8598_v63 = vld [vmem:[#allocation43_spill] sm:$0xff] }
 0x1f3   : > { %v4508_v6 = vadd.f32 %v5350_v44, %v6550_v43  ;;  %v3147_v2 = vmul.f32 %v2506_v13, %v6711_v62  ;;  %v1608_v44 = vsub.f32 1.0, %v1480_v0  ;;  %v6720_v47 = vmax.f32 %v1607_v58, 0.0 }
 0x1f4   : > { %v4582_v51 = vsub.f32 1.0, %v6693_v5  ;;  %5199 = vmatmul.msk.bf16.gmra.mxu2 %vm1975_vm4, %v5505_v17  ;;  %v3304_v21 = vadd.f32 %v3144_v61, %v3128_v56  ;;  %v4254_v18 = vrot.slane %v4253_v36, 1  ;;  %v796_v0 = vsub.f32 %v8590_v48, %v8598_v63 }
 0x1f5   : > { %v4640_v43 = vmul.f32 %v4624_v59, %v4508_v6  ;;  %v6714_v30 = vpop.f32.mrf.mxu0  ;;  %v780_v59 = vsub.f32 %v8589_v19, %v8598_v63  ;;  %v6728_v56 = vadd.f32 %v3147_v2, %v3131_v45  ;;  %v6730_v42 = vmax.f32 %v1608_v44, 0.0 }
 0x1f6   : > { %5211 = vmatmul.msk.bf16.gmra.mxu3 %vm1975_vm4, %v5505_v17  ;;  %v4255_v13 = vadd.f32 %v4254_v18, %v4253_v36  ;;  %v3160_v15 = vmul.f32 %v2302_v34, %v6720_v47  ;;  %v924_v53 = vand.u32 2147483647, %v796_v0  ;;  %v795_v45 = vsub.f32 %v8590_v48, %v6365_v22 }
 0x1f7   : > { %v4692_v54 = vmul.f32 %v4655_v24, %v4640_v43  ;;  %v6724_v41 = vpop.f32.mrf.mxu2  ;;  %v6726_v29 = vpop.f32.mrf.mxu1  ;;  %v779_v24 = vsub.f32 %v8589_v19, %v6365_v22  ;;  %v908_v6 = vand.u32 2147483647, %v780_v59  ;;  %v3161_v61 = vmul.f32 %v2371_v1, %v6730_v42 }
 0x1f8   : > { %v4429_v58 = vrot.slane %v4255_v13, 4  ;;  %vm4519_vm7 = vcmp.eq.f32.partialorder %v4255_v13, 0.0  ;;  %v6745_v2 = vadd.f32 %v3304_v21, %v3160_v15  ;;  %v1052_v18 = vsub.f32 1.0, %v924_v53 }
 0x1f9   : > { %v4708_v17 = vrot.slane %v4692_v54, 3  ;;  %v6737_v55 = vpop.f32.mrf.mxu3  ;;  %v907_v28 = vand.u32 2147483647, %v779_v24  ;;  %v5361_v36 = vsel %vm4519_vm7, 1.0, %v8453_v50  ;;  %v6748_v34 = vadd.f32 %v3317_v40, %v3161_v61 }
 0x1fa   : > { %v1036_v44 = vsub.f32 1.0, %v908_v6  ;;  %v4437_v1 = vsel %vm699_vm9, %v6677_v39, %v4429_v58  ;;  %v4567_v63 = vmul.f32 %v5361_v36, %v6556_v60  ;;  %v923_v22 = vand.u32 2147483647, %v795_v45  ;;  %v5506_v58 = vld [vmem:[%s5837_s14 + $0x50] sm:$0xff] }
 0x1fb   : > { %v6743_v43 = vsel %vm650_vm5, %v4692_v54, %v4708_v17  ;;  %v1035_v59 = vsub.f32 1.0, %v907_v28  ;;  %v4445_v0 = vrot.slane %v4437_v1, 6  ;;  %v1180_v21 = vmax.f32 %v1052_v18, 0.0 }
 0x1fc   : > { %v1164_v24 = vmax.f32 %v1036_v44, 0.0  ;;  %v1353_v17 = vsub.f32 %v8578_v11, %v6612_v49  ;;  %v4583_v40 = vsub.f32 1.0, %v4567_v63  ;;  %v1051_v13 = vsub.f32 1.0, %v923_v22 }
 0x1fd   : > { %v6753_v54 = vpop.f32.mrf.mxu0  ;;  %v1163_v15 = vmax.f32 %v1035_v59, 0.0  ;;  %v1354_v6 = vsub.f32 %v8578_v11, %v6605_v32  ;;  %v4461_v61 = vsub.f32 %v6495_v37, %v4445_v0  ;;  %v1367_v28 = vsub.f32 %v8579_v9, %v6602_v10 }
 0x1fe   : > { %v1862_v53 = vpack.c.bf16 %v1180_v21, %v1164_v24  ;;  %v1481_v45 = vand.u32 2147483647, %v1353_v17  ;;  %v4617_v36 = vrot.slane %v4583_v40, 4  ;;  %v1179_v44 = vmax.f32 %v1051_v13, 0.0 }
 0x1ff   : > { %v6759_v39 = vpop.f32.mrf.mxu2  ;;  %v6761_v60 = vpop.f32.mrf.mxu1  ;;  %v1482_v18 = vand.u32 2147483647, %v1354_v6  ;;  %v1368_v1 = vsub.f32 %v8579_v9, %v6598_v57  ;;  %v4469_v22 = vand.u32 2147483647, %v4461_v61  ;;  %v1495_v37 = vand.u32 2147483647, %v1367_v28 }
 0x200   : > { %5176 = vmatmul.msk.bf16.gmra.mxu0 %vm1975_vm4, %v5506_v58  ;;  %2778 = vmatpush.bf16.msra.mxu3 %v1862_v53  ;;  %v1609_v59 = vsub.f32 1.0, %v1481_v45  ;;  %v778_v0 = vsub.f32 %v8589_v19, %v6368_v20  ;;  %v4625_v24 = vsel %vm699_vm9, %v4582_v51, %v4617_v36  ;;  %v1861_v21 = vpack.c.bf16 %v1179_v44, %v1163_v15 }
 0x201   : > { %v6770_v63 = vpop.f32.mrf.mxu3  ;;  %v1610_v17 = vsub.f32 1.0, %v1482_v18  ;;  %v1496_v40 = vand.u32 2147483647, %v1368_v1  ;;  %v5351_v13 = vrot.slane %v4469_v22, 10  ;;  %v1623_v61 = vsub.f32 1.0, %v1495_v37 }
 0x202   : > { %5188 = vmatmul.msk.bf16.gmra.mxu1 %vm1975_vm4, %v5506_v58  ;;  %v6778_v6 = vmax.f32 %v1609_v59, 0.0  ;;  %v794_v53 = vsub.f32 %v8590_v48, %v6368_v20  ;;  %2709 = vmatpush.bf16.msra.mxu2 %v1861_v21  ;;  %v906_v28 = vand.u32 2147483647, %v778_v0  ;;  %v777_v51 = vsub.f32 %v8589_v19, %v6373_v16 }
 0x203   : > { %v6783_v45 = vmax.f32 %v1610_v17, 0.0  ;;  %v1624_v5 = vsub.f32 1.0, %v1496_v40  ;;  %v4509_v36 = vadd.f32 %v5351_v13, %v6575_v33  ;;  %v6792_v18 = vmax.f32 %v1623_v61, 0.0 }
 0x204   : > { %5200 = vmatmul.msk.bf16.gmra.mxu2 %vm1975_vm4, %v5506_v58  ;;  %v3162_v44 = vmul.f32 %v6724_v41, %v6778_v6  ;;  %v922_v20 = vand.u32 2147483647, %v794_v53  ;;  %v1034_v59 = vsub.f32 1.0, %v906_v28  ;;  %v793_v37 = vsub.f32 %v8590_v48, %v6373_v16  ;;  %v8604_v48 = vld [vmem:[#allocation25_spill] sm:$0xff] }
 0x205   : > { %v6787_v15 = vpop.f32.mrf.mxu0  ;;  %v3163_v1 = vmul.f32 %v6737_v55, %v6783_v45  ;;  %v6797_v22 = vmax.f32 %v1624_v5, 0.0  ;;  %v4641_v21 = vmul.f32 %v4625_v24, %v4509_v36  ;;  %v3176_v17 = vmul.f32 %v6714_v30, %v6792_v18 }
 0x206   : > { %5212 = vmatmul.msk.bf16.gmra.mxu3 %vm1975_vm4, %v5506_v58  ;;  %v3331_v41 = vadd.f32 %v6716_v8, %v3162_v44  ;;  %v1050_v58 = vsub.f32 1.0, %v922_v20  ;;  %v1162_v13 = vmax.f32 %v1034_v59, 0.0  ;;  %v905_v61 = vand.u32 2147483647, %v777_v51  ;;  %v8599_v59 = vld [vmem:[#allocation26_spill] sm:$0xff] }
 0x207   : > { %v6801_v0 = vpop.f32.mrf.mxu2  ;;  %v6803_v33 = vpop.f32.mrf.mxu1  ;;  %v3344_v40 = vadd.f32 %v6728_v56, %v3163_v1  ;;  %v3177_v55 = vmul.f32 %v6726_v29, %v6797_v22  ;;  %v4693_v16 = vmul.f32 %v6704_v7, %v4641_v21  ;;  %v6815_v5 = vadd.f32 %v6745_v2, %v3176_v17 }
 0x208   : > { %v1178_v24 = vmax.f32 %v1050_v58, 0.0  ;;  %v921_v8 = vand.u32 2147483647, %v793_v37  ;;  %v1033_v30 = vsub.f32 1.0, %v905_v61  ;;  %v1369_v56 = vsub.f32 %v8579_v9, %v6612_v49 }
 0x209   : > { %v6811_v53 = vpop.f32.mrf.mxu3  ;;  %v6818_v28 = vadd.f32 %v6748_v34, %v3177_v55  ;;  %v1370_v29 = vsub.f32 %v8579_v9, %v6605_v32  ;;  %v4709_v51 = vrot.slane %v4693_v16, 6  ;;  %v4710_v36 = vrot.slane %v4693_v16, 1 }
 0x20a   : > { %v1860_v44 = vpack.c.bf16 %v1178_v24, %v1162_v13  ;;  %v1049_v20 = vsub.f32 1.0, %v921_v8  ;;  %v1161_v7 = vmax.f32 %v1033_v30, 0.0  ;;  %v1497_v1 = vand.u32 2147483647, %v1369_v56 }
 0x20b   : > { %v1498_v2 = vand.u32 2147483647, %v1370_v29  ;;  %v1383_v37 = vsub.f32 %v8599_v59, %v6602_v10  ;;  %v4724_v34 = vsel %vm4723_vm8, %v4709_v51, %v4710_v36  ;;  %v1384_v58 = vsub.f32 %v8599_v59, %v6598_v57 }
 0x20c   : > { %2640 = vmatpush.bf16.msra.mxu1 %v1860_v44  ;;  %v1177_v17 = vmax.f32 %v1049_v20, 0.0  ;;  %v1385_v55 = vsub.f32 %v8599_v59, %v6612_v49  ;;  %v6835_v13 = vsel %vm695_vm10, %v6743_v43, %v4724_v34  ;;  %v1625_v61 = vsub.f32 1.0, %v1497_v1  ;;  %v5507_v44 = vld [vmem:[%s5837_s14 + $0x58] sm:$0xff] }
 0x20d   : > { %v6826_v21 = vpop.f32.mrf.mxu0  ;;  %8600 = vst [vmem:[#allocation36_spill] sm:$0xff] %v6835_v13  ;;  %v1626_v16 = vsub.f32 1.0, %v1498_v2  ;;  %v1511_v24 = vand.u32 2147483647, %v1383_v37  ;;  %v1512_v29 = vand.u32 2147483647, %v1384_v58  ;;  %v1386_v36 = vsub.f32 %v8599_v59, %v6605_v32 }
 0x20e   : > { %v1859_v56 = vpack.c.bf16 %v1177_v17, %v1161_v7  ;;  %v1513_v51 = vand.u32 2147483647, %v1385_v55  ;;  %v6845_v20 = vmax.f32 %v1625_v61, 0.0  ;;  %v8601_v2 = vld [vmem:[#allocation27_spill] sm:$0xff]  ;;  %v1431_v19 = vsub.f32 %v8604_v48, %v6602_v10 }
 0x20f   : > { %v6837_v8 = vpop.f32.mrf.mxu2  ;;  %v6839_v30 = vpop.f32.mrf.mxu1  ;;  %v6847_v43 = vmax.f32 %v1626_v16, 0.0  ;;  %v1639_v1 = vsub.f32 1.0, %v1511_v24  ;;  %v1399_v37 = vsub.f32 %v8601_v2, %v6602_v10  ;;  %v1640_v7 = vsub.f32 1.0, %v1512_v29 }
 0x210   : > { %5177 = vmatmul.msk.bf16.gmra.mxu0 %vm1975_vm4, %v5507_v44  ;;  %v1641_v17 = vsub.f32 1.0, %v1513_v51  ;;  %v1514_v58 = vand.u32 2147483647, %v1386_v36  ;;  %v1400_v55 = vsub.f32 %v8601_v2, %v6598_v57  ;;  %v3178_v61 = vmul.f32 %v6759_v39, %v6845_v20 }
 0x211   : > { %v6851_v34 = vpop.f32.mrf.mxu3  ;;  %2571 = vmatpush.bf16.msra.mxu0 %v1859_v56  ;;  %v3179_v16 = vmul.f32 %v6770_v63, %v6847_v43  ;;  %v6860_v24 = vmax.f32 %v1639_v1, 0.0  ;;  %v1527_v31 = vand.u32 2147483647, %v1399_v37  ;;  %v6862_v14 = vmax.f32 %v1640_v7, 0.0 }
 0x212   : > { %5189 = vmatmul.msk.bf16.gmra.mxu1 %vm1975_vm4, %v5507_v44  ;;  %v6864_v56 = vmax.f32 %v1641_v17, 0.0  ;;  %v1642_v29 = vsub.f32 1.0, %v1514_v58  ;;  %v1528_v51 = vand.u32 2147483647, %v1400_v55  ;;  %v3332_v36 = vadd.f32 %v3331_v41, %v3178_v61 }
 0x213   : > { %v3345_v50 = vadd.f32 %v3344_v40, %v3179_v16  ;;  %v3192_v4 = vmul.f32 %v6753_v54, %v6860_v24  ;;  %v1655_v39 = vsub.f32 1.0, %v1527_v31  ;;  %v3193_v63 = vmul.f32 %v6761_v60, %v6862_v14  ;;  %v8602_v16 = vld [vmem:[#allocation24_spill] sm:$0xff] }
 0x214   : > { %5201 = vmatmul.msk.bf16.gmra.mxu2 %vm1975_vm4, %v5507_v44  ;;  %v3194_v1 = vmul.f32 %v6801_v0, %v6864_v56  ;;  %v6875_v37 = vmax.f32 %v1642_v29, 0.0  ;;  %v1656_v7 = vsub.f32 1.0, %v1528_v51  ;;  %v1401_v31 = vsub.f32 %v8601_v2, %v6612_v49 }
 0x215   : > { %v6869_v26 = vpop.f32.mrf.mxu0  ;;  %v3307_v41 = vadd.f32 %v6815_v5, %v3192_v4  ;;  %v6879_v40 = vmax.f32 %v1655_v39, 0.0  ;;  %v1402_v54 = vsub.f32 %v8601_v2, %v6605_v32  ;;  %v3320_v0 = vadd.f32 %v6818_v28, %v3193_v63 }
 0x216   : > { %5213 = vmatmul.msk.bf16.gmra.mxu3 %vm1975_vm4, %v5507_v44  ;;  %v3333_v58 = vadd.f32 %v3332_v36, %v3194_v1  ;;  %v3195_v55 = vmul.f32 %v6811_v53, %v6875_v37  ;;  %v6890_v44 = vmax.f32 %v1656_v7, 0.0  ;;  %v1529_v5 = vand.u32 2147483647, %v1401_v31 }
 0x217   : > { %v2450_v17 = vpop.f32.mrf.mxu2  ;;  %v6885_v60 = vpop.f32.mrf.mxu1  ;;  %v3208_v4 = vmul.f32 %v6787_v15, %v6879_v40  ;;  %v1530_v61 = vand.u32 2147483647, %v1402_v54  ;;  %v1415_v29 = vsub.f32 %v8602_v16, %v6602_v10  ;;  %v1416_v28 = vsub.f32 %v8602_v16, %v6598_v57 }
 0x218   : > { %v3346_v39 = vadd.f32 %v3345_v50, %v3195_v55  ;;  %v3209_v13 = vmul.f32 %v6803_v33, %v6890_v44  ;;  %v1417_v53 = vsub.f32 %v8602_v16, %v6612_v49  ;;  %v1657_v63 = vsub.f32 1.0, %v1529_v5 }
 0x219   : > { %v2519_v51 = vpop.f32.mrf.mxu3  ;;  %v3308_v36 = vadd.f32 %v3307_v41, %v3208_v4  ;;  %v1658_v1 = vsub.f32 1.0, %v1530_v61  ;;  %v1543_v15 = vand.u32 2147483647, %v1415_v29  ;;  %v1544_v31 = vand.u32 2147483647, %v1416_v28 }
 0x21a   : > { %v3321_v7 = vadd.f32 %v3320_v0, %v3209_v13  ;;  %v1545_v54 = vand.u32 2147483647, %v1417_v53  ;;  %v1418_v46 = vsub.f32 %v8602_v16, %v6605_v32  ;;  %v6904_v50 = vmax.f32 %v1657_v63, 0.0 }
 0x21b   : > { %v6906_v55 = vmax.f32 %v1658_v1, 0.0  ;;  %v1671_v33 = vsub.f32 1.0, %v1543_v15  ;;  %v1672_v41 = vsub.f32 1.0, %v1544_v31  ;;  %v1432_v13 = vsub.f32 %v8604_v48, %v6598_v57  ;;  %v5508_v31 = vld [vmem:[%s5837_s14] sm:$0xff] }
 0x21c   : > { %v1673_v4 = vsub.f32 1.0, %v1545_v54  ;;  %v1546_v5 = vand.u32 2147483647, %v1418_v46  ;;  %v3210_v0 = vmul.f32 %v6837_v8, %v6904_v50  ;;  %v1559_v28 = vand.u32 2147483647, %v1431_v19 }
 0x21d   : > { %8603 = vst [vmem:[#allocation38_spill] sm:$0xff] %v6906_v55  ;;  %v2317_v12 = vpop.f32.mrf.mxu0  ;;  %v3211_v61 = vmul.f32 %v6851_v34, %v6906_v55  ;;  %v6916_v29 = vmax.f32 %v1671_v33, 0.0  ;;  %v6918_v10 = vmax.f32 %v1672_v41, 0.0  ;;  %v1560_v46 = vand.u32 2147483647, %v1432_v13 }
 0x21e   : > { %v6920_v1 = vmax.f32 %v1673_v4, 0.0  ;;  %v1674_v15 = vsub.f32 1.0, %v1546_v5  ;;  %v3334_v57 = vadd.f32 %v3333_v58, %v3210_v0  ;;  %v1687_v34 = vsub.f32 1.0, %v1559_v28 }
 0x21f   : > { %8605 = vst [vmem:[#allocation40_spill] sm:$0xff] %v6916_v29  ;;  %v2452_v53 = vpop.f32.mrf.mxu2  ;;  %v2386_v63 = vpop.f32.mrf.mxu1  ;;  %v3347_v54 = vadd.f32 %v3346_v39, %v3211_v61  ;;  %v3224_v8 = vmul.f32 %v6826_v21, %v6916_v29  ;;  %v3225_v19 = vmul.f32 %v6839_v30, %v6918_v10  ;;  %v1688_v4 = vsub.f32 1.0, %v1560_v46 }
 0x220   : > { %8606 = vst [vmem:[#allocation43_spill] sm:$0xff] %v6918_v10  ;;  %5214 = vmatmul.msk.bf16.vlgmr.msra.gmra.mxu0 %vm1975_vm4, %v5508_v31  ;;  %v3226_v41 = vmul.f32 %v2450_v17, %v6920_v1  ;;  %v6929_v9 = vmax.f32 %v1674_v15, 0.0  ;;  %v6932_v13 = vmax.f32 %v1687_v34, 0.0  ;;  %v1433_v58 = vsub.f32 %v8604_v48, %v6612_v49 }
 0x221   : > { %8607 = vst [vmem:[#allocation44_spill] sm:$0xff] %v6920_v1  ;;  %v2521_v33 = vpop.f32.mrf.mxu3  ;;  %v3309_v5 = vadd.f32 %v3308_v36, %v3224_v8  ;;  %v1434_v21 = vsub.f32 %v8604_v48, %v6605_v32  ;;  %v3322_v39 = vadd.f32 %v3321_v7, %v3225_v19  ;;  %v6939_v61 = vmax.f32 %v1688_v4, 0.0 }
 0x222   : > { %8608 = vst [vmem:[#allocation45_spill] sm:$0xff] %v6929_v9  ;;  %5226 = vmatmul.msk.bf16.vlgmr.msra.gmra.mxu1 %vm1975_vm4, %v5508_v31  ;;  %v3335_v0 = vadd.f32 %v3334_v57, %v3226_v41  ;;  %v3227_v30 = vmul.f32 %v2519_v51, %v6929_v9  ;;  %v3240_v17 = vmul.f32 %v6869_v26, %v6932_v13  ;;  %v1561_v36 = vand.u32 2147483647, %v1433_v58  ;;  %v8611_v51 = vld [vmem:[#allocation39_spill] sm:$0xff] }
 0x223   : > { %8609 = vst [vmem:[#allocation46_spill] sm:$0xff] %v6932_v13  ;;  %v1562_v28 = vand.u32 2147483647, %v1434_v21  ;;  %v6945_v15 = vmul.f32 %v2317_v12, %v6642_v27  ;;  %v3241_v32 = vmul.f32 %v6885_v60, %v6939_v61  ;;  %v6950_v7 = vmul.f32 %v2386_v63, %v6639_v25 }
 0x224   : > { %8610 = vst [vmem:[#allocation47_spill] sm:$0xff] %v6939_v61  ;;  %5238 = vmatmul.msk.bf16.vlgmr.msra.gmra.mxu2 %vm1975_vm4, %v5508_v31  ;;  %v3348_v46 = vadd.f32 %v3347_v54, %v3227_v30  ;;  %v6954_v57 = vperm.slane %v8611_v51, 7  ;;  %v3310_v8 = vadd.f32 %v3309_v5, %v3240_v17  ;;  %v1689_v26 = vsub.f32 1.0, %v1561_v36 }
 0x225   : > { %v2319_v49 = vpop.f32.mrf.mxu0  ;;  %v1690_v34 = vsub.f32 1.0, %v1562_v28  ;;  %v6957_v19 = vperm.slane %v8611_v51, 6  ;;  %v3323_v54 = vadd.f32 %v3322_v39, %v3241_v32  ;;  %vm697_vm6 = vcmask 1045508  }
 0x226   : > { %5250 = vmatmul.msk.bf16.vlgmr.msra.gmra.mxu3 %vm1975_vm4, %v5508_v31  ;;  %8612 = vst [vmem:[#allocation39_spill] sm:$0xff] %v6954_v57  ;;  %v880_v60 = vsub.f32 %v8602_v16, %v6954_v57  ;;  %v896_v63 = vsub.f32 %v8604_v48, %v6954_v57  ;;  %v3311_v4 = vrot.slane %v3310_v8, 4  ;;  %v6966_v58 = vmax.f32 %v1689_v26, 0.0 }
 0x227   : > { %8613 = vst [vmem:[#allocation48_spill] sm:$0xff] %v6957_v19  ;;  %v2455_v12 = vpop.f32.mrf.mxu2  ;;  %v2388_v41 = vpop.f32.mrf.mxu1  ;;  %v6968_v5 = vmax.f32 %v1690_v34, 0.0  ;;  %v879_v21 = vsub.f32 %v8602_v16, %v6957_v19  ;;  %v3324_v17 = vrot.slane %v3323_v54, 4  ;;  %v895_v28 = vsub.f32 %v8604_v48, %v6957_v19 }
 0x228   : > { %v6964_v31 = vmul.f32 %v2455_v12, %v6658_v38  ;;  %8614 = vst [vmem:[#allocation49_spill] sm:$0xff] %v6966_v58  ;;  %v1008_v39 = vand.u32 2147483647, %v880_v60  ;;  %v1024_v36 = vand.u32 2147483647, %v896_v63  ;;  %v3312_v32 = vadd.f32 %v3311_v4, %v3310_v8 }
 0x229   : > { %8615 = vst [vmem:[#allocation50_spill] sm:$0xff] %v6968_v5  ;;  %v2524_v30 = vpop.f32.mrf.mxu3  ;;  %v3242_v25 = vmul.f32 %v2452_v53, %v6966_v58  ;;  %v3243_v12 = vmul.f32 %v2521_v33, %v6968_v5  ;;  %v1007_v38 = vand.u32 2147483647, %v879_v21  ;;  %v3325_v26 = vadd.f32 %v3324_v17, %v3323_v54 }
 0x22a   : > { %v1136_v27 = vsub.f32 1.0, %v1008_v39  ;;  %v1152_v34 = vsub.f32 1.0, %v1024_v36  ;;  %v1023_v11 = vand.u32 2147483647, %v895_v28  ;;  %v3313_v9 = vrot.slane %v3312_v32, 2 }
 0x22b   : > { %v3336_v61 = vadd.f32 %v3335_v0, %v3242_v25  ;;  %v3349_v1 = vadd.f32 %v3348_v46, %v3243_v12  ;;  %v1135_v13 = vsub.f32 1.0, %v1007_v38  ;;  %v3326_v63 = vrot.slane %v3325_v26, 2  ;;  %v5509_v38 = vld [vmem:[%s5837_s14 + $0x8] sm:$0xff] }
 0x22c   : > { %v1264_v55 = vmax.f32 %v1136_v27, 0.0  ;;  %v1280_v10 = vmax.f32 %v1152_v34, 0.0  ;;  %v1151_v8 = vsub.f32 1.0, %v1023_v11  ;;  %v3314_v4 = vadd.f32 %v3313_v9, %v3312_v32 }
 0x22d   : > { %v6976_v60 = vpop.f32.mrf.mxu0  ;;  %v3337_v53 = vrot.slane %v3336_v61, 4  ;;  %v3350_v58 = vrot.slane %v3349_v1, 4  ;;  %v1263_v33 = vmax.f32 %v1135_v13, 0.0  ;;  %v3327_v17 = vadd.f32 %v3326_v63, %v3325_v26 }
 0x22e   : > { %v1914_v39 = vpack.c.bf16 %v1280_v10, %v1264_v55  ;;  %v1279_v36 = vmax.f32 %v1151_v8, 0.0  ;;  %v3579_v25 = vmul.f32 %v2524_v30, %v6644_v3  ;;  %v3315_v0 = vrot.slane %v3314_v4, 1 }
 0x22f   : > { %v2457_v21 = vpop.f32.mrf.mxu2  ;;  %v6978_v54 = vpop.f32.mrf.mxu1  ;;  %v3338_v46 = vadd.f32 %v3337_v53, %v3336_v61  ;;  %v3351_v27 = vadd.f32 %v3350_v58, %v3349_v1  ;;  %v3592_v11 = vmul.f32 %v2319_v49, %v6660_v35  ;;  %v3328_v28 = vrot.slane %v3327_v17, 1 }
 0x230   : > { %5215 = vmatmul.msk.bf16.gmra.mxu0 %vm1975_vm4, %v5509_v38  ;;  %3051 = vmatpush.bf16.msrb.mxu3 %v1914_v39  ;;  %v1913_v13 = vpack.c.bf16 %v1279_v36, %v1263_v33  ;;  %v3593_v32 = vmul.f32 %v2388_v41, %v6668_v52  ;;  %v6986_v12 = vperm.slane %v8611_v51, 5  ;;  %v6998_v34 = vperm.slane %v8611_v51, 4 }
 0x231   : > { %v2526_v9 = vpop.f32.mrf.mxu3  ;;  %v3339_v55 = vrot.slane %v3338_v46, 2  ;;  %v3352_v10 = vrot.slane %v3351_v27, 2  ;;  %v3752_v30 = vadd.f32 %v3592_v11, %v6945_v15  ;;  %v6990_v26 = vadd.f32 %v3328_v28, %v3327_v17 }
 0x232   : > { %8616 = vst [vmem:[#allocation51_spill] sm:$0xff] %v6986_v12  ;;  %5227 = vmatmul.msk.bf16.gmra.mxu1 %vm1975_vm4, %v5509_v38  ;;  %2982 = vmatpush.bf16.msrb.mxu2 %v1913_v13  ;;  %v3765_v1 = vadd.f32 %v3593_v32, %v6950_v7  ;;  %v878_v61 = vsub.f32 %v8602_v16, %v6986_v12 }
 0x233   : > { %v894_v49 = vsub.f32 %v8604_v48, %v6986_v12  ;;  %v3340_v41 = vadd.f32 %v3339_v55, %v3338_v46  ;;  %v3353_v58 = vadd.f32 %v3352_v10, %v3351_v27  ;;  %8617 = vst [vmem:[#allocation52_spill] sm:$0xff] %v6998_v34  ;;  %v7001_v15 = vadd.f32 %v3315_v0, %v3314_v4 }
 0x234   : > { %5239 = vmatmul.msk.bf16.gmra.mxu2 %vm1975_vm4, %v5509_v38  ;;  %v3478_v8 = vrot.slane %v6990_v26, 4  ;;  %v1006_v53 = vand.u32 2147483647, %v878_v61  ;;  %v877_v11 = vsub.f32 %v8602_v16, %v6998_v34  ;;  %v893_v4 = vsub.f32 %v8604_v48, %v6998_v34 }
 0x235   : > { %v2324_v63 = vpop.f32.mrf.mxu0  ;;  %v3341_v7 = vrot.slane %v3340_v41, 1  ;;  %v3354_v33 = vrot.slane %v3353_v58, 1  ;;  %v1022_v17 = vand.u32 2147483647, %v894_v49  ;;  %v3594_v10 = vmul.f32 %v2457_v21, %v6673_v23 }
 0x236   : > { %5251 = vmatmul.msk.bf16.gmra.mxu3 %vm1975_vm4, %v5509_v38  ;;  %v7007_v46 = vsel %vm699_vm9, %v7001_v15, %v3478_v8  ;;  %v1134_v27 = vsub.f32 1.0, %v1006_v53  ;;  %v1005_v32 = vand.u32 2147483647, %v877_v11  ;;  %v1021_v55 = vand.u32 2147483647, %v893_v4 }
 0x237   : > { %v2460_v39 = vpop.f32.mrf.mxu2  ;;  %v2393_v36 = vpop.f32.mrf.mxu1  ;;  %v7013_v0 = vadd.f32 %v3354_v33, %v3353_v58  ;;  %v1150_v28 = vsub.f32 1.0, %v1022_v17  ;;  %v7016_v61 = vadd.f32 %v3341_v7, %v3340_v41  ;;  %v3778_v58 = vadd.f32 %v3594_v10, %v6964_v31 }
 0x238   : > { %v1262_v13 = vmax.f32 %v1134_v27, 0.0  ;;  %v1133_v53 = vsub.f32 1.0, %v1005_v32  ;;  %v1149_v48 = vsub.f32 1.0, %v1021_v55  ;;  %v3595_v33 = vmul.f32 %v2526_v9, %v6711_v62 }
 0x239   : > { %v2529_v38 = vpop.f32.mrf.mxu3  ;;  %v3479_v49 = vrot.slane %v7013_v0, 4  ;;  %v1278_v8 = vmax.f32 %v1150_v28, 0.0  ;;  %v3608_v21 = vmul.f32 %v6976_v60, %v6720_v47  ;;  %v3609_v4 = vmul.f32 %v6978_v54, %v6730_v42 }
 0x23a   : > { %v1261_v11 = vmax.f32 %v1133_v53, 0.0  ;;  %v1277_v41 = vmax.f32 %v1149_v48, 0.0  ;;  %v3791_v7 = vadd.f32 %v3595_v33, %v3579_v25  ;;  %v3610_v28 = vmul.f32 %v2460_v39, %v6778_v6 }
 0x23b   : > { %v7021_v16 = vsel %vm699_vm9, %v7016_v61, %v3479_v49  ;;  %v1912_v27 = vpack.c.bf16 %v1278_v8, %v1262_v13  ;;  %v3753_v31 = vadd.f32 %v3752_v30, %v3608_v21  ;;  %v3611_v10 = vmul.f32 %v2529_v38, %v6783_v45  ;;  %v5510_v13 = vld [vmem:[%s5837_s14 + $0x10] sm:$0xff] }
 0x23c   : > { %v3624_v9 = vmul.f32 %v2324_v63, %v6792_v18  ;;  %v1911_v49 = vpack.c.bf16 %v1277_v41, %v1261_v11  ;;  %v3766_v60 = vadd.f32 %v3765_v1, %v3609_v4  ;;  %v3779_v48 = vadd.f32 %v3778_v58, %v3610_v28 }
 0x23d   : > { %v2327_v17 = vpop.f32.mrf.mxu0  ;;  %2913 = vmatpush.bf16.msrb.mxu1 %v1912_v27  ;;  %v3625_v25 = vmul.f32 %v2393_v36, %v6797_v22  ;;  %v3792_v54 = vadd.f32 %v3791_v7, %v3611_v10  ;;  %v848_v1 = vsub.f32 %v8599_v59, %v6954_v57  ;;  %v864_v27 = vsub.f32 %v8601_v2, %v6954_v57 }
 0x23e   : > { %v3754_v53 = vadd.f32 %v3753_v31, %v3624_v9  ;;  %2844 = vmatpush.bf16.msrb.mxu0 %v1911_v49  ;;  %v3640_v63 = vmul.f32 %v2327_v17, %v6860_v24  ;;  %v847_v11 = vsub.f32 %v8599_v59, %v6957_v19  ;;  %v863_v17 = vsub.f32 %v8601_v2, %v6957_v19 }
 0x23f   : > { %v2462_v32 = vpop.f32.mrf.mxu2  ;;  %v2396_v55 = vpop.f32.mrf.mxu1  ;;  %v3767_v30 = vadd.f32 %v3766_v60, %v3625_v25  ;;  %v976_v4 = vand.u32 2147483647, %v848_v1  ;;  %vm3528_vm11 = vcmp.eq.f32.partialorder %v7001_v15, 0.0  ;;  %vm3529_vm12 = vcmp.eq.f32.partialorder %v6990_v26, 0.0 }
 0x240   : > { %5216 = vmatmul.msk.bf16.gmra.mxu0 %vm1975_vm4, %v5510_v13  ;;  %v3626_v39 = vmul.f32 %v2462_v32, %v6845_v20  ;;  %v3641_v38 = vmul.f32 %v2396_v55, %v6862_v14  ;;  %v3755_v21 = vadd.f32 %v3754_v53, %v3640_v63  ;;  %v992_v32 = vand.u32 2147483647, %v864_v27 }
 0x241   : > { %v2531_v8 = vpop.f32.mrf.mxu3  ;;  %v975_v55 = vand.u32 2147483647, %v847_v11  ;;  %v1104_v9 = vsub.f32 1.0, %v976_v4  ;;  %v991_v49 = vand.u32 2147483647, %v863_v17  ;;  %vm3530_vm15 = vcmp.eq.f32.partialorder %v7016_v61, 0.0 }
 0x242   : > { %v3627_v33 = vmul.f32 %v2531_v8, %v6847_v43  ;;  %5228 = vmatmul.msk.bf16.gmra.mxu1 %vm1975_vm4, %v5510_v13  ;;  %v3780_v58 = vadd.f32 %v3779_v48, %v3626_v39  ;;  %v3768_v41 = vadd.f32 %v3767_v30, %v3641_v38  ;;  %v1120_v8 = vsub.f32 1.0, %v992_v32 }
 0x243   : > { %v1232_v53 = vmax.f32 %v1104_v9, 0.0  ;;  %v1103_v39 = vsub.f32 1.0, %v975_v55  ;;  %vm3531_vm0 = vcmp.eq.f32.partialorder %v7013_v0, 0.0 }
 0x244   : > { %v3793_v36 = vadd.f32 %v3792_v54, %v3627_v33  ;;  %5240 = vmatmul.msk.bf16.gmra.mxu2 %vm1975_vm4, %v5510_v13  ;;  %v1119_v33 = vsub.f32 1.0, %v991_v49  ;;  %v1248_v38 = vmax.f32 %v1120_v8, 0.0  ;;  %v846_v8 = vsub.f32 %v8599_v59, %v6986_v12 }
 0x245   : > { %v2329_v7 = vpop.f32.mrf.mxu0  ;;  %v1231_v1 = vmax.f32 %v1103_v39, 0.0 }
 0x246   : > { %5252 = vmatmul.msk.bf16.gmra.mxu3 %vm1975_vm4, %v5510_v13  ;;  %v3656_v28 = vmul.f32 %v2329_v7, %v6879_v40  ;;  %v1247_v27 = vmax.f32 %v1119_v33, 0.0  ;;  %v1898_v7 = vpack.c.bf16 %v1248_v38, %v1232_v53  ;;  %v861_v53 = vsub.f32 %v8601_v2, %v6998_v34  ;;  %v8620_v38 = vld [vmem:[#allocation46_spill] sm:$0xff] }
 0x247   : > { %v2465_v31 = vpop.f32.mrf.mxu2  ;;  %v2398_v10 = vpop.f32.mrf.mxu1 }
 0x248   : > { %v3642_v60 = vmul.f32 %v2465_v31, %v6864_v56  ;;  %v3756_v48 = vadd.f32 %v3755_v21, %v3656_v28  ;;  %v3657_v25 = vmul.f32 %v2398_v10, %v6890_v44  ;;  %v1897_v17 = vpack.c.bf16 %v1247_v27, %v1231_v1  ;;  %3052 = vmatpush.bf16.msrb.mxu3 %v1898_v7  ;;  %v8618_v31 = vld [vmem:[#allocation43_spill] sm:$0xff] }
 0x249   : > { %v2534_v54 = vpop.f32.mrf.mxu3  ;;  %v989_v27 = vand.u32 2147483647, %v861_v53 }
 0x24a   : > { %v3781_v30 = vadd.f32 %v3780_v58, %v3642_v60  ;;  %v3643_v13 = vmul.f32 %v2534_v54, %v6875_v37  ;;  %v3769_v63 = vadd.f32 %v3768_v41, %v3657_v25  ;;  %2983 = vmatpush.bf16.msrb.mxu2 %v1897_v17  ;;  %v5511_v41 = vld [vmem:[%s5837_s14 + $0x18] sm:$0xff]  ;;  %v862_v54 = vsub.f32 %v8601_v2, %v6986_v12 }
 0x24c   : > { %v3794_v11 = vadd.f32 %v3793_v36, %v3643_v13  ;;  %v8619_v36 = vld [vmem:[#allocation38_spill] sm:$0xff]  ;;  %v990_v13 = vand.u32 2147483647, %v862_v54 }
 0x24d   : > { %v2332_v4 = vpop.f32.mrf.mxu0 }
 0x24e   : > { %v3672_v21 = vmul.f32 %v2332_v4, %v6916_v29 }
 0x24f   : > { %v2467_v28 = vpop.f32.mrf.mxu2  ;;  %v2401_v32 = vpop.f32.mrf.mxu1 }
 0x250   : > { %v3658_v55 = vmul.f32 %v2467_v28, %v6904_v50  ;;  %v3757_v58 = vadd.f32 %v3756_v48, %v3672_v21  ;;  %v3673_v10 = vmul.f32 %v2401_v32, %v8618_v31  ;;  %5217 = vmatmul.msk.bf16.gmra.mxu0 %vm1975_vm4, %v5511_v41  ;;  %v845_v48 = vsub.f32 %v8599_v59, %v6998_v34  ;;  %v8621_v32 = vld [vmem:[#allocation44_spill] sm:$0xff] }
 0x251   : > { %v2536_v9 = vpop.f32.mrf.mxu3  ;;  %v1118_v21 = vsub.f32 1.0, %v990_v13 }
 0x252   : > { %v3782_v49 = vadd.f32 %v3781_v30, %v3658_v55  ;;  %v3659_v60 = vmul.f32 %v2536_v9, %v8619_v36  ;;  %v3770_v25 = vadd.f32 %v3769_v63, %v3673_v10  ;;  %5229 = vmatmul.msk.bf16.gmra.mxu1 %vm1975_vm4, %v5511_v41  ;;  %v974_v30 = vand.u32 2147483647, %v846_v8 }
 0x253   : > { %v973_v63 = vand.u32 2147483647, %v845_v48  ;;  %v1246_v54 = vmax.f32 %v1118_v21, 0.0 }
 0x254   : > { %v3795_v39 = vadd.f32 %v3794_v11, %v3659_v60  ;;  %5241 = vmatmul.msk.bf16.gmra.mxu2 %vm1975_vm4, %v5511_v41  ;;  %v1102_v17 = vsub.f32 1.0, %v974_v30  ;;  %v8622_v11 = vld [vmem:[#allocation47_spill] sm:$0xff]  ;;  %v1117_v60 = vsub.f32 1.0, %v989_v27 }
 0x255   : > { %v2334_v33 = vpop.f32.mrf.mxu0  ;;  %v1101_v28 = vsub.f32 1.0, %v973_v63 }
 0x256   : > { %5253 = vmatmul.msk.bf16.gmra.mxu3 %vm1975_vm4, %v5511_v41  ;;  %v3688_v1 = vmul.f32 %v2334_v33, %v8620_v38  ;;  %v1230_v8 = vmax.f32 %v1102_v17, 0.0  ;;  %v8623_v41 = vld [vmem:[#allocation45_spill] sm:$0xff]  ;;  %v1245_v30 = vmax.f32 %v1117_v60, 0.0 }
 0x257   : > { %v2470_v7 = vpop.f32.mrf.mxu2  ;;  %v2403_v4 = vpop.f32.mrf.mxu1  ;;  %v1229_v48 = vmax.f32 %v1101_v28, 0.0 }
 0x258   : > { %v3674_v55 = vmul.f32 %v2470_v7, %v8621_v32  ;;  %v3758_v10 = vadd.f32 %v3757_v58, %v3688_v1  ;;  %v3689_v9 = vmul.f32 %v2403_v4, %v8622_v11  ;;  %v1896_v38 = vpack.c.bf16 %v1246_v54, %v1230_v8  ;;  %v7086_v54 = vld [vmem:[%s5814_s18 + $0x10] ss:$2 sm:$0xff] }
 0x259   : > { %v2539_v2 = vpop.f32.mrf.mxu3  ;;  %v1895_v58 = vpack.c.bf16 %v1245_v30, %v1229_v48  ;;  %v8625_v48 = vstv %s5860_s16  ;;  %v8626_v30 = vstv %s5863_s11 }
 0x25a   : > { %v3783_v59 = vadd.f32 %v3782_v49, %v3674_v55  ;;  %v3675_v31 = vmul.f32 %v2539_v2, %v8623_v41  ;;  %v3759_v33 = vrot.slane %v3758_v10, 4  ;;  %v3771_v53 = vadd.f32 %v3770_v25, %v3689_v9  ;;  %2914 = vmatpush.bf16.msrb.mxu1 %v1896_v38  ;;  %v8624_v25 = vld [vmem:[#allocation49_spill] sm:$0xff] }
 0x25b   : > { %2845 = vmatpush.bf16.msrb.mxu0 %v1895_v58 }
 0x25c   : > { %v3796_v13 = vadd.f32 %v3795_v39, %v3675_v31  ;;  %v3760_v63 = vadd.f32 %v3759_v33, %v3758_v10  ;;  %v3772_v36 = vrot.slane %v3771_v53, 4  ;;  %v5512_v31 = vld [vmem:[%s5837_s14 + $0x20] sm:$0xff]  ;;  %v514_v33 = vmul.f32 %v7086_v54, %v8625_v48 }
 0x25d   : > { %v7075_v1 = vpop.f32.mrf.mxu0 }
 0x25e   : > { %v3761_v27 = vrot.slane %v3760_v63, 2  ;;  %v3773_v7 = vadd.f32 %v3772_v36, %v3771_v53  ;;  %v7092_v53 = vld [vmem:[%s5814_s18 + $0x11] ss:$2 sm:$0xff] }
 0x25f   : > { %v2472_v4 = vpop.f32.mrf.mxu2  ;;  %v7077_v17 = vpop.f32.mrf.mxu1 }
 0x260   : > { %v3762_v49 = vadd.f32 %v3761_v27, %v3760_v63  ;;  %v3774_v2 = vrot.slane %v3773_v7, 2  ;;  %v3690_v21 = vmul.f32 %v2472_v4, %v8624_v25  ;;  %5218 = vmatmul.msk.bf16.gmra.mxu0 %vm1975_vm4, %v5512_v31 }
 0x261   : > { %v2541_v39 = vpop.f32.mrf.mxu3 }
 0x262   : > { %v3763_v38 = vrot.slane %v3762_v49, 1  ;;  %v3775_v28 = vadd.f32 %v3774_v2, %v3773_v7  ;;  %v3784_v55 = vadd.f32 %v3783_v59, %v3690_v21  ;;  %v3691_v36 = vmul.f32 %v2541_v39, %v6968_v5  ;;  %5230 = vmatmul.msk.bf16.gmra.mxu1 %vm1975_vm4, %v5512_v31 }
 0x263   : > { %v517_v59 = vmul.f32 %v7092_v53, %v8626_v30  ;;  %v8627_v7 = vmov 0.0  }
 0x264   : > { %v3764_v10 = vadd.f32 %v3763_v38, %v3762_v49  ;;  %v3776_v9 = vrot.slane %v3775_v28, 1  ;;  %v3785_v60 = vrot.slane %v3784_v55, 4  ;;  %v3797_v8 = vadd.f32 %v3796_v13, %v3691_v36  ;;  %5242 = vmatmul.msk.bf16.gmra.mxu2 %vm1975_vm4, %v5512_v31  ;;  %v7106_v49 = vld [vmem:[%s5824_s20 + $0x10] sm:$0x77]  ;;  %v8629_v38 = vld [vmem:[#allocation28_spill] sm:$0xff] }
 0x265   : > { %v7099_v63 = vpop.f32.mrf.mxu0  ;;  %v5314_v4 = vsel %vm3528_vm11, 1.0, %v8627_v7  ;;  %8628 = vst [vmem:[#allocation53_spill] sm:$0xff] %v7106_v49  ;;  %v816_v36 = vsub.f32 %v8629_v38, %v6954_v57  ;;  %v5315_v48 = vsel %vm3529_vm12, 1.0, %v8627_v7  ;;  %v3502_v41 = vsub.f32 %v7106_v49, %v7007_v46 }
 0x266   : > { %vm4016_vm13 = vcmp.eq.f32.partialorder %v3764_v10, 0.0  ;;  %v3777_v58 = vadd.f32 %v3776_v9, %v3775_v28  ;;  %v3786_v27 = vadd.f32 %v3785_v60, %v3784_v55  ;;  %v3798_v13 = vrot.slane %v3797_v8, 4  ;;  %5254 = vmatmul.msk.bf16.gmra.mxu3 %vm1975_vm4, %v5512_v31  ;;  %v8630_v28 = vld [vmem:[#allocation29_spill] sm:$0xff] }
 0x267   : > { %v5338_v2 = vsel %vm4016_vm13, 1.0, %v8627_v7  ;;  %v7109_v21 = vpop.f32.mrf.mxu2  ;;  %v7111_v39 = vpop.f32.mrf.mxu1  ;;  %v832_v55 = vsub.f32 %v8630_v28, %v6954_v57  ;;  %v519_v60 = vadd.f32 %v517_v59, %v514_v33  ;;  %v944_v59 = vand.u32 2147483647, %v816_v36 }
 0x268   : > { %v7117_v9 = vmul.f32 %v5338_v2, %v5314_v4  ;;  %v3926_v31 = vrot.slane %v3777_v58, 4  ;;  %vm4017_vm14 = vcmp.eq.f32.partialorder %v3777_v58, 0.0  ;;  %v3787_v15 = vrot.slane %v3786_v27, 2 }
 0x269   : > { %v5339_v30 = vsel %vm4017_vm14, 1.0, %v8627_v7  ;;  %v3799_v5 = vadd.f32 %v3798_v13, %v3797_v8  ;;  %v7123_v25 = vpop.f32.mrf.mxu3  ;;  %v960_v26 = vand.u32 2147483647, %v832_v55  ;;  %v815_v11 = vsub.f32 %v8629_v38, %v6957_v19 }
 0x26a   : > { %8631 = vst [vmem:[#allocation54_spill] sm:$0xff] %v7117_v9  ;;  %v3934_v4 = vsel %vm699_vm9, %v3764_v10, %v3926_v31  ;;  %v7128_v2 = vmul.f32 %v5339_v30, %v5315_v48  ;;  %v3788_v58 = vadd.f32 %v3787_v15, %v3786_v27  ;;  %v831_v8 = vsub.f32 %v8630_v28, %v6957_v19 }
 0x26b   : > { %v3942_v57 = vrot.slane %v3934_v4, 7  ;;  %v3800_v33 = vrot.slane %v3799_v5, 2  ;;  %v1072_v27 = vsub.f32 1.0, %v944_v59  ;;  %v8633_v31 = vstv %s5866_s30 }
 0x26c   : > { %8632 = vst [vmem:[#allocation55_spill] sm:$0xff] %v7128_v2  ;;  %v3789_v9 = vrot.slane %v3788_v58, 1  ;;  %v522_v15 = vadd.f32 %v8633_v31, %v519_v60  ;;  %v3510_v36 = vand.u32 2147483647, %v3502_v41  ;;  %v1088_v55 = vsub.f32 1.0, %v960_v26  ;;  %v5516_v31 = vld [vmem:[%s5819_s27 + $0x8] sm:$0xff] }
 0x26d   : > { %v3958_v46 = vsub.f32 %v7106_v49, %v3942_v57  ;;  %v3801_v10 = vadd.f32 %v3800_v33, %v3799_v5  ;;  %v7136_v13 = vpop.f32.mrf.mxu0  ;;  %v1200_v57 = vmax.f32 %v1072_v27, 0.0  ;;  %v5316_v5 = vsel %vm3530_vm15, 1.0, %v8627_v7  ;;  %v5515_v33 = vld [vmem:[%s5837_s14 + $0x28] sm:$0xff]  ;;  %v8634_v27 = vld [vmem:[#allocation22_spill] sm:$0xff] }
 0x26e   : > { %v3790_v48 = vadd.f32 %v3789_v9, %v3788_v58  ;;  %v943_v41 = vand.u32 2147483647, %v815_v11  ;;  %v959_v9 = vand.u32 2147483647, %v831_v8  ;;  %v524_v49 = vmul.f32 %v5516_v31, %v522_v15  ;;  %v5517_v2 = vld [vmem:[%s5814_s18] ss:$2 sm:$0xff] }
 0x26f   : > { %v3966_v30 = vand.u32 2147483647, %v3958_v46  ;;  %v3802_v4 = vrot.slane %v3801_v10, 1  ;;  %v7141_v19 = vpop.f32.mrf.mxu2  ;;  %v7143_v61 = vpop.f32.mrf.mxu1  ;;  %v1216_v46 = vmax.f32 %v1088_v55, 0.0  ;;  %v7154_v32 = vsub.f32 %v8634_v27, %v5517_v2  ;;  %v7166_v2 = vld [vmem:[%s5824_s20 + $0x18] sm:$0x77] }
 0x270   : > { %vm4018_vm1 = vcmp.eq.f32.partialorder %v3790_v48, 0.0  ;;  %5219 = vmatmul.msk.bf16.gmra.mxu0 %vm1975_vm4, %v5515_v33  ;;  %v5317_v55 = vsel %vm3531_vm0, 1.0, %v8627_v7  ;;  %8637 = vst [vmem:[#allocation57_spill] sm:$0xff] %v7166_v2  ;;  %v814_v0 = vsub.f32 %v8629_v38, %v6986_v12  ;;  %v830_v27 = vsub.f32 %v8630_v28, %v6986_v12 }
 0x271   : > { %v5328_v60 = vrot.slane %v3966_v30, 9  ;;  %v5340_v58 = vsel %vm4018_vm1, 1.0, %v8627_v7  ;;  %v3803_v59 = vadd.f32 %v3802_v4, %v3801_v10  ;;  %v7149_v26 = vpop.f32.mrf.mxu3  ;;  %v1882_v10 = vpack.c.bf16 %v1216_v46, %v1200_v57  ;;  %v5518_v57 = vld [vmem:[%s5814_s18 + $0x1] ss:$2 sm:$0xff] }
 0x272   : > { %v7156_v29 = vmul.f32 %v5340_v58, %v5316_v5  ;;  %5231 = vmatmul.msk.bf16.gmra.mxu1 %vm1975_vm4, %v5515_v33  ;;  %v1071_v30 = vsub.f32 1.0, %v943_v41  ;;  %v1087_v4 = vsub.f32 1.0, %v959_v9  ;;  %vm4726_vm11 = vcmask 1044484  }
 0x273   : > { %v7159_v11 = vadd.f32 %v5328_v60, %v3510_v36  ;;  %v3927_v8 = vrot.slane %v3803_v59, 4  ;;  %vm4019_vm2 = vcmp.eq.f32.partialorder %v3803_v59, 0.0  ;;  %3053 = vmatpush.bf16.msrb.mxu3 %v1882_v10  ;;  %v8639_v60 = vld [vmem:[#allocation23_spill] sm:$0xff]  ;;  %v813_v10 = vsub.f32 %v8629_v38, %v6998_v34 }
 0x274   : > { %8635 = vst [vmem:[#allocation22_spill] sm:$0xff] %v7156_v29  ;;  %v5341_v15 = vsel %vm4019_vm2, 1.0, %v8627_v7  ;;  %5243 = vmatmul.msk.bf16.gmra.mxu2 %vm1975_vm4, %v5515_v33  ;;  %v7178_v59 = vsub.f32 %v8639_v60, %v5518_v57  ;;  %v1199_v9 = vmax.f32 %v1071_v30, 0.0  ;;  %v958_v60 = vand.u32 2147483647, %v830_v27  ;;  %v8642_v27 = vld [vmem:[#allocation37_spill] sm:$0xff] }
 0x275   : > { %8636 = vst [vmem:[#allocation56_spill] sm:$0xff] %v7159_v11  ;;  %v3935_v5 = vsel %vm699_vm9, %v3790_v48, %v3927_v8  ;;  %v7169_v58 = vmul.f32 %v5341_v15, %v5317_v55  ;;  %v7172_v36 = vpop.f32.mrf.mxu0  ;;  %v1215_v48 = vmax.f32 %v1087_v4, 0.0  ;;  %v942_v8 = vand.u32 2147483647, %v814_v0 }
 0x276   : > { %8640 = vst [vmem:[#allocation23_spill] sm:$0xff] %v7178_v59  ;;  %v3943_v41 = vrot.slane %v3935_v5, 7  ;;  %5255 = vmatmul.msk.bf16.gmra.mxu3 %vm1975_vm4, %v5515_v33  ;;  %v829_v55 = vsub.f32 %v8630_v28, %v6998_v34  ;;  %v8641_v15 = vstv %s5884_s2  ;;  %v3503_v33 = vsub.f32 %v7166_v2, %v7021_v16 }
 0x277   : > { %8638 = vst [vmem:[#allocation58_spill] sm:$0xff] %v7169_v58  ;;  %v7181_v46 = vpop.f32.mrf.mxu2  ;;  %v7183_v31 = vpop.f32.mrf.mxu1  ;;  %v527_v5 = vadd.f32 %v8641_v15, %v524_v49  ;;  %v1881_v57 = vpack.c.bf16 %v1215_v48, %v1199_v9  ;;  %v1070_v58 = vsub.f32 1.0, %v942_v8  ;;  %v941_v12 = vand.u32 2147483647, %v813_v10 }
 0x278   : > { %v3959_v30 = vsub.f32 %v7166_v2, %v3943_v41  ;;  %v585_v0 = vperm.slane %v7154_v32, 1  ;;  %v619_v38 = vperm.slane %v7178_v59, 1  ;;  %v1086_v34 = vsub.f32 1.0, %v958_v60 }
 0x279   : > { %v7196_v4 = vpop.f32.mrf.mxu3  ;;  %2984 = vmatpush.bf16.msrb.mxu2 %v1881_v57  ;;  %v1198_v28 = vmax.f32 %v1070_v58, 0.0  ;;  %v957_v49 = vand.u32 2147483647, %v829_v55  ;;  %v1069_v15 = vsub.f32 1.0, %v941_v12  ;;  %v7202_v16 = vsub.f32 %v8611_v51, %v7086_v54 }
 0x27a   : > { %v3967_v11 = vand.u32 2147483647, %v3959_v30  ;;  %v584_v41 = vperm.slane %v7154_v32, 0  ;;  %v3511_v9 = vand.u32 2147483647, %v3503_v33  ;;  %v7206_v8 = vmul.f32 %v8642_v27, %v527_v5 }
 0x27b   : > { %v1214_v30 = vmax.f32 %v1086_v34, 0.0  ;;  %v1085_v57 = vsub.f32 1.0, %v957_v49  ;;  %v1197_v60 = vmax.f32 %v1069_v15, 0.0  ;;  %v589_v58 = vperm.slane %v7154_v32, 5  ;;  %v5519_v49 = vld [vmem:[%s5837_s14 + $0x30] sm:$0xff] }
 0x27c   : > { %v5329_v48 = vrot.slane %v3967_v11, 9  ;;  %8643 = vst [vmem:[#allocation37_spill] sm:$0xff] %v7206_v8  ;;  %v618_v12 = vperm.slane %v7178_v59, 0  ;;  %v623_v51 = vperm.slane %v7178_v59, 5  ;;  %v7217_v11 = vsub.f32 %v7206_v8, %v7092_v53 }
 0x27d   : > { %v7208_v10 = vpop.f32.mrf.mxu0  ;;  %v652_v55 = vsel %vm650_vm5, %v585_v0, %v619_v38  ;;  %v1880_v27 = vpack.c.bf16 %v1214_v30, %v1198_v28  ;;  %v1213_v34 = vmax.f32 %v1085_v57, 0.0  ;;  %v588_v15 = vperm.slane %v7154_v32, 4 }
 0x27e   : > { %v7213_v54 = vadd.f32 %v5329_v48, %v3511_v9  ;;  %8645 = vst [vmem:[#allocation60_spill] sm:$0xff] %v7217_v11  ;;  %v593_v9 = vperm.slane %v7202_v16, 1  ;;  %v597_v48 = vperm.slane %v7202_v16, 5  ;;  %v622_v53 = vperm.slane %v7178_v59, 4 }
 0x27f   : > { %v2482_v5 = vpop.f32.mrf.mxu2  ;;  %v2416_v33 = vpop.f32.mrf.mxu1  ;;  %2915 = vmatpush.bf16.msrb.mxu1 %v1880_v27  ;;  %v1879_v29 = vpack.c.bf16 %v1213_v34, %v1197_v60  ;;  %v627_v38 = vperm.slane %v7217_v11, 1  ;;  %v631_v28 = vperm.slane %v7217_v11, 5  ;;  %v651_v0 = vsel %vm650_vm5, %v584_v41, %v618_v12 }
 0x280   : > { %8644 = vst [vmem:[#allocation59_spill] sm:$0xff] %v7213_v54  ;;  %5220 = vmatmul.msk.bf16.gmra.mxu0 %vm1975_vm4, %v5519_v49  ;;  %v683_v54 = vrot.slane %v652_v55, 6  ;;  %v656_v30 = vsel %vm650_vm5, %v589_v58, %v623_v51  ;;  %v592_v57 = vperm.slane %v7202_v16, 0  ;;  %v596_v60 = vperm.slane %v7202_v16, 4  ;;  %v8646_v55 = vld [vmem:[#allocation42_spill] sm:$0xff] }
 0x281   : > { %v2551_v2 = vpop.f32.mrf.mxu3  ;;  %2846 = vmatpush.bf16.msrb.mxu0 %v1879_v29  ;;  %v626_v27 = vperm.slane %v7217_v11, 0  ;;  %v630_v34 = vperm.slane %v7217_v11, 4  ;;  %v4080_v7 = vmul.f32 %v7075_v1, %v8646_v55  ;;  %v4096_v59 = vmul.f32 %v7099_v63, %v6660_v35 }
 0x282   : > { %5232 = vmatmul.msk.bf16.gmra.mxu1 %vm1975_vm4, %v5519_v49  ;;  %v655_v58 = vsel %vm650_vm5, %v588_v15, %v622_v53  ;;  %v686_v29 = vrot.slane %v656_v30, 6  ;;  %v7242_v12 = vsel %vm695_vm10, %v651_v0, %v683_v54  ;;  %v660_v51 = vsel %vm650_vm5, %v593_v9, %v627_v38  ;;  %v8647_v54 = vld [vmem:[#allocation41_spill] sm:$0xff] }
 0x283   : > { %v664_v11 = vsel %vm650_vm5, %v597_v48, %v631_v28  ;;  %v4097_v1 = vmul.f32 %v7111_v39, %v6668_v52  ;;  %v4112_v35 = vmul.f32 %v7136_v13, %v6720_v47  ;;  %v659_v15 = vsel %vm650_vm5, %v592_v57, %v626_v27  ;;  %v8648_v28 = vld [vmem:[#allocation33_spill] sm:$0xff]  ;;  %v8649_v27 = vld [vmem:[#allocation40_spill] sm:$0xff] }
 0x284   : > { %5244 = vmatmul.msk.bf16.gmra.mxu2 %vm1975_vm4, %v5519_v49  ;;  %v663_v53 = vsel %vm650_vm5, %v596_v60, %v630_v34  ;;  %v4081_v0 = vmul.f32 %v7077_v17, %v8647_v54  ;;  %v4256_v9 = vadd.f32 %v4096_v59, %v4080_v7  ;;  %v4099_v48 = vmul.f32 %v7149_v26, %v6711_v62 }
 0x285   : > { %v2349_v41 = vpop.f32.mrf.mxu0  ;;  %v4113_v52 = vmul.f32 %v7143_v61, %v6730_v42  ;;  %v4128_v47 = vmul.f32 %v7172_v36, %v6792_v18  ;;  %v689_v13 = vrot.slane %v660_v51, 6  ;;  %v692_v38 = vrot.slane %v664_v11, 6  ;;  %v8650_v51 = vld [vmem:[#allocation38_spill] sm:$0xff] }
 0x286   : > { %5256 = vmatmul.msk.bf16.gmra.mxu3 %vm1975_vm4, %v5519_v49  ;;  %v4098_v49 = vmul.f32 %v7141_v19, %v6673_v23  ;;  %v4082_v30 = vmul.f32 %v7109_v21, %v8648_v28  ;;  %v4114_v17 = vmul.f32 %v7181_v46, %v6778_v6  ;;  %v4083_v23 = vmul.f32 %v7123_v25, %v6644_v3 }
 0x287   : > { %v2485_v63 = vpop.f32.mrf.mxu2  ;;  %v2418_v55 = vpop.f32.mrf.mxu1  ;;  %v4269_v19 = vadd.f32 %v4097_v1, %v4081_v0  ;;  %v4257_v62 = vadd.f32 %v4256_v9, %v4112_v35  ;;  %v4129_v42 = vmul.f32 %v7183_v31, %v6797_v22  ;;  %v4115_v18 = vmul.f32 %v7196_v4, %v6783_v45  ;;  %v8651_v35 = vld [vmem:[#allocation43_spill] sm:$0xff] }
 0x288   : > { %v4282_v7 = vadd.f32 %v4098_v49, %v4082_v30  ;;  %v4130_v61 = vmul.f32 %v2482_v5, %v6845_v20  ;;  %v4144_v21 = vmul.f32 %v7208_v10, %v6860_v24  ;;  %v4295_v26 = vadd.f32 %v4099_v48, %v4083_v23 }
 0x289   : > { %v2554_v39 = vpop.f32.mrf.mxu3  ;;  %v4270_v36 = vadd.f32 %v4269_v19, %v4113_v52  ;;  %v4258_v6 = vadd.f32 %v4257_v62, %v4128_v47  ;;  %v4145_v59 = vmul.f32 %v2416_v33, %v6862_v14  ;;  %v4131_v46 = vmul.f32 %v2551_v2, %v6847_v43  ;;  %v5520_v2 = vld [vmem:[%s5837_s14 + $0x38] sm:$0xff]  ;;  %v8653_v47 = vld [vmem:[#allocation46_spill] sm:$0xff] }
 0x28a   : > { %v4283_v25 = vadd.f32 %v4282_v7, %v4114_v17  ;;  %v4146_v22 = vmul.f32 %v2485_v63, %v6864_v56  ;;  %v4160_v31 = vmul.f32 %v2349_v41, %v6879_v40  ;;  %v7281_v45 = vsel %vm695_vm10, %v655_v58, %v686_v29 }
 0x28b   : > { %v7284_v20 = vsel %vm695_vm10, %v659_v15, %v689_v13  ;;  %v4271_v24 = vadd.f32 %v4270_v36, %v4129_v42  ;;  %v4161_v4 = vmul.f32 %v2418_v55, %v6890_v44  ;;  %v4296_v11 = vadd.f32 %v4295_v26, %v4115_v18  ;;  %v8655_v18 = vld [vmem:[#allocation44_spill] sm:$0xff]  ;;  %v8656_v26 = vld [vmem:[#allocation47_spill] sm:$0xff] }
 0x28c   : > { %v4284_v5 = vadd.f32 %v4283_v25, %v4130_v61  ;;  %v4259_v33 = vadd.f32 %v4258_v6, %v4144_v21  ;;  %v4147_v43 = vmul.f32 %v2554_v39, %v6875_v37  ;;  %v7291_v56 = vsel %vm695_vm10, %v663_v53, %v692_v38  ;;  %v8652_v53 = vld [vmem:[#allocation30_spill] sm:$0xff] }
 0x28d   : > { %v2352_v3 = vpop.f32.mrf.mxu0  ;;  %v4272_v40 = vadd.f32 %v4271_v24, %v4145_v59  ;;  %v4297_v44 = vadd.f32 %v4296_v11, %v4131_v46  ;;  %v7297_v29 = vperm.slane %v7206_v8, 1  ;;  %v7302_v55 = vperm.slane %v7206_v8, 3  ;;  %v8657_v46 = vld [vmem:[#allocation31_spill] sm:$0xff]  ;;  %v8658_v11 = vld [vmem:[#allocation45_spill] sm:$0xff] }
 0x28e   : > { %v4176_v34 = vmul.f32 %v2352_v3, %v8649_v27  ;;  %v4285_v41 = vadd.f32 %v4284_v5, %v4146_v22  ;;  %v4260_v58 = vadd.f32 %v4259_v33, %v4160_v31  ;;  %v7305_v15 = vperm.slane %v7206_v8, 0  ;;  %v8659_v33 = vld [vmem:[#allocation34_spill] sm:$0xff] }
 0x28f   : > { %v2487_v10 = vpop.f32.mrf.mxu2  ;;  %v2421_v14 = vpop.f32.mrf.mxu1  ;;  %v4273_v37 = vadd.f32 %v4272_v40, %v4161_v4  ;;  %v1324_v54 = vsub.f32 %v8652_v53, %v7297_v29  ;;  %v7310_v0 = vperm.slane %v7206_v8, 2  ;;  %v1326_v52 = vsub.f32 %v8652_v53, %v7302_v55 }
 0x290   : > { %5221 = vmatmul.msk.bf16.gmra.mxu0 %vm1975_vm4, %v5520_v2  ;;  %v4162_v57 = vmul.f32 %v2487_v10, %v6904_v50  ;;  %v4177_v63 = vmul.f32 %v2421_v14, %v8651_v35  ;;  %v4298_v50 = vadd.f32 %v4297_v44, %v4147_v43  ;;  %v4261_v9 = vadd.f32 %v4260_v58, %v4176_v34 }
 0x291   : > { %v2556_v60 = vpop.f32.mrf.mxu3  ;;  %v5668_v13 = vmov 1431651396   ;;  %v1323_v28 = vsub.f32 %v8652_v53, %v7305_v15  ;;  %v7321_v30 = vand.u32 2147483647, %v1324_v54  ;;  %v1325_v42 = vsub.f32 %v8652_v53, %v7310_v0 }
 0x292   : > { %5233 = vmatmul.msk.bf16.gmra.mxu1 %vm1975_vm4, %v5520_v2  ;;  %v4163_v1 = vmul.f32 %v2556_v60, %v8650_v51  ;;  %v4286_v49 = vadd.f32 %v4285_v41, %v4162_v57  ;;  %v7317_v38 = vunpack.c.l.s4 %v5668_v13  ;;  %v4274_v23 = vadd.f32 %v4273_v37, %v4177_v63  ;;  %v8660_v63 = vld [vmem:[#allocation23_spill] sm:$0xff] }
 0x293   : > { %v7327_v7 = vand.u32 2147483647, %v1326_v52  ;;  %v7332_v3 = vand.u32 2147483647, %v1323_v28  ;;  %v1580_v25 = vsub.f32 1.0, %v7321_v30  ;;  %v1339_v22 = vsub.f32 %v8657_v46, %v7305_v15  ;;  %v8662_v28 = vld [vmem:[#allocation49_spill] sm:$0xff] }
 0x294   : > { %5245 = vmatmul.msk.bf16.gmra.mxu2 %vm1975_vm4, %v5520_v2  ;;  %8654 = vst [vmem:[#allocation42_spill] sm:$0xff] %v7317_v38  ;;  %v7323_v17 = vadd.f32 %v4298_v50, %v4163_v1  ;;  %v8505_v6 = vunpack.c.0.s8 %v7317_v38  ;;  %v1340_v31 = vsub.f32 %v8657_v46, %v7297_v29  ;;  %v7339_v14 = vand.u32 2147483647, %v1325_v42 }
 0x295   : > { %v2354_v48 = vpop.f32.mrf.mxu0  ;;  %v587_v40 = vperm.slane %v7154_v32, 3  ;;  %v590_v27 = vperm.slane %v7154_v32, 6  ;;  %v591_v34 = vperm.slane %v7154_v32, 7  ;;  %v594_v44 = vperm.slane %v7202_v16, 2 }
 0x296   : > { %5257 = vmatmul.msk.bf16.gmra.mxu3 %vm1975_vm4, %v5520_v2  ;;  %v4192_v39 = vmul.f32 %v2354_v48, %v8653_v47  ;;  %v7347_v43 = vperm.slane %v8659_v33, %v8505_v6  ;;  %v586_v2 = vperm.slane %v7154_v32, 2  ;;  %v595_v41 = vperm.slane %v7202_v16, 3  ;;  %v8661_v48 = vld [vmem:[#allocation60_spill] sm:$0xff] }
 0x297   : > { %v2490_v19 = vpop.f32.mrf.mxu2  ;;  %v2423_v62 = vpop.f32.mrf.mxu1  ;;  %v598_v58 = vperm.slane %v7202_v16, 6  ;;  %v599_v37 = vperm.slane %v7202_v16, 7  ;;  %v620_v50 = vperm.slane %v8660_v63, 2  ;;  %v621_v54 = vperm.slane %v8660_v63, 3 }
 0x298   : > { %v4178_v61 = vmul.f32 %v2490_v19, %v8655_v18  ;;  %v4262_v21 = vadd.f32 %v4261_v9, %v4192_v39  ;;  %v4193_v36 = vmul.f32 %v2423_v62, %v8656_v26  ;;  %v624_v32 = vperm.slane %v8660_v63, 6  ;;  %v5521_v62 = vld [vmem:[%s5837_s14 + $0x40] sm:$0xff] }
 0x299   : > { %v2559_v59 = vpop.f32.mrf.mxu3  ;;  %v625_v9 = vperm.slane %v8660_v63, 7  ;;  %v628_v52 = vperm.slane %v8661_v48, 2  ;;  %v629_v47 = vperm.slane %v8661_v48, 3  ;;  %v632_v19 = vperm.slane %v8661_v48, 6 }
 0x29a   : > { %v4287_v24 = vadd.f32 %v4286_v49, %v4178_v61  ;;  %v4263_v4 = vrot.slane %v4262_v21, 4  ;;  %v4275_v10 = vadd.f32 %v4274_v23, %v4193_v36  ;;  %v7342_v5 = vmul.f32 %v2559_v59, %v8658_v11 }
 0x29b   : > { %v633_v42 = vperm.slane %v8661_v48, 7  ;;  %v653_v18 = vsel %vm650_vm5, %v586_v2, %v620_v50  ;;  %v654_v61 = vsel %vm650_vm5, %v587_v40, %v621_v54  ;;  %v661_v11 = vsel %vm650_vm5, %v594_v44, %v628_v52 }
 0x29c   : > { %v4264_v57 = vadd.f32 %v4263_v4, %v4262_v21  ;;  %v4276_v60 = vrot.slane %v4275_v10, 4  ;;  %v657_v21 = vsel %vm650_vm5, %v590_v27, %v624_v32  ;;  %v684_v27 = vrot.slane %v653_v18, 4 }
 0x29d   : > { %v7357_v51 = vpop.f32.mrf.mxu0  ;;  %v666_v2 = vsel %vm650_vm5, %v599_v37, %v633_v42  ;;  %v685_v50 = vrot.slane %v654_v61, 2  ;;  %v687_v54 = vrot.slane %v657_v21, 4  ;;  %v4300_v61 = vadd.f32 %v7323_v17, %v7342_v5  ;;  %v8666_v5 = vld [vmem:[#allocation50_spill] sm:$0xff] }
 0x29e   : > { %v4265_v1 = vrot.slane %v4264_v57, 2  ;;  %v4277_v35 = vadd.f32 %v4276_v60, %v4275_v10  ;;  %v658_v10 = vsel %vm650_vm5, %v591_v34, %v625_v9  ;;  %v665_v60 = vsel %vm650_vm5, %v598_v58, %v632_v19 }
 0x29f   : > { %v2492_v49 = vpop.f32.mrf.mxu2  ;;  %v7365_v39 = vpop.f32.mrf.mxu1  ;;  %v8663_v58 = vmov 0.0   ;;  %v693_v32 = vrot.slane %v665_v60, 4  ;;  %v694_v9 = vrot.slane %v666_v2, 2  ;;  %v698_v19 = vsel %vm697_vm6, %v684_v27, %v685_v50  ;;  %v8667_v27 = vld [vmem:[#allocation53_spill] sm:$0xff] }
 0x2a0   : > { %v4266_v16 = vadd.f32 %v4265_v1, %v4264_v57  ;;  %v4278_v13 = vrot.slane %v4277_v35, 2  ;;  %v4194_v23 = vmul.f32 %v2492_v49, %v8662_v28  ;;  %5222 = vmatmul.msk.bf16.gmra.mxu0 %vm1975_vm4, %v5521_v62  ;;  %v662_v57 = vsel %vm650_vm5, %v595_v41, %v629_v47  ;;  %v8664_v47 = vld [vmem:[#allocation54_spill] sm:$0xff] }
 0x2a1   : > { %v2561_v26 = vpop.f32.mrf.mxu3  ;;  %v691_v41 = vrot.slane %v662_v57, 2  ;;  %v708_v17 = vsel %vm697_vm6, %v693_v32, %v694_v9  ;;  %vm4728_vm14 = vcmask 1046534  }
 0x2a2   : > { %v4267_v36 = vrot.slane %v4266_v16, 1  ;;  %v4279_v59 = vadd.f32 %v4278_v13, %v4277_v35  ;;  %v4288_v4 = vadd.f32 %v4287_v24, %v4194_v23  ;;  %5234 = vmatmul.msk.bf16.gmra.mxu1 %vm1975_vm4, %v5521_v62  ;;  %v688_v35 = vrot.slane %v658_v10, 2 }
 0x2a3   : > { %v690_v24 = vrot.slane %v661_v11, 4  ;;  %v700_v11 = vsel %vm699_vm9, %v7242_v12, %v698_v19  ;;  %v709_v12 = vsel %vm699_vm9, %v7291_v56, %v708_v17  ;;  %v1581_v56 = vsub.f32 1.0, %v7339_v14 }
 0x2a4   : > { %v4268_v1 = vadd.f32 %v4267_v36, %v4266_v16  ;;  %v4280_v40 = vrot.slane %v4279_v59, 1  ;;  %v4289_v63 = vrot.slane %v4288_v4, 4  ;;  %5246 = vmatmul.msk.bf16.gmra.mxu2 %vm1975_vm4, %v5521_v62  ;;  %v8665_v36 = vld [vmem:[#allocation55_spill] sm:$0xff]  ;;  %714 = vst [vmem:[%s5843_s13] sm:$0xff] %v700_v11 }
 0x2a5   : > { %v7382_v34 = vpop.f32.mrf.mxu0  ;;  %v705_v42 = vsel %vm697_vm6, %v690_v24, %v691_v41  ;;  %v5669_v24 = vmov 2004313702   ;;  %717 = vst [vmem:[%s5843_s13 + $0x18] sm:$0xff] %v709_v12  ;;  %v7425_v41 = vmax.f32 %v1580_v25, 0.0 }
 0x2a6   : > { %vm4520_vm3 = vcmp.eq.f32.partialorder %v4268_v1, 0.0  ;;  %v4281_v44 = vadd.f32 %v4280_v40, %v4279_v59  ;;  %v4290_v49 = vadd.f32 %v4289_v63, %v4288_v4  ;;  %5258 = vmatmul.msk.bf16.gmra.mxu3 %vm1975_vm4, %v5521_v62  ;;  %v702_v62 = vsel %vm697_vm6, %v687_v54, %v688_v35 }
 0x2a7   : > { %v5362_v37 = vsel %vm4520_vm3, 1.0, %v8663_v58  ;;  %v7386_v48 = vpop.f32.mrf.mxu2  ;;  %v7388_v52 = vpop.f32.mrf.mxu1  ;;  %v703_v57 = vsel %vm699_vm9, %v7281_v45, %v702_v62  ;;  %v706_v60 = vsel %vm699_vm9, %v7284_v20, %v705_v42  ;;  %v3133_v14 = vmul.f32 %v7365_v39, %v7425_v41 }
 0x2a8   : > { %v4568_v16 = vmul.f32 %v5362_v37, %v8664_v47  ;;  %v4430_v13 = vrot.slane %v4281_v44, 4  ;;  %vm4521_vm7 = vcmp.eq.f32.partialorder %v4281_v44, 0.0  ;;  %v4291_v28 = vrot.slane %v4290_v49, 2  ;;  %715 = vst [vmem:[%s5843_s13 + $0x8] sm:$0xff] %v703_v57 }
 0x2a9   : > { %v5363_v23 = vsel %vm4521_vm7, 1.0, %v8663_v58  ;;  %v7395_v18 = vpop.f32.mrf.mxu3  ;;  %716 = vst [vmem:[%s5843_s13 + $0x10] sm:$0xff] %v706_v60  ;;  %v7419_v44 = vunpack.c.l.s4 %v5669_v24  ;;  %v1582_v39 = vsub.f32 1.0, %v7327_v7  ;;  %v1468_v57 = vand.u32 2147483647, %v1340_v31 }
 0x2aa   : > { %v4438_v21 = vsel %vm699_vm9, %v4268_v1, %v4430_v13  ;;  %v4569_v59 = vmul.f32 %v5363_v23, %v8665_v36  ;;  %v4292_v4 = vadd.f32 %v4291_v28, %v4290_v49  ;;  %v4195_v1 = vmul.f32 %v2561_v26, %v8666_v5  ;;  %v5522_v13 = vld [vmem:[%s5837_s14 + $0x48] sm:$0xff]  ;;  %v8669_v23 = vld [vmem:[#allocation22_spill] sm:$0xff]  ;;  %v8671_v5 = vld [vmem:[#allocation28_spill] sm:$0xff] }
 0x2ab   : > { %v4446_v10 = vrot.slane %v4438_v21, 6  ;;  %v4584_v63 = vsub.f32 1.0, %v4568_v16  ;;  %8668 = vst [vmem:[#allocation41_spill] sm:$0xff] %v7419_v44  ;;  %v1579_v26 = vsub.f32 1.0, %v7332_v3  ;;  %v8504_v16 = vunpack.c.0.s8 %v7419_v44  ;;  %v8670_v21 = vld [vmem:[#allocation56_spill] sm:$0xff] }
 0x2ac   : > { %v4585_v2 = vsub.f32 1.0, %v4569_v59  ;;  %v4293_v40 = vrot.slane %v4292_v4, 1  ;;  %v4301_v20 = vadd.f32 %v4300_v61, %v4195_v1  ;;  %v7450_v61 = vmax.f32 %v1581_v56, 0.0 }
 0x2ad   : > { %v4462_v50 = vsub.f32 %v8667_v27, %v4446_v10  ;;  %v7414_v54 = vpop.f32.mrf.mxu0  ;;  %v7438_v25 = vmax.f32 %v1579_v26, 0.0  ;;  %v7448_v42 = vperm.slane %v8659_v33, %v8504_v16  ;;  %v1341_v7 = vsub.f32 %v8657_v46, %v7310_v0 }
 0x2ae   : > { %v4618_v45 = vrot.slane %v4585_v2, 4  ;;  %v7416_v35 = vadd.f32 %v4293_v40, %v4292_v4  ;;  %v4302_v47 = vrot.slane %v4301_v20, 4  ;;  %v1467_v4 = vand.u32 2147483647, %v1339_v22 }
 0x2af   : > { %v4470_v49 = vand.u32 2147483647, %v4462_v50  ;;  %v7428_v37 = vpop.f32.mrf.mxu2  ;;  %v7430_v32 = vpop.f32.mrf.mxu1  ;;  %v3132_v59 = vmul.f32 %v7357_v51, %v7438_v25  ;;  %v3134_v33 = vmul.f32 %v7386_v48, %v7450_v61  ;;  %v7466_v2 = vmax.f32 %v1582_v39, 0.0 }
 0x2b0   : > { %v4626_v9 = vsel %vm699_vm9, %v4584_v63, %v4618_v45  ;;  %vm4522_vm12 = vcmp.eq.f32.partialorder %v7416_v35, 0.0  ;;  %5223 = vmatmul.msk.bf16.gmra.mxu0 %vm1975_vm4, %v5522_v13  ;;  %v4303_v62 = vadd.f32 %v4302_v47, %v4301_v20  ;;  %v1595_v51 = vsub.f32 1.0, %v1467_v4 }
 0x2b1   : > { %v5352_v30 = vrot.slane %v4470_v49, 10  ;;  %v5364_v3 = vsel %vm4522_vm12, 1.0, %v8663_v58  ;;  %v2782_v28 = vpop.f32.mrf.mxu3  ;;  %v1596_v17 = vsub.f32 1.0, %v1468_v57  ;;  %v1342_v48 = vsub.f32 %v8657_v46, %v7302_v55 }
 0x2b2   : > { %v7443_v19 = vmul.f32 %v5364_v3, %v8669_v23  ;;  %5235 = vmatmul.msk.bf16.gmra.mxu1 %vm1975_vm4, %v5522_v13  ;;  %v4304_v11 = vrot.slane %v4303_v62, 2  ;;  %v1355_v1 = vsub.f32 %v8671_v5, %v7305_v15  ;;  %v3135_v63 = vmul.f32 %v7395_v18, %v7466_v2 }
 0x2b3   : > { %v4510_v36 = vadd.f32 %v5352_v30, %v8670_v21  ;;  %v7481_v27 = vmax.f32 %v1595_v51, 0.0  ;;  %v1469_v50 = vand.u32 2147483647, %v1341_v7  ;;  %v7485_v20 = vmax.f32 %v1596_v17, 0.0 }
 0x2b4   : > { %v4586_v10 = vsub.f32 1.0, %v7443_v19  ;;  %5247 = vmatmul.msk.bf16.gmra.mxu2 %vm1975_vm4, %v5522_v13  ;;  %v4305_v40 = vadd.f32 %v4304_v11, %v4303_v62  ;;  %v1470_v24 = vand.u32 2147483647, %v1342_v48  ;;  %v1483_v49 = vand.u32 2147483647, %v1355_v1  ;;  %v8673_v48 = vld [vmem:[#allocation39_spill] sm:$0xff] }
 0x2b5   : > { %v4642_v60 = vmul.f32 %v4626_v9, %v4510_v36  ;;  %v7471_v22 = vpop.f32.mrf.mxu0  ;;  %v1597_v47 = vsub.f32 1.0, %v1469_v50  ;;  %v3149_v30 = vmul.f32 %v7388_v52, %v7485_v20  ;;  %v1356_v39 = vsub.f32 %v8671_v5, %v7297_v29 }
 0x2b6   : > { %5259 = vmatmul.msk.bf16.gmra.mxu3 %vm1975_vm4, %v5522_v13  ;;  %v4306_v45 = vrot.slane %v4305_v40, 1  ;;  %v1598_v3 = vsub.f32 1.0, %v1470_v24  ;;  %v1611_v23 = vsub.f32 1.0, %v1483_v49  ;;  %v784_v1 = vsub.f32 %v8652_v53, %v8673_v48 }
 0x2b7   : > { %v4694_v31 = vmul.f32 %v7347_v43, %v4642_v60  ;;  %v7483_v12 = vpop.f32.mrf.mxu1  ;;  %v7487_v26 = vpop.f32.mrf.mxu2  ;;  %v3148_v43 = vmul.f32 %v7382_v34, %v7481_v27  ;;  %v7498_v36 = vmax.f32 %v1597_v47, 0.0  ;;  %v3369_v34 = vadd.f32 %v3149_v30, %v3133_v14  ;;  %v8675_v30 = vld [vmem:[#allocation48_spill] sm:$0xff] }
 0x2b8   : > { %v4307_v18 = vadd.f32 %v4306_v45, %v4305_v40  ;;  %v7502_v11 = vmax.f32 %v1598_v3, 0.0  ;;  %v7507_v60 = vmax.f32 %v1611_v23, 0.0  ;;  %v1484_v51 = vand.u32 2147483647, %v1356_v39  ;;  %v8672_v40 = vld [vmem:[#allocation58_spill] sm:$0xff] }
 0x2b9   : > { %v4711_v56 = vrot.slane %v4694_v31, 4  ;;  %v4712_v9 = vrot.slane %v4694_v31, 7  ;;  %v7491_v13 = vpop.f32.mrf.mxu3  ;;  %v3356_v21 = vadd.f32 %v3148_v43, %v3132_v59  ;;  %v3150_v52 = vmul.f32 %v7428_v37, %v7498_v36  ;;  %v5523_v43 = vld [vmem:[%s5837_s14 + $0x50] sm:$0xff] }
 0x2ba   : > { %v4431_v4 = vrot.slane %v4307_v18, 4  ;;  %vm4523_vm13 = vcmp.eq.f32.partialorder %v4307_v18, 0.0  ;;  %v3151_v14 = vmul.f32 %v2782_v28, %v7502_v11  ;;  %v3164_v37 = vmul.f32 %v7414_v54, %v7507_v60 }
 0x2bb   : > { %v7496_v62 = vsel %vm4726_vm11, %v4711_v56, %v4712_v9  ;;  %v5365_v57 = vsel %vm4523_vm13, 1.0, %v8663_v58  ;;  %v7517_v50 = vadd.f32 %v3150_v52, %v3134_v33  ;;  %v1612_v45 = vsub.f32 1.0, %v1484_v51  ;;  %v8674_v33 = vld [vmem:[#allocation57_spill] sm:$0xff] }
 0x2bc   : > { %v4439_v7 = vsel %vm699_vm9, %v7416_v35, %v4431_v4  ;;  %v4571_v17 = vmul.f32 %v5365_v57, %v8672_v40  ;;  %v7523_v56 = vadd.f32 %v3151_v14, %v3135_v63  ;;  %v800_v35 = vsub.f32 %v8657_v46, %v8673_v48 }
 0x2bd   : > { %v7509_v59 = vpop.f32.mrf.mxu0  ;;  %v4447_v31 = vrot.slane %v4439_v7, 6  ;;  %v912_v9 = vand.u32 2147483647, %v784_v1  ;;  %v7532_v18 = vadd.f32 %v3356_v21, %v3164_v37  ;;  %v7534_v54 = vmax.f32 %v1612_v45, 0.0 }
 0x2be   : > { %v4587_v49 = vsub.f32 1.0, %v4571_v17  ;;  %v783_v3 = vsub.f32 %v8652_v53, %v8675_v30  ;;  %v928_v39 = vand.u32 2147483647, %v800_v35  ;;  %v799_v57 = vsub.f32 %v8657_v46, %v8675_v30 }
 0x2bf   : > { %v7521_v24 = vpop.f32.mrf.mxu1  ;;  %v7527_v28 = vpop.f32.mrf.mxu2  ;;  %v4463_v47 = vsub.f32 %v8674_v33, %v4447_v31  ;;  %v1040_v4 = vsub.f32 1.0, %v912_v9  ;;  %v3165_v21 = vmul.f32 %v7430_v32, %v7534_v54  ;;  %v1357_v7 = vsub.f32 %v8671_v5, %v7310_v0  ;;  %v8677_v33 = vld [vmem:[#allocation59_spill] sm:$0xff] }
 0x2c0   : > { %5224 = vmatmul.msk.bf16.gmra.mxu0 %vm1975_vm4, %v5523_v43  ;;  %v4619_v23 = vrot.slane %v4587_v49, 4  ;;  %v911_v51 = vand.u32 2147483647, %v783_v3  ;;  %v1056_v17 = vsub.f32 1.0, %v928_v39  ;;  %v927_v48 = vand.u32 2147483647, %v799_v57 }
 0x2c1   : > { %v7538_v63 = vpop.f32.mrf.mxu3  ;;  %v4471_v52 = vand.u32 2147483647, %v4463_v47  ;;  %v1168_v14 = vmax.f32 %v1040_v4, 0.0  ;;  %v7550_v31 = vadd.f32 %v3369_v34, %v3165_v21  ;;  %v1485_v45 = vand.u32 2147483647, %v1357_v7 }
 0x2c2   : > { %5236 = vmatmul.msk.bf16.gmra.mxu1 %vm1975_vm4, %v5523_v43  ;;  %v4627_v40 = vsel %vm699_vm9, %v4586_v10, %v4619_v23  ;;  %v1039_v37 = vsub.f32 1.0, %v911_v51  ;;  %v1184_v49 = vmax.f32 %v1056_v17, 0.0  ;;  %v1055_v35 = vsub.f32 1.0, %v927_v48  ;;  %v8676_v10 = vld [vmem:[#allocation29_spill] sm:$0xff] }
 0x2c3   : > { %v5353_v1 = vrot.slane %v4471_v52, 10  ;;  %v1358_v19 = vsub.f32 %v8671_v5, %v7302_v55  ;;  %v1371_v9 = vsub.f32 %v8676_v10, %v7305_v15  ;;  %v1613_v30 = vsub.f32 1.0, %v1485_v45 }
 0x2c4   : > { %5248 = vmatmul.msk.bf16.gmra.mxu2 %vm1975_vm4, %v5523_v43  ;;  %v1167_v34 = vmax.f32 %v1039_v37, 0.0  ;;  %v1372_v3 = vsub.f32 %v8676_v10, %v7297_v29  ;;  %v1866_v39 = vpack.c.bf16 %v1184_v49, %v1168_v14  ;;  %v1183_v4 = vmax.f32 %v1055_v35, 0.0 }
 0x2c5   : > { %v7553_v32 = vpop.f32.mrf.mxu0  ;;  %v4511_v47 = vadd.f32 %v5353_v1, %v8677_v33  ;;  %v1486_v57 = vand.u32 2147483647, %v1358_v19  ;;  %v1499_v52 = vand.u32 2147483647, %v1371_v9  ;;  %v7567_v7 = vmax.f32 %v1613_v30, 0.0 }
 0x2c6   : > { %5260 = vmatmul.msk.bf16.gmra.mxu3 %vm1975_vm4, %v5523_v43  ;;  %v1500_v17 = vand.u32 2147483647, %v1372_v3  ;;  %v8678_v43 = vld [vmem:[#allocation51_spill] sm:$0xff]  ;;  %v1865_v37 = vpack.c.bf16 %v1183_v4, %v1167_v34  ;;  %v8679_v3 = vld [vmem:[#allocation52_spill] sm:$0xff] }
 0x2c7   : > { %v7563_v23 = vpop.f32.mrf.mxu1  ;;  %v7565_v21 = vpop.f32.mrf.mxu2  ;;  %v4643_v51 = vmul.f32 %v4627_v40, %v4511_v47  ;;  %v782_v48 = vsub.f32 %v8652_v53, %v8678_v43  ;;  %3054 = vmatpush.bf16.msrb.mxu3 %v1866_v39  ;;  %v1614_v45 = vsub.f32 1.0, %v1486_v57  ;;  %v1627_v33 = vsub.f32 1.0, %v1499_v52 }
 0x2c8   : > { %v798_v14 = vsub.f32 %v8657_v46, %v8678_v43  ;;  %v3166_v40 = vmul.f32 %v7487_v26, %v7567_v7  ;;  %v1628_v35 = vsub.f32 1.0, %v1500_v17  ;;  %2985 = vmatpush.bf16.msrb.mxu2 %v1865_v37  ;;  %v781_v34 = vsub.f32 %v8652_v53, %v8679_v3 }
 0x2c9   : > { %v7571_v1 = vpop.f32.mrf.mxu3  ;;  %v4695_v49 = vmul.f32 %v7448_v42, %v4643_v51  ;;  %v910_v19 = vand.u32 2147483647, %v782_v48  ;;  %v7578_v9 = vmax.f32 %v1614_v45, 0.0  ;;  %v7580_v47 = vmax.f32 %v1627_v33, 0.0  ;;  %v4598_v48 = vld [vmem:[#allocation2] sm:$0xff] }
 0x2ca   : > { %v926_v30 = vand.u32 2147483647, %v798_v14  ;;  %v7585_v57 = vadd.f32 %v7517_v50, %v3166_v40  ;;  %v7587_v42 = vmax.f32 %v1628_v35, 0.0  ;;  %v797_v45 = vsub.f32 %v8657_v46, %v8679_v3 }
 0x2cb   : > { %v4713_v39 = vrot.slane %v4695_v49, 2  ;;  %v4714_v4 = vrot.slane %v4695_v49, 5  ;;  %v3167_v26 = vmul.f32 %v7491_v13, %v7578_v9  ;;  %v3180_v51 = vmul.f32 %v7471_v22, %v7580_v47 }
 0x2cc   : > { %v1038_v17 = vsub.f32 1.0, %v910_v19  ;;  %v1054_v43 = vsub.f32 1.0, %v926_v30  ;;  %v3181_v50 = vmul.f32 %v7483_v12, %v7587_v42  ;;  %v909_v33 = vand.u32 2147483647, %v781_v34  ;;  %v5524_v19 = vld [vmem:[%s5837_s14 + $0x58] sm:$0xff]  ;;  %v8680_v12 = vld [vmem:[#allocation36_spill] sm:$0xff] }
 0x2cd   : > { %v7589_v52 = vpop.f32.mrf.mxu0  ;;  %v4729_v37 = vsel %vm4728_vm14, %v4713_v39, %v4714_v4  ;;  %v3396_v49 = vadd.f32 %v7523_v56, %v3167_v26  ;;  %v7606_v22 = vadd.f32 %v7532_v18, %v3180_v51  ;;  %v925_v39 = vand.u32 2147483647, %v797_v45 }
 0x2ce   : > { %v4730_v13 = vsel %vm697_vm6, %v7496_v62, %v4729_v37  ;;  %v1166_v40 = vmax.f32 %v1038_v17, 0.0  ;;  %v3371_v3 = vadd.f32 %v7550_v31, %v3181_v50  ;;  %v1182_v34 = vmax.f32 %v1054_v43, 0.0  ;;  %v8681_v37 = vld [vmem:[#allocation26_spill] sm:$0xff] }
 0x2cf   : > { %v7600_v14 = vpop.f32.mrf.mxu1  ;;  %v7608_v35 = vpop.f32.mrf.mxu2  ;;  %v4731_v30 = vsel %vm699_vm9, %v8680_v12, %v4730_v13  ;;  %v1037_v56 = vsub.f32 1.0, %v909_v33  ;;  %v1373_v18 = vsub.f32 %v8676_v10, %v7310_v0  ;;  %v1374_v26 = vsub.f32 %v8676_v10, %v7302_v55 }
 0x2d0   : > { %5225 = vmatmul.msk.bf16.gmra.mxu0 %vm1975_vm4, %v5524_v19  ;;  %v4741_v62 = vadd.f32 %v4731_v30, %v4598_v48  ;;  %v1864_v51 = vpack.c.bf16 %v1182_v34, %v1166_v40  ;;  %v1053_v17 = vsub.f32 1.0, %v925_v39  ;;  %v1387_v13 = vsub.f32 %v8681_v37, %v7305_v15 }
 0x2d1   : > { %v7615_v4 = vpop.f32.mrf.mxu3  ;;  %v1388_v31 = vsub.f32 %v8681_v37, %v7297_v29  ;;  %v1165_v43 = vmax.f32 %v1037_v56, 0.0  ;;  %v1501_v48 = vand.u32 2147483647, %v1373_v18  ;;  %v1502_v50 = vand.u32 2147483647, %v1374_v26  ;;  %v8682_v56 = vld [vmem:[#allocation27_spill] sm:$0xff] }
 0x2d2   : > { %5237 = vmatmul.msk.bf16.gmra.mxu1 %vm1975_vm4, %v5524_v19  ;;  %4743 = vst [vmem:[#allocation2] sm:$0xff] %v4741_v62  ;;  %v1389_v45 = vsub.f32 %v8681_v37, %v7310_v0  ;;  %v1181_v33 = vmax.f32 %v1053_v17, 0.0  ;;  %v1515_v12 = vand.u32 2147483647, %v1387_v13  ;;  %v1390_v40 = vsub.f32 %v8681_v37, %v7302_v55 }
 0x2d3   : > { %2916 = vmatpush.bf16.msrb.mxu1 %v1864_v51  ;;  %v1516_v30 = vand.u32 2147483647, %v1388_v31  ;;  %v1629_v39 = vsub.f32 1.0, %v1501_v48  ;;  %v1630_v16 = vsub.f32 1.0, %v1502_v50  ;;  %v1403_v18 = vsub.f32 %v8682_v56, %v7305_v15 }
 0x2d4   : > { %5249 = vmatmul.msk.bf16.gmra.mxu2 %vm1975_vm4, %v5524_v19  ;;  %v1517_v62 = vand.u32 2147483647, %v1389_v45  ;;  %v1863_v26 = vpack.c.bf16 %v1181_v33, %v1165_v43  ;;  %v1643_v51 = vsub.f32 1.0, %v1515_v12  ;;  %v1518_v13 = vand.u32 2147483647, %v1390_v40 }
 0x2d5   : > { %v7631_v34 = vpop.f32.mrf.mxu0  ;;  %v1644_v17 = vsub.f32 1.0, %v1516_v30  ;;  %v7638_v6 = vmax.f32 %v1629_v39, 0.0  ;;  %v7640_v44 = vmax.f32 %v1630_v16, 0.0  ;;  %v1531_v37 = vand.u32 2147483647, %v1403_v18 }
 0x2d6   : > { %5261 = vmatmul.msk.bf16.gmra.mxu3 %vm1975_vm4, %v5524_v19  ;;  %v1645_v38 = vsub.f32 1.0, %v1517_v62  ;;  %2847 = vmatpush.bf16.msrb.mxu0 %v1863_v26  ;;  %v7644_v50 = vmax.f32 %v1643_v51, 0.0  ;;  %v1646_v19 = vsub.f32 1.0, %v1518_v13  ;;  %v1404_v43 = vsub.f32 %v8682_v56, %v7297_v29 }
 0x2d7   : > { %v7636_v31 = vpop.f32.mrf.mxu1  ;;  %v7642_v48 = vpop.f32.mrf.mxu2  ;;  %v7646_v45 = vmax.f32 %v1644_v17, 0.0  ;;  %v3182_v12 = vmul.f32 %v7527_v28, %v7638_v6  ;;  %v3183_v16 = vmul.f32 %v7538_v63, %v7640_v44  ;;  %v1659_v40 = vsub.f32 1.0, %v1531_v37 }
 0x2d8   : > { %v7656_v30 = vmax.f32 %v1645_v38, 0.0  ;;  %v3196_v39 = vmul.f32 %v7509_v59, %v7644_v50  ;;  %v7662_v18 = vmax.f32 %v1646_v19, 0.0  ;;  %v1532_v26 = vand.u32 2147483647, %v1404_v43 }
 0x2d9   : > { %v7650_v33 = vpop.f32.mrf.mxu3  ;;  %v3197_v62 = vmul.f32 %v7521_v24, %v7646_v45  ;;  %v3384_v51 = vadd.f32 %v7585_v57, %v3182_v12  ;;  %v3397_v17 = vadd.f32 %v3396_v49, %v3183_v16  ;;  %v7667_v13 = vmax.f32 %v1659_v40, 0.0 }
 0x2da   : > { %v3198_v28 = vmul.f32 %v7565_v21, %v7656_v30  ;;  %v3359_v38 = vadd.f32 %v7606_v22, %v3196_v39  ;;  %v3199_v59 = vmul.f32 %v7571_v1, %v7662_v18  ;;  %v1660_v37 = vsub.f32 1.0, %v1532_v26 }
 0x2db   : > { %v3372_v63 = vadd.f32 %v3371_v3, %v3197_v62  ;;  %v3212_v57 = vmul.f32 %v7553_v32, %v7667_v13  ;;  %v1405_v49 = vsub.f32 %v8682_v56, %v7310_v0  ;;  %v1406_v21 = vsub.f32 %v8682_v56, %v7302_v55  ;;  %v8683_v3 = vld [vmem:[#allocation24_spill] sm:$0xff] }
 0x2dc   : > { %v3385_v19 = vadd.f32 %v3384_v51, %v3198_v28  ;;  %v3398_v43 = vadd.f32 %v3397_v17, %v3199_v59  ;;  %v7680_v22 = vmax.f32 %v1660_v37, 0.0  ;;  %v1419_v1 = vsub.f32 %v8683_v3, %v7305_v15  ;;  %v5525_v51 = vld [vmem:[%s5837_s14] sm:$0xff] }
 0x2dd   : > { %v7672_v24 = vpop.f32.mrf.mxu0  ;;  %v1420_v12 = vsub.f32 %v8683_v3, %v7297_v29  ;;  %v3360_v40 = vadd.f32 %v3359_v38, %v3212_v57  ;;  %v1533_v39 = vand.u32 2147483647, %v1405_v49  ;;  %v1534_v32 = vand.u32 2147483647, %v1406_v21  ;;  %v8684_v21 = vld [vmem:[#allocation25_spill] sm:$0xff] }
 0x2de   : > { %v1421_v62 = vsub.f32 %v8683_v3, %v7310_v0  ;;  %v3213_v17 = vmul.f32 %v7563_v23, %v7680_v22  ;;  %v1547_v28 = vand.u32 2147483647, %v1419_v1  ;;  %v1422_v37 = vsub.f32 %v8683_v3, %v7302_v55 }
 0x2df   : > { %v7686_v16 = vpop.f32.mrf.mxu1  ;;  %v7690_v26 = vpop.f32.mrf.mxu2  ;;  %v1548_v59 = vand.u32 2147483647, %v1420_v12  ;;  %v1661_v38 = vsub.f32 1.0, %v1533_v39  ;;  %v1662_v57 = vsub.f32 1.0, %v1534_v32  ;;  %v1435_v10 = vsub.f32 %v8684_v21, %v7305_v15 }
 0x2e0   : > { %5262 = vmatmul.msk.bf16.vlgmr.msrb.gmra.mxu0 %vm1975_vm4, %v5525_v51  ;;  %v1549_v49 = vand.u32 2147483647, %v1421_v62  ;;  %v3373_v5 = vadd.f32 %v3372_v63, %v3213_v17  ;;  %v1675_v46 = vsub.f32 1.0, %v1547_v28  ;;  %v1550_v8 = vand.u32 2147483647, %v1422_v37 }
 0x2e1   : > { %v7698_v56 = vpop.f32.mrf.mxu3  ;;  %v1676_v53 = vsub.f32 1.0, %v1548_v59  ;;  %v7703_v23 = vmax.f32 %v1661_v38, 0.0  ;;  %v7705_v1 = vmax.f32 %v1662_v57, 0.0  ;;  %v1563_v3 = vand.u32 2147483647, %v1435_v10 }
 0x2e2   : > { %5274 = vmatmul.msk.bf16.vlgmr.msrb.gmra.mxu1 %vm1975_vm4, %v5525_v51  ;;  %v1677_v12 = vsub.f32 1.0, %v1549_v49  ;;  %v7707_v58 = vmax.f32 %v1675_v46, 0.0  ;;  %v1678_v32 = vsub.f32 1.0, %v1550_v8  ;;  %v1436_v15 = vsub.f32 %v8684_v21, %v7297_v29 }
 0x2e3   : > { %v7709_v39 = vmax.f32 %v1676_v53, 0.0  ;;  %v3214_v62 = vmul.f32 %v7608_v35, %v7703_v23  ;;  %v3215_v17 = vmul.f32 %v7615_v4, %v7705_v1  ;;  %v1691_v10 = vsub.f32 1.0, %v1563_v3 }
 0x2e4   : > { %5286 = vmatmul.msk.bf16.vlgmr.msrb.gmra.mxu2 %vm1975_vm4, %v5525_v51  ;;  %v7718_v28 = vmax.f32 %v1677_v12, 0.0  ;;  %v3228_v8 = vmul.f32 %v7589_v52, %v7707_v58  ;;  %v7725_v53 = vmax.f32 %v1678_v32, 0.0  ;;  %v1564_v46 = vand.u32 2147483647, %v1436_v15 }
 0x2e5   : > { %v2595_v63 = vpop.f32.mrf.mxu0  ;;  %v3229_v29 = vmul.f32 %v7600_v14, %v7709_v39  ;;  %v3386_v37 = vadd.f32 %v3385_v19, %v3214_v62  ;;  %v3399_v35 = vadd.f32 %v3398_v43, %v3215_v17  ;;  %v7729_v38 = vmax.f32 %v1691_v10, 0.0 }
 0x2e6   : > { %5298 = vmatmul.msk.bf16.vlgmr.msrb.gmra.mxu3 %vm1975_vm4, %v5525_v51  ;;  %v3230_v4 = vmul.f32 %v7642_v48, %v7718_v28  ;;  %v3361_v57 = vadd.f32 %v3360_v40, %v3228_v8  ;;  %v3231_v52 = vmul.f32 %v7650_v33, %v7725_v53  ;;  %v1692_v49 = vsub.f32 1.0, %v1564_v46 }
 0x2e7   : > { %v2664_v59 = vpop.f32.mrf.mxu1  ;;  %v2731_v3 = vpop.f32.mrf.mxu2  ;;  %v3374_v51 = vadd.f32 %v3373_v5, %v3229_v29  ;;  %v3244_v32 = vmul.f32 %v7631_v34, %v7729_v38  ;;  %v1437_v19 = vsub.f32 %v8684_v21, %v7310_v0  ;;  %v1438_v48 = vsub.f32 %v8684_v21, %v7302_v55 }
 0x2e8   : > { %v3387_v14 = vadd.f32 %v3386_v37, %v3230_v4  ;;  %v3400_v43 = vadd.f32 %v3399_v35, %v3231_v52  ;;  %v7739_v15 = vmax.f32 %v1692_v49, 0.0  ;;  %v3580_v5 = vmul.f32 %v7672_v24, %v7438_v25 }
 0x2e9   : > { %v2800_v12 = vpop.f32.mrf.mxu3  ;;  %v3362_v40 = vadd.f32 %v3361_v57, %v3244_v32  ;;  %v1565_v33 = vand.u32 2147483647, %v1437_v19  ;;  %v1566_v62 = vand.u32 2147483647, %v1438_v48  ;;  %v3581_v34 = vmul.f32 %v7686_v16, %v7425_v41  ;;  %v5526_v32 = vld [vmem:[%s5837_s14 + $0x8] sm:$0xff] }
 0x2ea   : > { %v3245_v17 = vmul.f32 %v7636_v31, %v7739_v15  ;;  %v3596_v0 = vmul.f32 %v2595_v63, %v7481_v27  ;;  %v3597_v10 = vmul.f32 %v2664_v59, %v7485_v20  ;;  %v3582_v35 = vmul.f32 %v2731_v3, %v7450_v61 }
 0x2eb   : > { %v3363_v8 = vrot.slane %v3362_v40, 4  ;;  %v1693_v29 = vsub.f32 1.0, %v1565_v33  ;;  %v1694_v46 = vsub.f32 1.0, %v1566_v62  ;;  %v3583_v48 = vmul.f32 %v2800_v12, %v7466_v2 }
 0x2ec   : > { %v3375_v37 = vadd.f32 %v3374_v51, %v3245_v17  ;;  %v3804_v4 = vadd.f32 %v3596_v0, %v3580_v5  ;;  %v3817_v57 = vadd.f32 %v3597_v10, %v3581_v34 }
 0x2ed   : > { %v2598_v55 = vpop.f32.mrf.mxu0  ;;  %v3364_v52 = vadd.f32 %v3363_v8, %v3362_v40  ;;  %v7751_v49 = vmax.f32 %v1693_v29, 0.0  ;;  %v7753_v16 = vmax.f32 %v1694_v46, 0.0 }
 0x2ee   : > { %v3612_v24 = vmul.f32 %v2598_v55, %v7507_v60  ;;  %v3376_v19 = vrot.slane %v3375_v37, 4 }
 0x2ef   : > { %v2667_v31 = vpop.f32.mrf.mxu1  ;;  %v2733_v63 = vpop.f32.mrf.mxu2  ;;  %v3365_v33 = vrot.slane %v3364_v52, 2  ;;  %v3246_v40 = vmul.f32 %v7690_v26, %v7751_v49  ;;  %v3247_v62 = vmul.f32 %v7698_v56, %v7753_v16 }
 0x2f0   : > { %v3613_v59 = vmul.f32 %v2667_v31, %v7534_v54  ;;  %5263 = vmatmul.msk.bf16.gmra.mxu0 %vm1975_vm4, %v5526_v32  ;;  %v3598_v51 = vmul.f32 %v2733_v63, %v7498_v36  ;;  %v3805_v5 = vadd.f32 %v3804_v4, %v3612_v24  ;;  %v3377_v34 = vadd.f32 %v3376_v19, %v3375_v37 }
 0x2f1   : > { %v2802_v3 = vpop.f32.mrf.mxu3  ;;  %v3388_v55 = vadd.f32 %v3387_v14, %v3246_v40  ;;  %v3401_v12 = vadd.f32 %v3400_v43, %v3247_v62  ;;  %v3366_v29 = vadd.f32 %v3365_v33, %v3364_v52 }
 0x2f2   : > { %v3599_v17 = vmul.f32 %v2802_v3, %v7502_v11  ;;  %5275 = vmatmul.msk.bf16.gmra.mxu1 %vm1975_vm4, %v5526_v32  ;;  %v3830_v0 = vadd.f32 %v3598_v51, %v3582_v35  ;;  %v3818_v10 = vadd.f32 %v3817_v57, %v3613_v59  ;;  %v3378_v46 = vrot.slane %v3377_v34, 2 }
 0x2f3   : > { %v3389_v4 = vrot.slane %v3388_v55, 4  ;;  %v3402_v26 = vrot.slane %v3401_v12, 4  ;;  %v3367_v14 = vrot.slane %v3366_v29, 1 }
 0x2f4   : > { %v3843_v8 = vadd.f32 %v3599_v17, %v3583_v48  ;;  %5287 = vmatmul.msk.bf16.gmra.mxu2 %vm1975_vm4, %v5526_v32  ;;  %v3379_v31 = vadd.f32 %v3378_v46, %v3377_v34 }
 0x2f5   : > { %v2600_v24 = vpop.f32.mrf.mxu0  ;;  %v3390_v3 = vadd.f32 %v3389_v4, %v3388_v55  ;;  %v3403_v37 = vadd.f32 %v3402_v26, %v3401_v12 }
 0x2f6   : > { %5299 = vmatmul.msk.bf16.gmra.mxu3 %vm1975_vm4, %v5526_v32  ;;  %v3628_v56 = vmul.f32 %v2600_v24, %v7580_v47  ;;  %v3380_v43 = vrot.slane %v3379_v31, 1 }
 0x2f7   : > { %v2669_v63 = vpop.f32.mrf.mxu1  ;;  %v2736_v35 = vpop.f32.mrf.mxu2  ;;  %v3391_v48 = vrot.slane %v3390_v3, 2  ;;  %v3404_v51 = vrot.slane %v3403_v37, 2 }
 0x2f8   : > { %v3806_v57 = vadd.f32 %v3805_v5, %v3628_v56  ;;  %v3614_v52 = vmul.f32 %v2736_v35, %v7567_v7  ;;  %v3629_v19 = vmul.f32 %v2669_v63, %v7587_v42  ;;  %v7772_v32 = vadd.f32 %v3380_v43, %v3379_v31 }
 0x2f9   : > { %v2805_v59 = vpop.f32.mrf.mxu3  ;;  %v3392_v17 = vadd.f32 %v3391_v48, %v3390_v3  ;;  %v3405_v34 = vadd.f32 %v3404_v51, %v3403_v37  ;;  %v7774_v5 = vadd.f32 %v3367_v14, %v3366_v29  ;;  %v5527_v3 = vld [vmem:[%s5837_s14 + $0x10] sm:$0xff] }
 0x2fa   : > { %v3615_v33 = vmul.f32 %v2805_v59, %v7578_v9  ;;  %v3831_v40 = vadd.f32 %v3830_v0, %v3614_v52  ;;  %v3819_v62 = vadd.f32 %v3818_v10, %v3629_v19  ;;  %v3480_v12 = vrot.slane %v7772_v32, 4 }
 0x2fb   : > { %v3393_v24 = vrot.slane %v3392_v17, 1  ;;  %v3406_v4 = vrot.slane %v3405_v34, 1  ;;  %vm3532_vm15 = vcmp.eq.f32.partialorder %v7774_v5, 0.0  ;;  %vm3533_vm0 = vcmp.eq.f32.partialorder %v7772_v32, 0.0 }
 0x2fc   : > { %v3844_v55 = vadd.f32 %v3843_v8, %v3615_v33  ;;  %v7780_v56 = vsel %vm699_vm9, %v7774_v5, %v3480_v12 }
 0x2fd   : > { %v2603_v46 = vpop.f32.mrf.mxu0  ;;  %v7782_v0 = vadd.f32 %v3406_v4, %v3405_v34  ;;  %v7788_v35 = vadd.f32 %v3393_v24, %v3392_v17 }
 0x2fe   : > { %v3644_v26 = vmul.f32 %v2603_v46, %v7644_v50 }
 0x2ff   : > { %v2672_v31 = vpop.f32.mrf.mxu1  ;;  %v2738_v10 = vpop.f32.mrf.mxu2  ;;  %v3481_v14 = vrot.slane %v7782_v0, 4  ;;  %vm3534_vm3 = vcmp.eq.f32.partialorder %v7788_v35, 0.0  ;;  %vm3535_vm7 = vcmp.eq.f32.partialorder %v7782_v0, 0.0 }
 0x300   : > { %v3807_v63 = vadd.f32 %v3806_v57, %v3644_v26  ;;  %5264 = vmatmul.msk.bf16.gmra.mxu0 %vm1975_vm4, %v5527_v3  ;;  %v3630_v8 = vmul.f32 %v2738_v10, %v7638_v6  ;;  %v3645_v37 = vmul.f32 %v2672_v31, %v7646_v45 }
 0x301   : > { %v2807_v29 = vpop.f32.mrf.mxu3  ;;  %v7795_v57 = vsel %vm699_vm9, %v7788_v35, %v3481_v14 }
 0x302   : > { %5276 = vmatmul.msk.bf16.gmra.mxu1 %vm1975_vm4, %v5527_v3  ;;  %v3832_v43 = vadd.f32 %v3831_v40, %v3630_v8  ;;  %v3631_v52 = vmul.f32 %v2807_v29, %v7640_v44  ;;  %v3820_v59 = vadd.f32 %v3819_v62, %v3645_v37  ;;  %v5528_v37 = vld [vmem:[%s5837_s14 + $0x18] sm:$0xff] }
 0x304   : > { %v3845_v19 = vadd.f32 %v3844_v55, %v3631_v52  ;;  %5288 = vmatmul.msk.bf16.gmra.mxu2 %vm1975_vm4, %v5527_v3 }
 0x305   : > { %v2605_v48 = vpop.f32.mrf.mxu0 }
 0x306   : > { %5300 = vmatmul.msk.bf16.gmra.mxu3 %vm1975_vm4, %v5527_v3  ;;  %v3660_v51 = vmul.f32 %v2605_v48, %v7667_v13 }
 0x307   : > { %v2674_v33 = vpop.f32.mrf.mxu1  ;;  %v2741_v17 = vpop.f32.mrf.mxu2 }
 0x308   : > { %v3808_v34 = vadd.f32 %v3807_v63, %v3660_v51  ;;  %v3661_v40 = vmul.f32 %v2674_v33, %v7680_v22  ;;  %v3646_v12 = vmul.f32 %v2741_v17, %v7656_v30 }
 0x309   : > { %v2810_v46 = vpop.f32.mrf.mxu3 }
 0x30a   : > { %v3647_v24 = vmul.f32 %v2810_v46, %v7662_v18  ;;  %v3821_v62 = vadd.f32 %v3820_v59, %v3661_v40  ;;  %v3833_v55 = vadd.f32 %v3832_v43, %v3646_v12 }
 0x30c   : > { %v3846_v4 = vadd.f32 %v3845_v19, %v3647_v24 }
 0x30d   : > { %v2608_v26 = vpop.f32.mrf.mxu0 }
 0x30e   : > { %v3676_v31 = vmul.f32 %v2608_v26, %v7707_v58 }
 0x30f   : > { %v2677_v10 = vpop.f32.mrf.mxu1  ;;  %v2743_v3 = vpop.f32.mrf.mxu2 }
 0x310   : > { %v3809_v8 = vadd.f32 %v3808_v34, %v3676_v31  ;;  %v3677_v29 = vmul.f32 %v2677_v10, %v7709_v39  ;;  %5265 = vmatmul.msk.bf16.gmra.mxu0 %vm1975_vm4, %v5528_v37  ;;  %v3662_v63 = vmul.f32 %v2743_v3, %v7703_v23 }
 0x311   : > { %v2812_v14 = vpop.f32.mrf.mxu3 }
 0x312   : > { %v3663_v52 = vmul.f32 %v2812_v14, %v7705_v1  ;;  %v3822_v48 = vadd.f32 %v3821_v62, %v3677_v29  ;;  %5277 = vmatmul.msk.bf16.gmra.mxu1 %vm1975_vm4, %v5528_v37  ;;  %v3834_v43 = vadd.f32 %v3833_v55, %v3662_v63 }
 0x314   : > { %v3847_v59 = vadd.f32 %v3846_v4, %v3663_v52  ;;  %5289 = vmatmul.msk.bf16.gmra.mxu2 %vm1975_vm4, %v5528_v37 }
 0x315   : > { %v2610_v19 = vpop.f32.mrf.mxu0 }
 0x316   : > { %5301 = vmatmul.msk.bf16.gmra.mxu3 %vm1975_vm4, %v5528_v37  ;;  %v3692_v51 = vmul.f32 %v2610_v19, %v7729_v38  ;;  %v5529_v19 = vld [vmem:[%s5837_s14 + $0x20] sm:$0xff] }
 0x317   : > { %v2679_v33 = vpop.f32.mrf.mxu1  ;;  %v2746_v17 = vpop.f32.mrf.mxu2 }
 0x318   : > { %v3810_v34 = vadd.f32 %v3809_v8, %v3692_v51  ;;  %v3693_v40 = vmul.f32 %v2679_v33, %v7739_v15  ;;  %v3678_v12 = vmul.f32 %v2746_v17, %v7718_v28 }
 0x319   : > { %v2815_v46 = vpop.f32.mrf.mxu3 }
 0x31a   : > { %v3679_v24 = vmul.f32 %v2815_v46, %v7725_v53  ;;  %v3811_v62 = vrot.slane %v3810_v34, 4  ;;  %v3823_v55 = vadd.f32 %v3822_v48, %v3693_v40  ;;  %v3835_v4 = vadd.f32 %v3834_v43, %v3678_v12 }
 0x31c   : > { %v3848_v26 = vadd.f32 %v3847_v59, %v3679_v24  ;;  %v3812_v31 = vadd.f32 %v3811_v62, %v3810_v34  ;;  %v3824_v10 = vrot.slane %v3823_v55, 4 }
 0x31d   : > { %v2613_v3 = vpop.f32.mrf.mxu0 }
 0x31e   : > { %v3813_v29 = vrot.slane %v3812_v31, 2  ;;  %v3825_v37 = vadd.f32 %v3824_v10, %v3823_v55  ;;  %v4084_v24 = vmul.f32 %v2613_v3, %v7438_v25  ;;  %v8685_v10 = vmov 0.0  }
 0x31f   : > { %v2682_v63 = vpop.f32.mrf.mxu1  ;;  %v2748_v52 = vpop.f32.mrf.mxu2  ;;  %v5318_v5 = vsel %vm3532_vm15, 1.0, %v8685_v10 }
 0x320   : > { %v3814_v14 = vadd.f32 %v3813_v29, %v3812_v31  ;;  %v3826_v8 = vrot.slane %v3825_v37, 2  ;;  %5266 = vmatmul.msk.bf16.gmra.mxu0 %vm1975_vm4, %v5529_v19  ;;  %v3694_v51 = vmul.f32 %v2748_v52, %v7751_v49  ;;  %v7829_v29 = vld [vmem:[%s5824_s20 + $0x20] sm:$0x77] }
 0x321   : > { %v2817_v33 = vpop.f32.mrf.mxu3 }
 0x322   : > { %v3815_v17 = vrot.slane %v3814_v14, 1  ;;  %v3827_v46 = vadd.f32 %v3826_v8, %v3825_v37  ;;  %v3695_v48 = vmul.f32 %v2817_v33, %v7753_v16  ;;  %5278 = vmatmul.msk.bf16.gmra.mxu1 %vm1975_vm4, %v5529_v19  ;;  %v3836_v43 = vadd.f32 %v3835_v4, %v3694_v51 }
 0x324   : > { %v3816_v59 = vadd.f32 %v3815_v17, %v3814_v14  ;;  %v3828_v34 = vrot.slane %v3827_v46, 1  ;;  %v3849_v40 = vadd.f32 %v3848_v26, %v3695_v48  ;;  %v3837_v12 = vrot.slane %v3836_v43, 4  ;;  %5290 = vmatmul.msk.bf16.gmra.mxu2 %vm1975_vm4, %v5529_v19 }
 0x325   : > { %v2615_v62 = vpop.f32.mrf.mxu0 }
 0x326   : > { %vm4020_vm1 = vcmp.eq.f32.partialorder %v3816_v59, 0.0  ;;  %v3829_v55 = vadd.f32 %v3828_v34, %v3827_v46  ;;  %v3850_v31 = vrot.slane %v3849_v40, 4  ;;  %5302 = vmatmul.msk.bf16.gmra.mxu3 %vm1975_vm4, %v5529_v19  ;;  %v4100_v4 = vmul.f32 %v2615_v62, %v7481_v27 }
 0x327   : > { %v5342_v26 = vsel %vm4020_vm1, 1.0, %v8685_v10  ;;  %v3838_v37 = vadd.f32 %v3837_v12, %v3836_v43  ;;  %v2684_v14 = vpop.f32.mrf.mxu1  ;;  %v2751_v52 = vpop.f32.mrf.mxu2  ;;  %v5319_v19 = vsel %vm3533_vm0, 1.0, %v8685_v10  ;;  %v3504_v46 = vsub.f32 %v7829_v29, %v7780_v56 }
 0x328   : > { %v7832_v8 = vmul.f32 %v5342_v26, %v5318_v5  ;;  %v3928_v25 = vrot.slane %v3829_v55, 4  ;;  %vm4021_vm2 = vcmp.eq.f32.partialorder %v3829_v55, 0.0  ;;  %v3851_v3 = vadd.f32 %v3850_v31, %v3849_v40 }
 0x329   : > { %v5343_v27 = vsel %vm4021_vm2, 1.0, %v8685_v10  ;;  %v3839_v51 = vrot.slane %v3838_v37, 2  ;;  %v2820_v33 = vpop.f32.mrf.mxu3  ;;  %v4308_v17 = vadd.f32 %v4100_v4, %v4084_v24  ;;  %v4085_v62 = vmul.f32 %v2682_v63, %v7425_v41 }
 0x32a   : > { %v3936_v48 = vsel %vm699_vm9, %v3816_v59, %v3928_v25  ;;  %v7841_v43 = vmul.f32 %v5343_v27, %v5319_v19  ;;  %v3852_v34 = vrot.slane %v3851_v3, 2  ;;  %v4101_v32 = vmul.f32 %v2684_v14, %v7485_v20  ;;  %v5530_v27 = vld [vmem:[%s5837_s14 + $0x28] sm:$0xff] }
 0x32b   : > { %v3944_v12 = vrot.slane %v3936_v48, 7  ;;  %v3840_v40 = vadd.f32 %v3839_v51, %v3838_v37  ;;  %v3512_v4 = vand.u32 2147483647, %v3504_v46  ;;  %v5320_v37 = vsel %vm3534_vm3, 1.0, %v8685_v10 }
 0x32c   : > { %v3853_v55 = vadd.f32 %v3852_v34, %v3851_v3  ;;  %v4321_v56 = vadd.f32 %v4101_v32, %v4085_v62  ;;  %v5321_v41 = vsel %vm3535_vm7, 1.0, %v8685_v10  ;;  %v4086_v0 = vmul.f32 %v2751_v52, %v7450_v61  ;;  %v7866_v62 = vld [vmem:[%s5824_s20 + $0x28] sm:$0x77] }
 0x32d   : > { %v3960_v24 = vsub.f32 %v7829_v29, %v3944_v12  ;;  %v3841_v31 = vrot.slane %v3840_v40, 1  ;;  %v2618_v59 = vpop.f32.mrf.mxu0 }
 0x32e   : > { %v3854_v5 = vrot.slane %v3853_v55, 1  ;;  %v4116_v26 = vmul.f32 %v2618_v59, %v7507_v60  ;;  %v4087_v60 = vmul.f32 %v2820_v33, %v7466_v2 }
 0x32f   : > { %v3968_v20 = vand.u32 2147483647, %v3960_v24  ;;  %v3842_v63 = vadd.f32 %v3841_v31, %v3840_v40  ;;  %v2687_v35 = vpop.f32.mrf.mxu1  ;;  %v2753_v25 = vpop.f32.mrf.mxu2  ;;  %v3505_v31 = vsub.f32 %v7866_v62, %v7795_v57 }
 0x330   : > { %v3855_v14 = vadd.f32 %v3854_v5, %v3853_v55  ;;  %v4309_v3 = vadd.f32 %v4308_v17, %v4116_v26  ;;  %v4117_v19 = vmul.f32 %v2687_v35, %v7534_v54  ;;  %5267 = vmatmul.msk.bf16.gmra.mxu0 %vm1975_vm4, %v5530_v27  ;;  %v4102_v46 = vmul.f32 %v2753_v25, %v7498_v36 }
 0x331   : > { %v5330_v51 = vrot.slane %v3968_v20, 9  ;;  %vm4022_vm12 = vcmp.eq.f32.partialorder %v3842_v63, 0.0  ;;  %v2822_v48 = vpop.f32.mrf.mxu3 }
 0x332   : > { %v5344_v34 = vsel %vm4022_vm12, 1.0, %v8685_v10  ;;  %v3929_v12 = vrot.slane %v3855_v14, 4  ;;  %vm4023_vm13 = vcmp.eq.f32.partialorder %v3855_v14, 0.0  ;;  %v4103_v61 = vmul.f32 %v2822_v48, %v7502_v11  ;;  %5279 = vmatmul.msk.bf16.gmra.mxu1 %vm1975_vm4, %v5530_v27 }
 0x333   : > { %v7860_v54 = vadd.f32 %v5330_v51, %v3512_v4  ;;  %v7862_v52 = vmul.f32 %v5344_v34, %v5320_v37  ;;  %v5345_v17 = vsel %vm4023_vm13, 1.0, %v8685_v10  ;;  %v4334_v40 = vadd.f32 %v4102_v46, %v4086_v0  ;;  %v5531_v46 = vld [vmem:[%s5837_s14 + $0x30] sm:$0xff] }
 0x334   : > { %v3937_v2 = vsel %vm699_vm9, %v3842_v63, %v3929_v12  ;;  %v7869_v36 = vmul.f32 %v5345_v17, %v5321_v41  ;;  %v4347_v33 = vadd.f32 %v4103_v61, %v4087_v60  ;;  %v4322_v32 = vadd.f32 %v4321_v56, %v4117_v19  ;;  %5291 = vmatmul.msk.bf16.gmra.mxu2 %vm1975_vm4, %v5530_v27 }
 0x335   : > { %v3945_v55 = vrot.slane %v3937_v2, 7  ;;  %v2620_v11 = vpop.f32.mrf.mxu0  ;;  %v3513_v14 = vand.u32 2147483647, %v3505_v31 }
 0x336   : > { %5303 = vmatmul.msk.bf16.gmra.mxu3 %vm1975_vm4, %v5530_v27  ;;  %v4132_v24 = vmul.f32 %v2620_v11, %v7580_v47 }
 0x337   : > { %v3961_v59 = vsub.f32 %v7866_v62, %v3945_v55  ;;  %v2689_v4 = vpop.f32.mrf.mxu1  ;;  %v2756_v5 = vpop.f32.mrf.mxu2 }
 0x338   : > { %v4310_v26 = vadd.f32 %v4309_v3, %v4132_v24  ;;  %v4133_v37 = vmul.f32 %v2689_v4, %v7587_v42  ;;  %v4118_v56 = vmul.f32 %v2756_v5, %v7567_v7 }
 0x339   : > { %v3969_v41 = vand.u32 2147483647, %v3961_v59  ;;  %v2825_v20 = vpop.f32.mrf.mxu3 }
 0x33a   : > { %v4119_v63 = vmul.f32 %v2825_v20, %v7578_v9  ;;  %v4323_v35 = vadd.f32 %v4322_v32, %v4133_v37  ;;  %v4335_v0 = vadd.f32 %v4334_v40, %v4118_v56  ;;  %v5532_v37 = vld [vmem:[%s5837_s14 + $0x38] sm:$0xff]  ;;  %v4597_v20 = vld [vmem:[%s5832_s4 + $0x8] sm:$0xff] }
 0x33b   : > { %v5331_v47 = vrot.slane %v3969_v41, 9 }
 0x33c   : > { %v4348_v25 = vadd.f32 %v4347_v33, %v4119_v63 }
 0x33d   : > { %v7880_v57 = vadd.f32 %v5331_v47, %v3513_v14  ;;  %v2623_v19 = vpop.f32.mrf.mxu0 }
 0x33e   : > { %v4148_v27 = vmul.f32 %v2623_v19, %v7644_v50 }
 0x33f   : > { %v2692_v3 = vpop.f32.mrf.mxu1  ;;  %v2758_v51 = vpop.f32.mrf.mxu2 }
 0x340   : > { %v4311_v42 = vadd.f32 %v4310_v26, %v4148_v27  ;;  %v4149_v60 = vmul.f32 %v2692_v3, %v7646_v45  ;;  %5268 = vmatmul.msk.bf16.gmra.mxu0 %vm1975_vm4, %v5531_v46  ;;  %v4134_v7 = vmul.f32 %v2758_v51, %v7638_v6  ;;  %v8688_v51 = vld [vmem:[#allocation32_spill] sm:$0xff] }
 0x341   : > { %v2827_v9 = vpop.f32.mrf.mxu3 }
 0x342   : > { %v4135_v48 = vmul.f32 %v2827_v9, %v7640_v44  ;;  %v4324_v34 = vadd.f32 %v4323_v35, %v4149_v60  ;;  %5280 = vmatmul.msk.bf16.gmra.mxu1 %vm1975_vm4, %v5531_v46  ;;  %v4336_v12 = vadd.f32 %v4335_v0, %v4134_v7  ;;  %v7904_v35 = vand.u32 2147483647, %v4597_v20  ;;  %v8687_v0 = vld [vmem:[#allocation37_spill] sm:$0xff] }
 0x343   : > { %v7913_v19 = vperm.slane %v8687_v0, 7 }
 0x344   : > { %v4349_v61 = vadd.f32 %v4348_v25, %v4135_v48  ;;  %5292 = vmatmul.msk.bf16.gmra.mxu2 %vm1975_vm4, %v5531_v46  ;;  %8686 = vst [vmem:[#allocation33_spill] sm:$0xff] %v7904_v35  ;;  %v7910_v25 = vperm.slane %v8687_v0, 5  ;;  %v8690_v48 = vld [vmem:[#allocation30_spill] sm:$0xff] }
 0x345   : > { %v2625_v50 = vpop.f32.mrf.mxu0 }
 0x346   : > { %5304 = vmatmul.msk.bf16.gmra.mxu3 %vm1975_vm4, %v5531_v46  ;;  %v4164_v45 = vmul.f32 %v2625_v50, %v7667_v13 }
 0x347   : > { %v2694_v17 = vpop.f32.mrf.mxu1  ;;  %v2761_v40 = vpop.f32.mrf.mxu2 }
 0x348   : > { %v4312_v2 = vadd.f32 %v4311_v42, %v4164_v45  ;;  %v4165_v6 = vmul.f32 %v2694_v17, %v7680_v22  ;;  %v4150_v44 = vmul.f32 %v2761_v40, %v7656_v30  ;;  %v8689_v42 = vunpack.c.0.s8 %v8688_v51 }
 0x349   : > { %v2830_v33 = vpop.f32.mrf.mxu3 }
 0x34a   : > { %v4151_v32 = vmul.f32 %v2830_v33, %v7662_v18  ;;  %v4325_v55 = vadd.f32 %v4324_v34, %v4165_v6  ;;  %v4337_v11 = vadd.f32 %v4336_v12, %v4150_v44  ;;  %v7919_v60 = vperm.slane %v7904_v35, %v8689_v42  ;;  %v8691_v44 = vld [vmem:[#allocation31_spill] sm:$0xff] }
 0x34b   : > { %v1328_v34 = vsub.f32 %v8690_v48, %v7910_v25  ;;  %v7928_v12 = vperm.slane %v8687_v0, 6 }
 0x34c   : > { %v4350_v24 = vadd.f32 %v4349_v61, %v4151_v32 }
 0x34d   : > { %v2628_v31 = vpop.f32.mrf.mxu0  ;;  %v1456_v40 = vand.u32 2147483647, %v1328_v34 }
 0x34e   : > { %v4180_v59 = vmul.f32 %v2628_v31, %v7707_v58  ;;  %v8692_v31 = vld [vmem:[#allocation35_spill] sm:$0xff] }
 0x34f   : > { %v2697_v4 = vpop.f32.mrf.mxu1  ;;  %v2763_v13 = vpop.f32.mrf.mxu2 }
 0x350   : > { %v4313_v5 = vadd.f32 %v4312_v2, %v4180_v59  ;;  %v4181_v26 = vmul.f32 %v2697_v4, %v7709_v39  ;;  %5269 = vmatmul.msk.bf16.gmra.mxu0 %vm1975_vm4, %v5532_v37  ;;  %v4166_v30 = vmul.f32 %v2763_v13, %v7703_v23  ;;  %v1329_v2 = vsub.f32 %v8690_v48, %v7928_v12 }
 0x351   : > { %v2832_v22 = vpop.f32.mrf.mxu3  ;;  %v8693_v59 = vunpack.c.0.s8 %v8692_v31  ;;  %v1584_v13 = vsub.f32 1.0, %v1456_v40 }
 0x352   : > { %v4167_v18 = vmul.f32 %v2832_v22, %v7705_v1  ;;  %v4326_v41 = vadd.f32 %v4325_v55, %v4181_v26  ;;  %5281 = vmatmul.msk.bf16.gmra.mxu1 %vm1975_vm4, %v5532_v37  ;;  %v4338_v56 = vadd.f32 %v4337_v11, %v4166_v30  ;;  %v1457_v26 = vand.u32 2147483647, %v1329_v2 }
 0x353   : > { %v7943_v4 = vperm.slane %v7904_v35, %v8693_v59 }
 0x354   : > { %v4351_v63 = vadd.f32 %v4350_v24, %v4167_v18  ;;  %5293 = vmatmul.msk.bf16.gmra.mxu2 %vm1975_vm4, %v5532_v37  ;;  %v1344_v24 = vsub.f32 %v8691_v44, %v7910_v25 }
 0x355   : > { %v2630_v58 = vpop.f32.mrf.mxu0 }
 0x356   : > { %5305 = vmatmul.msk.bf16.gmra.mxu3 %vm1975_vm4, %v5532_v37  ;;  %v4196_v39 = vmul.f32 %v2630_v58, %v7729_v38 }
 0x357   : > { %v2699_v14 = vpop.f32.mrf.mxu1  ;;  %v2766_v23 = vpop.f32.mrf.mxu2 }
 0x358   : > { %v4314_v47 = vadd.f32 %v4313_v5, %v4196_v39  ;;  %v4197_v1 = vmul.f32 %v2699_v14, %v7739_v15  ;;  %v4182_v27 = vmul.f32 %v2766_v23, %v7718_v28  ;;  %v7923_v15 = vperm.slane %v8687_v0, 4 }
 0x359   : > { %v2835_v3 = vpop.f32.mrf.mxu3  ;;  %v1330_v28 = vsub.f32 %v8690_v48, %v7913_v19  ;;  %v7948_v39 = vmax.f32 %v1584_v13, 0.0  ;;  %v1585_v14 = vsub.f32 1.0, %v1457_v26 }
 0x35a   : > { %v4183_v38 = vmul.f32 %v2835_v3, %v7725_v53  ;;  %v4315_v46 = vrot.slane %v4314_v47, 4  ;;  %v4327_v7 = vadd.f32 %v4326_v41, %v4197_v1  ;;  %v4339_v9 = vadd.f32 %v4338_v56, %v4182_v27  ;;  %v5533_v56 = vld [vmem:[%s5837_s14 + $0x40] sm:$0xff] }
 0x35b   : > { %v1327_v53 = vsub.f32 %v8690_v48, %v7923_v15  ;;  %v1458_v6 = vand.u32 2147483647, %v1330_v28  ;;  %v1343_v33 = vsub.f32 %v8691_v44, %v7923_v15  ;;  %v7957_v42 = vmax.f32 %v1585_v14, 0.0 }
 0x35c   : > { %v4352_v61 = vadd.f32 %v4351_v63, %v4183_v38  ;;  %v4316_v50 = vadd.f32 %v4315_v46, %v4314_v47  ;;  %v4328_v45 = vrot.slane %v4327_v7, 4 }
 0x35d   : > { %v2849_v17 = vpop.f32.mrf.mxu0  ;;  %v1455_v11 = vand.u32 2147483647, %v1327_v53  ;;  %v1586_v37 = vsub.f32 1.0, %v1458_v6  ;;  %v1471_v20 = vand.u32 2147483647, %v1343_v33 }
 0x35e   : > { %v4317_v32 = vrot.slane %v4316_v50, 2  ;;  %v4329_v55 = vadd.f32 %v4328_v45, %v4327_v7 }
 0x35f   : > { %v2918_v5 = vpop.f32.mrf.mxu1  ;;  %v2768_v18 = vpop.f32.mrf.mxu2  ;;  %v1583_v41 = vsub.f32 1.0, %v1455_v11  ;;  %v7950_v23 = vmax.f32 %v1586_v37, 0.0 }
 0x360   : > { %v4318_v30 = vadd.f32 %v4317_v32, %v4316_v50  ;;  %v4330_v22 = vrot.slane %v4329_v55, 2  ;;  %5270 = vmatmul.msk.bf16.gmra.mxu0 %vm1975_vm4, %v5533_v56  ;;  %v4198_v63 = vmul.f32 %v2768_v18, %v7751_v49  ;;  %v3137_v51 = vmul.f32 %v2918_v5, %v7948_v39 }
 0x361   : > { %v2837_v58 = vpop.f32.mrf.mxu3  ;;  %v7953_v27 = vmax.f32 %v1583_v41, 0.0  ;;  %v1599_v49 = vsub.f32 1.0, %v1471_v20  ;;  %v1472_v50 = vand.u32 2147483647, %v1344_v24 }
 0x362   : > { %v4319_v47 = vrot.slane %v4318_v30, 1  ;;  %v4331_v1 = vadd.f32 %v4330_v22, %v4329_v55  ;;  %v4199_v0 = vmul.f32 %v2837_v58, %v7753_v16  ;;  %5282 = vmatmul.msk.bf16.gmra.mxu1 %vm1975_vm4, %v5533_v56  ;;  %v4340_v3 = vadd.f32 %v4339_v9, %v4198_v63 }
 0x363   : > { %v3136_v48 = vmul.f32 %v2849_v17, %v7953_v27  ;;  %v7961_v28 = vmax.f32 %v1599_v49, 0.0  ;;  %v1345_v9 = vsub.f32 %v8691_v44, %v7928_v12  ;;  %v1600_v6 = vsub.f32 1.0, %v1472_v50 }
 0x364   : > { %v4320_v38 = vadd.f32 %v4319_v47, %v4318_v30  ;;  %v4332_v46 = vrot.slane %v4331_v1, 1  ;;  %v4353_v7 = vadd.f32 %v4352_v61, %v4199_v0  ;;  %v4341_v34 = vrot.slane %v4340_v3, 4  ;;  %5294 = vmatmul.msk.bf16.gmra.mxu2 %vm1975_vm4, %v5533_v56 }
 0x365   : > { %v2851_v16 = vpop.f32.mrf.mxu0  ;;  %v1346_v61 = vsub.f32 %v8691_v44, %v7913_v19  ;;  %v1473_v58 = vand.u32 2147483647, %v1345_v9 }
 0x366   : > { %vm4524_vm15 = vcmp.eq.f32.partialorder %v4320_v38, 0.0  ;;  %v4333_v45 = vadd.f32 %v4332_v46, %v4331_v1  ;;  %v4354_v53 = vrot.slane %v4353_v7, 4  ;;  %5306 = vmatmul.msk.bf16.gmra.mxu3 %vm1975_vm4, %v5533_v56  ;;  %v4342_v40 = vadd.f32 %v4341_v34, %v4340_v3  ;;  %v8694_v3 = vld [vmem:[#allocation28_spill] sm:$0xff] }
 0x367   : > { %v5366_v17 = vsel %vm4524_vm15, 1.0, %v8685_v10  ;;  %v3152_v2 = vmul.f32 %v2851_v16, %v7961_v28  ;;  %v2920_v33 = vpop.f32.mrf.mxu1  ;;  %v2987_v24 = vpop.f32.mrf.mxu2  ;;  %v7978_v56 = vmax.f32 %v1600_v6, 0.0  ;;  %v1474_v14 = vand.u32 2147483647, %v1346_v61 }
 0x368   : > { %v4572_v32 = vmul.f32 %v5366_v17, %v7832_v8  ;;  %v4432_v55 = vrot.slane %v4333_v45, 4  ;;  %vm4525_vm0 = vcmp.eq.f32.partialorder %v4333_v45, 0.0  ;;  %v4355_v11 = vadd.f32 %v4354_v53, %v4353_v7 }
 0x369   : > { %v5367_v31 = vsel %vm4525_vm0, 1.0, %v8685_v10  ;;  %v4343_v59 = vrot.slane %v4342_v40, 2  ;;  %v3138_v13 = vmul.f32 %v2987_v24, %v7957_v42  ;;  %v3056_v5 = vpop.f32.mrf.mxu3  ;;  %v7973_v44 = vadd.f32 %v3152_v2, %v3136_v48  ;;  %v5534_v2 = vld [vmem:[%s5837_s14 + $0x48] sm:$0xff] }
 0x36a   : > { %v4588_v26 = vsub.f32 1.0, %v4572_v32  ;;  %v4440_v37 = vsel %vm699_vm9, %v4320_v38, %v4432_v55  ;;  %v4573_v30 = vmul.f32 %v5367_v31, %v7841_v43  ;;  %v4356_v22 = vrot.slane %v4355_v11, 2 }
 0x36b   : > { %v4448_v18 = vrot.slane %v4440_v37, 6  ;;  %v4344_v8 = vadd.f32 %v4343_v59, %v4342_v40  ;;  %v3139_v41 = vmul.f32 %v3056_v5, %v7950_v23  ;;  %v3153_v0 = vmul.f32 %v2920_v33, %v7978_v56 }
 0x36c   : > { %v4589_v20 = vsub.f32 1.0, %v4573_v30  ;;  %v4357_v63 = vadd.f32 %v4356_v22, %v4355_v11  ;;  %v1359_v49 = vsub.f32 %v8694_v3, %v7923_v15  ;;  %v1601_v7 = vsub.f32 1.0, %v1473_v58 }
 0x36d   : > { %v4464_v47 = vsub.f32 %v7829_v29, %v4448_v18  ;;  %v4345_v1 = vrot.slane %v4344_v8, 1  ;;  %v2854_v43 = vpop.f32.mrf.mxu0  ;;  %v1602_v48 = vsub.f32 1.0, %v1474_v14  ;;  %v7984_v50 = vadd.f32 %v3153_v0, %v3137_v51 }
 0x36e   : > { %v4620_v38 = vrot.slane %v4589_v20, 4  ;;  %v4358_v46 = vrot.slane %v4357_v63, 1  ;;  %v1487_v9 = vand.u32 2147483647, %v1359_v49  ;;  %v7987_v61 = vmax.f32 %v1601_v7, 0.0 }
 0x36f   : > { %v4472_v34 = vand.u32 2147483647, %v4464_v47  ;;  %v4346_v16 = vadd.f32 %v4345_v1, %v4344_v8  ;;  %v2923_v45 = vpop.f32.mrf.mxu1  ;;  %v2989_v17 = vpop.f32.mrf.mxu2  ;;  %v7989_v40 = vmax.f32 %v1602_v48, 0.0  ;;  %v1360_v51 = vsub.f32 %v8694_v3, %v7910_v25 }
 0x370   : > { %v4628_v29 = vsel %vm699_vm9, %v4588_v26, %v4620_v38  ;;  %v4359_v53 = vadd.f32 %v4358_v46, %v4357_v63  ;;  %5271 = vmatmul.msk.bf16.gmra.mxu0 %vm1975_vm4, %v5534_v2  ;;  %v1615_v32 = vsub.f32 1.0, %v1487_v9  ;;  %v3154_v24 = vmul.f32 %v2989_v17, %v7987_v61 }
 0x371   : > { %v5354_v6 = vrot.slane %v4472_v34, 10  ;;  %vm4526_vm1 = vcmp.eq.f32.partialorder %v4346_v16, 0.0  ;;  %v3058_v33 = vpop.f32.mrf.mxu3  ;;  %v1488_v47 = vand.u32 2147483647, %v1360_v51  ;;  %v1361_v1 = vsub.f32 %v8694_v3, %v7928_v12 }
 0x372   : > { %v5368_v55 = vsel %vm4526_vm1, 1.0, %v8685_v10  ;;  %v4433_v11 = vrot.slane %v4359_v53, 4  ;;  %vm4527_vm2 = vcmp.eq.f32.partialorder %v4359_v53, 0.0  ;;  %5283 = vmatmul.msk.bf16.gmra.mxu1 %vm1975_vm4, %v5534_v2  ;;  %v3155_v26 = vmul.f32 %v3058_v33, %v7989_v40 }
 0x373   : > { %v4512_v31 = vadd.f32 %v5354_v6, %v7860_v54  ;;  %v4574_v59 = vmul.f32 %v5368_v55, %v7862_v52  ;;  %v5369_v5 = vsel %vm4527_vm2, 1.0, %v8685_v10  ;;  %v3434_v22 = vadd.f32 %v3154_v24, %v3138_v13 }
 0x374   : > { %v4441_v37 = vsel %vm699_vm9, %v4346_v16, %v4433_v11  ;;  %v4575_v30 = vmul.f32 %v5369_v5, %v7869_v36  ;;  %v8004_v18 = vmax.f32 %v1615_v32, 0.0  ;;  %v3447_v58 = vadd.f32 %v3155_v26, %v3139_v41  ;;  %5295 = vmatmul.msk.bf16.gmra.mxu2 %vm1975_vm4, %v5534_v2  ;;  %v8695_v41 = vld [vmem:[#allocation29_spill] sm:$0xff] }
 0x375   : > { %v4644_v8 = vmul.f32 %v4628_v29, %v4512_v31  ;;  %v4590_v20 = vsub.f32 1.0, %v4574_v59  ;;  %v4449_v63 = vrot.slane %v4441_v37, 6  ;;  %v2856_v54 = vpop.f32.mrf.mxu0  ;;  %v1362_v0 = vsub.f32 %v8694_v3, %v7913_v19 }
 0x376   : > { %v4591_v14 = vsub.f32 1.0, %v4575_v30  ;;  %v3168_v52 = vmul.f32 %v2854_v43, %v8004_v18  ;;  %5307 = vmatmul.msk.bf16.gmra.mxu3 %vm1975_vm4, %v5534_v2  ;;  %v1375_v49 = vsub.f32 %v8695_v41, %v7923_v15  ;;  %v1616_v7 = vsub.f32 1.0, %v1488_v47 }
 0x377   : > { %v4696_v36 = vmul.f32 %v7919_v60, %v4644_v8  ;;  %v4465_v13 = vsub.f32 %v7866_v62, %v4449_v63  ;;  %v2925_v38 = vpop.f32.mrf.mxu1  ;;  %v1489_v48 = vand.u32 2147483647, %v1361_v1  ;;  %v2992_v34 = vpop.f32.mrf.mxu2  ;;  %v1490_v29 = vand.u32 2147483647, %v1362_v0 }
 0x378   : > { %v4621_v46 = vrot.slane %v4591_v14, 4  ;;  %v3409_v43 = vadd.f32 %v7973_v44, %v3168_v52  ;;  %v1376_v62 = vsub.f32 %v8695_v41, %v7910_v25  ;;  %v8021_v3 = vmax.f32 %v1616_v7, 0.0 }
 0x379   : > { %v4715_v16 = vrot.slane %v4696_v36, 3  ;;  %v4473_v9 = vand.u32 2147483647, %v4465_v13  ;;  %v3061_v53 = vpop.f32.mrf.mxu3  ;;  %v1617_v17 = vsub.f32 1.0, %v1489_v48  ;;  %v1503_v2 = vand.u32 2147483647, %v1375_v49 }
 0x37a   : > { %v4629_v60 = vsel %vm699_vm9, %v4590_v20, %v4621_v46  ;;  %v1618_v44 = vsub.f32 1.0, %v1490_v29  ;;  %v1504_v32 = vand.u32 2147483647, %v1376_v62  ;;  %v3169_v51 = vmul.f32 %v2923_v45, %v8021_v3  ;;  %v5535_v49 = vld [vmem:[%s5837_s14 + $0x50] sm:$0xff] }
 0x37b   : > { %v4732_v6 = vsel %vm650_vm5, %v4696_v36, %v4715_v16  ;;  %v5355_v33 = vrot.slane %v4473_v9, 10  ;;  %v8025_v55 = vmax.f32 %v1617_v17, 0.0  ;;  %v1631_v11 = vsub.f32 1.0, %v1503_v2 }
 0x37c   : > { %v1377_v24 = vsub.f32 %v8695_v41, %v7928_v12  ;;  %v8030_v59 = vmax.f32 %v1618_v44, 0.0  ;;  %v1632_v5 = vsub.f32 1.0, %v1504_v32  ;;  %v1378_v26 = vsub.f32 %v8695_v41, %v7913_v19  ;;  %v8696_v41 = vld [vmem:[#allocation26_spill] sm:$0xff]  ;;  %v8697_v32 = vld [vmem:[#allocation27_spill] sm:$0xff] }
 0x37d   : > { %v4513_v31 = vadd.f32 %v5355_v33, %v7880_v57  ;;  %v2859_v37 = vpop.f32.mrf.mxu0  ;;  %v3422_v30 = vadd.f32 %v7984_v50, %v3169_v51  ;;  %v3170_v45 = vmul.f32 %v2992_v34, %v8025_v55  ;;  %v8036_v8 = vmax.f32 %v1631_v11, 0.0 }
 0x37e   : > { %v1505_v20 = vand.u32 2147483647, %v1377_v24  ;;  %v3171_v14 = vmul.f32 %v3061_v53, %v8030_v59  ;;  %v8039_v52 = vmax.f32 %v1632_v5, 0.0  ;;  %v1506_v57 = vand.u32 2147483647, %v1378_v26 }
 0x37f   : > { %v4645_v63 = vmul.f32 %v4629_v60, %v4513_v31  ;;  %v2928_v47 = vpop.f32.mrf.mxu1  ;;  %v3435_v1 = vadd.f32 %v3434_v22, %v3170_v45  ;;  %v3184_v36 = vmul.f32 %v2856_v54, %v8036_v8  ;;  %v2994_v0 = vpop.f32.mrf.mxu2  ;;  %v1391_v50 = vsub.f32 %v8696_v41, %v7923_v15 }
 0x380   : > { %v1633_v13 = vsub.f32 1.0, %v1505_v20  ;;  %5272 = vmatmul.msk.bf16.gmra.mxu0 %vm1975_vm4, %v5535_v49  ;;  %v3448_v7 = vadd.f32 %v3447_v58, %v3171_v14  ;;  %v3185_v48 = vmul.f32 %v2925_v38, %v8039_v52  ;;  %v1634_v34 = vsub.f32 1.0, %v1506_v57 }
 0x381   : > { %v4697_v46 = vmul.f32 %v7943_v4, %v4645_v63  ;;  %v3063_v16 = vpop.f32.mrf.mxu3  ;;  %v3410_v9 = vadd.f32 %v3409_v43, %v3184_v36  ;;  %v1519_v22 = vand.u32 2147483647, %v1391_v50  ;;  %v1392_v54 = vsub.f32 %v8696_v41, %v7910_v25 }
 0x382   : > { %v8048_v29 = vmax.f32 %v1633_v13, 0.0  ;;  %5284 = vmatmul.msk.bf16.gmra.mxu1 %vm1975_vm4, %v5535_v49  ;;  %v3423_v60 = vadd.f32 %v3422_v30, %v3185_v48  ;;  %v8053_v17 = vmax.f32 %v1634_v34, 0.0  ;;  %v1393_v43 = vsub.f32 %v8696_v41, %v7928_v12 }
 0x383   : > { %v4716_v53 = vrot.slane %v4697_v46, 6  ;;  %v4717_v62 = vrot.slane %v4697_v46, 1  ;;  %v1647_v58 = vsub.f32 1.0, %v1519_v22  ;;  %v1520_v38 = vand.u32 2147483647, %v1392_v54 }
 0x384   : > { %v3186_v4 = vmul.f32 %v2994_v0, %v8048_v29  ;;  %v3187_v33 = vmul.f32 %v3063_v16, %v8053_v17  ;;  %5296 = vmatmul.msk.bf16.gmra.mxu2 %vm1975_vm4, %v5535_v49  ;;  %v1394_v44 = vsub.f32 %v8696_v41, %v7913_v19  ;;  %v1407_v51 = vsub.f32 %v8697_v32, %v7923_v15 }
 0x385   : > { %v4733_v2 = vsel %vm4723_vm8, %v4716_v53, %v4717_v62  ;;  %v2861_v11 = vpop.f32.mrf.mxu0  ;;  %v8068_v5 = vmax.f32 %v1647_v58, 0.0  ;;  %v1648_v26 = vsub.f32 1.0, %v1520_v38  ;;  %v1521_v45 = vand.u32 2147483647, %v1393_v43  ;;  %v8699_v38 = vld [vmem:[#allocation24_spill] sm:$0xff] }
 0x386   : > { %v8066_v24 = vsel %vm695_vm10, %v4732_v6, %v4733_v2  ;;  %v3436_v31 = vadd.f32 %v3435_v1, %v3186_v4  ;;  %5308 = vmatmul.msk.bf16.gmra.mxu3 %vm1975_vm4, %v5535_v49  ;;  %v3449_v30 = vadd.f32 %v3448_v7, %v3187_v33  ;;  %v1522_v20 = vand.u32 2147483647, %v1394_v44 }
 0x387   : > { %8698 = vst [vmem:[#allocation40_spill] sm:$0xff] %v8066_v24  ;;  %v1535_v63 = vand.u32 2147483647, %v1407_v51  ;;  %v2930_v14 = vpop.f32.mrf.mxu1  ;;  %v3200_v57 = vmul.f32 %v2859_v37, %v8068_v5  ;;  %v8072_v36 = vmax.f32 %v1648_v26, 0.0  ;;  %v2997_v13 = vpop.f32.mrf.mxu2  ;;  %v1408_v6 = vsub.f32 %v8697_v32, %v7910_v25 }
 0x388   : > { %v1409_v1 = vsub.f32 %v8697_v32, %v7928_v12  ;;  %v1649_v0 = vsub.f32 1.0, %v1521_v45  ;;  %v1650_v41 = vsub.f32 1.0, %v1522_v20  ;;  %v1410_v46 = vsub.f32 %v8697_v32, %v7913_v19 }
 0x389   : > { %v3066_v50 = vpop.f32.mrf.mxu3  ;;  %v1663_v49 = vsub.f32 1.0, %v1535_v63  ;;  %v3411_v7 = vadd.f32 %v3410_v9, %v3200_v57  ;;  %v3201_v48 = vmul.f32 %v2928_v47, %v8072_v36  ;;  %v1536_v37 = vand.u32 2147483647, %v1408_v6 }
 0x38a   : > { %v1537_v34 = vand.u32 2147483647, %v1409_v1  ;;  %v8081_v16 = vmax.f32 %v1649_v0, 0.0  ;;  %v8083_v22 = vmax.f32 %v1650_v41, 0.0  ;;  %v1538_v53 = vand.u32 2147483647, %v1410_v46 }
 0x38b   : > { %v8085_v54 = vmax.f32 %v1663_v49, 0.0  ;;  %v3424_v62 = vadd.f32 %v3423_v60, %v3201_v48  ;;  %v1664_v4 = vsub.f32 1.0, %v1536_v37  ;;  %v1423_v43 = vsub.f32 %v8699_v38, %v7923_v15  ;;  %v5536_v41 = vld [vmem:[%s5837_s14 + $0x58] sm:$0xff] }
 0x38c   : > { %v1665_v58 = vsub.f32 1.0, %v1537_v34  ;;  %v3202_v2 = vmul.f32 %v2997_v13, %v8081_v16  ;;  %v3203_v9 = vmul.f32 %v3066_v50, %v8083_v22  ;;  %v1666_v33 = vsub.f32 1.0, %v1538_v53 }
 0x38d   : > { %v3216_v47 = vmul.f32 %v2861_v11, %v8085_v54  ;;  %v2864_v44 = vpop.f32.mrf.mxu0  ;;  %v8092_v32 = vmax.f32 %v1664_v4, 0.0  ;;  %v1551_v26 = vand.u32 2147483647, %v1423_v43  ;;  %v1424_v60 = vsub.f32 %v8699_v38, %v7910_v25 }
 0x38e   : > { %v8094_v51 = vmax.f32 %v1665_v58, 0.0  ;;  %v3437_v45 = vadd.f32 %v3436_v31, %v3202_v2  ;;  %v3450_v20 = vadd.f32 %v3449_v30, %v3203_v9  ;;  %v8098_v57 = vmax.f32 %v1666_v33, 0.0 }
 0x38f   : > { %v3412_v63 = vadd.f32 %v3411_v7, %v3216_v47  ;;  %v2933_v13 = vpop.f32.mrf.mxu1  ;;  %v3217_v6 = vmul.f32 %v2930_v14, %v8092_v32  ;;  %v2999_v11 = vpop.f32.mrf.mxu2  ;;  %v1679_v1 = vsub.f32 1.0, %v1551_v26  ;;  %v1552_v0 = vand.u32 2147483647, %v1424_v60 }
 0x390   : > { %5273 = vmatmul.msk.bf16.gmra.mxu0 %vm1975_vm4, %v5536_v41  ;;  %v1425_v50 = vsub.f32 %v8699_v38, %v7928_v12  ;;  %v3218_v49 = vmul.f32 %v2999_v11, %v8094_v51  ;;  %v1426_v31 = vsub.f32 %v8699_v38, %v7913_v19  ;;  %v1439_v30 = vsub.f32 %v8684_v21, %v7923_v15 }
 0x391   : > { %v3068_v46 = vpop.f32.mrf.mxu3  ;;  %v1440_v14 = vsub.f32 %v8684_v21, %v7910_v25  ;;  %v3425_v7 = vadd.f32 %v3424_v62, %v3217_v6  ;;  %v8113_v37 = vmax.f32 %v1679_v1, 0.0  ;;  %v1680_v34 = vsub.f32 1.0, %v1552_v0 }
 0x392   : > { %v3219_v48 = vmul.f32 %v3068_v46, %v8098_v57  ;;  %5285 = vmatmul.msk.bf16.gmra.mxu1 %vm1975_vm4, %v5536_v41  ;;  %v3438_v53 = vadd.f32 %v3437_v45, %v3218_v49  ;;  %v1553_v4 = vand.u32 2147483647, %v1425_v50  ;;  %v1554_v58 = vand.u32 2147483647, %v1426_v31 }
 0x393   : > { %v1567_v43 = vand.u32 2147483647, %v1439_v30  ;;  %v3232_v38 = vmul.f32 %v2864_v44, %v8113_v37  ;;  %v8117_v9 = vmax.f32 %v1680_v34, 0.0  ;;  %v1568_v15 = vand.u32 2147483647, %v1440_v14 }
 0x394   : > { %v3451_v2 = vadd.f32 %v3450_v20, %v3219_v48  ;;  %5297 = vmatmul.msk.bf16.gmra.mxu2 %vm1975_vm4, %v5536_v41  ;;  %v1681_v25 = vsub.f32 1.0, %v1553_v4  ;;  %v1682_v62 = vsub.f32 1.0, %v1554_v58  ;;  %v1441_v26 = vsub.f32 %v8684_v21, %v7928_v12 }
 0x395   : > { %v1695_v47 = vsub.f32 1.0, %v1567_v43  ;;  %v2866_v33 = vpop.f32.mrf.mxu0  ;;  %v3413_v60 = vadd.f32 %v3412_v63, %v3232_v38  ;;  %v3233_v45 = vmul.f32 %v2933_v13, %v8117_v9  ;;  %v1696_v20 = vsub.f32 1.0, %v1568_v15 }
 0x396   : > { %5309 = vmatmul.msk.bf16.gmra.mxu3 %vm1975_vm4, %v5536_v41  ;;  %v1442_v44 = vsub.f32 %v8684_v21, %v7913_v19  ;;  %v8126_v6 = vmax.f32 %v1681_v25, 0.0  ;;  %v8128_v11 = vmax.f32 %v1682_v62, 0.0  ;;  %v1569_v50 = vand.u32 2147483647, %v1441_v26 }
 0x397   : > { %v8130_v1 = vmax.f32 %v1695_v47, 0.0  ;;  %v2935_v0 = vpop.f32.mrf.mxu1  ;;  %v3426_v49 = vadd.f32 %v3425_v7, %v3233_v45  ;;  %v3002_v46 = vpop.f32.mrf.mxu2  ;;  %v8132_v12 = vmax.f32 %v1696_v20, 0.0 }
 0x398   : > { %v1570_v63 = vand.u32 2147483647, %v1442_v44  ;;  %v3234_v13 = vmul.f32 %v3002_v46, %v8126_v6  ;;  %v1697_v30 = vsub.f32 1.0, %v1569_v50 }
 0x399   : > { %v3071_v41 = vpop.f32.mrf.mxu3  ;;  %v3248_v31 = vmul.f32 %v2866_v33, %v8130_v1  ;;  %v3249_v19 = vmul.f32 %v2935_v0, %v8132_v12 }
 0x39a   : > { %v3235_v21 = vmul.f32 %v3071_v41, %v8128_v11  ;;  %v1698_v14 = vsub.f32 1.0, %v1570_v63  ;;  %v3439_v48 = vadd.f32 %v3438_v53, %v3234_v13  ;;  %v8138_v43 = vmax.f32 %v1697_v30, 0.0 }
 0x39b   : > { %v3414_v34 = vadd.f32 %v3413_v60, %v3248_v31  ;;  %v3427_v58 = vadd.f32 %v3426_v49, %v3249_v19 }
 0x39c   : > { %v3452_v4 = vadd.f32 %v3451_v2, %v3235_v21  ;;  %v8140_v25 = vmax.f32 %v1698_v14, 0.0 }
 0x39d   : > { %v3415_v7 = vrot.slane %v3414_v34, 4  ;;  %v2869_v38 = vpop.f32.mrf.mxu0  ;;  %v3428_v15 = vrot.slane %v3427_v58, 4 }
 0x39e   : > { %8700 = vst [vmem:[#allocation38_spill] sm:$0xff] %v8140_v25  ;;  %v3584_v46 = vmul.f32 %v2869_v38, %v7953_v27 }
 0x39f   : > { %v3416_v62 = vadd.f32 %v3415_v7, %v3414_v34  ;;  %v2938_v47 = vpop.f32.mrf.mxu1  ;;  %v3429_v33 = vadd.f32 %v3428_v15, %v3427_v58  ;;  %v3004_v26 = vpop.f32.mrf.mxu2 }
 0x3a0   : > { %v3250_v20 = vmul.f32 %v3004_v26, %v8138_v43 }
 0x3a1   : > { %v3417_v45 = vrot.slane %v3416_v62, 2  ;;  %v3073_v44 = vpop.f32.mrf.mxu3  ;;  %v3430_v0 = vrot.slane %v3429_v33, 2 }
 0x3a2   : > { %v3251_v53 = vmul.f32 %v3073_v44, %v8140_v25  ;;  %v3440_v60 = vadd.f32 %v3439_v48, %v3250_v20 }
 0x3a3   : > { %v3418_v2 = vadd.f32 %v3417_v45, %v3416_v62  ;;  %v3431_v50 = vadd.f32 %v3430_v0, %v3429_v33 }
 0x3a4   : > { %v3453_v49 = vadd.f32 %v3452_v4, %v3251_v53  ;;  %v3441_v63 = vrot.slane %v3440_v60, 4  ;;  %v3585_v4 = vmul.f32 %v2938_v47, %v7948_v39 }
 0x3a5   : > { %v2871_v13 = vpop.f32.mrf.mxu0  ;;  %v3419_v41 = vrot.slane %v3418_v2, 1  ;;  %v3432_v31 = vrot.slane %v3431_v50, 1 }
 0x3a6   : > { %v3454_v30 = vrot.slane %v3453_v49, 4  ;;  %v3600_v21 = vmul.f32 %v2871_v13, %v7961_v28  ;;  %v3442_v19 = vadd.f32 %v3441_v63, %v3440_v60 }
 0x3a7   : > { %v2940_v14 = vpop.f32.mrf.mxu1  ;;  %v8146_v34 = vadd.f32 %v3432_v31, %v3431_v50  ;;  %v3007_v7 = vpop.f32.mrf.mxu2  ;;  %v8150_v33 = vadd.f32 %v3419_v41, %v3418_v2 }
 0x3a8   : > { %v3455_v58 = vadd.f32 %v3454_v30, %v3453_v49  ;;  %v3856_v15 = vadd.f32 %v3600_v21, %v3584_v46  ;;  %v3601_v48 = vmul.f32 %v2940_v14, %v7978_v56  ;;  %v3443_v62 = vrot.slane %v3442_v19, 2 }
 0x3a9   : > { %v3076_v38 = vpop.f32.mrf.mxu3  ;;  %v3482_v26 = vrot.slane %v8146_v34, 4  ;;  %v3586_v31 = vmul.f32 %v3007_v7, %v7957_v42  ;;  %vm3536_vm4 = vcmp.eq.f32.partialorder %v8150_v33, 0.0  ;;  %vm3537_vm8 = vcmp.eq.f32.partialorder %v8146_v34, 0.0 }
 0x3aa   : > { %v3456_v45 = vrot.slane %v3455_v58, 2  ;;  %v3444_v20 = vadd.f32 %v3443_v62, %v3442_v19  ;;  %v3869_v44 = vadd.f32 %v3601_v48, %v3585_v4  ;;  %v5323_v34 = vsel %vm3537_vm8, 1.0, %v8685_v10 }
 0x3ab   : > { %v8155_v0 = vsel %vm699_vm9, %v8150_v33, %v3482_v26 }
 0x3ac   : > { %v3457_v53 = vadd.f32 %v3456_v45, %v3455_v58  ;;  %v3445_v50 = vrot.slane %v3444_v20, 1  ;;  %v3587_v58 = vmul.f32 %v3076_v38, %v7950_v23 }
 0x3ad   : > { %v2874_v60 = vpop.f32.mrf.mxu0 }
 0x3ae   : > { %v3458_v49 = vrot.slane %v3457_v53, 1  ;;  %v3616_v46 = vmul.f32 %v2874_v60, %v8004_v18  ;;  %v8163_v19 = vadd.f32 %v3445_v50, %v3444_v20 }
 0x3af   : > { %v2943_v63 = vpop.f32.mrf.mxu1  ;;  %v3009_v2 = vpop.f32.mrf.mxu2 }
 0x3b0   : > { %v8158_v47 = vadd.f32 %v3458_v49, %v3457_v53  ;;  %v3857_v13 = vadd.f32 %v3856_v15, %v3616_v46  ;;  %v3617_v41 = vmul.f32 %v2943_v63, %v8021_v3  ;;  %v3602_v30 = vmul.f32 %v3009_v2, %v7987_v61 }
 0x3b1   : > { %v3078_v21 = vpop.f32.mrf.mxu3  ;;  %vm3538_vm7 = vcmp.eq.f32.partialorder %v8163_v19, 0.0 }
 0x3b2   : > { %v3483_v14 = vrot.slane %v8158_v47, 4  ;;  %v3603_v48 = vmul.f32 %v3078_v21, %v7989_v40  ;;  %v3882_v62 = vadd.f32 %v3602_v30, %v3586_v31  ;;  %v3870_v4 = vadd.f32 %v3869_v44, %v3617_v41 }
 0x3b3   : > { %vm3539_vm12 = vcmp.eq.f32.partialorder %v8158_v47, 0.0 }
 0x3b4   : > { %v8170_v15 = vsel %vm699_vm9, %v8163_v19, %v3483_v14  ;;  %v3895_v26 = vadd.f32 %v3603_v48, %v3587_v58  ;;  %v5325_v19 = vsel %vm3539_vm12, 1.0, %v8685_v10 }
 0x3b5   : > { %v2876_v45 = vpop.f32.mrf.mxu0 }
 0x3b6   : > { %v3632_v7 = vmul.f32 %v2876_v45, %v8036_v8 }
 0x3b7   : > { %v2945_v53 = vpop.f32.mrf.mxu1  ;;  %v3012_v60 = vpop.f32.mrf.mxu2 }
 0x3b8   : > { %v3858_v20 = vadd.f32 %v3857_v13, %v3632_v7  ;;  %v3633_v50 = vmul.f32 %v2945_v53, %v8039_v52  ;;  %v3618_v49 = vmul.f32 %v3012_v60, %v8025_v55 }
 0x3b9   : > { %v3081_v38 = vpop.f32.mrf.mxu3 }
 0x3ba   : > { %v3619_v46 = vmul.f32 %v3081_v38, %v8030_v59  ;;  %v3871_v63 = vadd.f32 %v3870_v4, %v3633_v50  ;;  %v3883_v44 = vadd.f32 %v3882_v62, %v3618_v49 }
 0x3bc   : > { %v3896_v2 = vadd.f32 %v3895_v26, %v3619_v46 }
 0x3bd   : > { %v2879_v41 = vpop.f32.mrf.mxu0 }
 0x3be   : > { %v3648_v31 = vmul.f32 %v2879_v41, %v8068_v5 }
 0x3bf   : > { %v2948_v30 = vpop.f32.mrf.mxu1  ;;  %v3014_v21 = vpop.f32.mrf.mxu2 }
 0x3c0   : > { %v3859_v14 = vadd.f32 %v3858_v20, %v3648_v31  ;;  %v3649_v58 = vmul.f32 %v2948_v30, %v8072_v36  ;;  %v3634_v13 = vmul.f32 %v3014_v21, %v8048_v29 }
 0x3c1   : > { %v3083_v48 = vpop.f32.mrf.mxu3 }
 0x3c2   : > { %v3635_v45 = vmul.f32 %v3083_v48, %v8053_v17  ;;  %v3872_v7 = vadd.f32 %v3871_v63, %v3649_v58  ;;  %v3884_v53 = vadd.f32 %v3883_v44, %v3634_v13 }
 0x3c4   : > { %v3897_v60 = vadd.f32 %v3896_v2, %v3635_v45 }
 0x3c5   : > { %v2881_v38 = vpop.f32.mrf.mxu0 }
 0x3c6   : > { %v3664_v62 = vmul.f32 %v2881_v38, %v8085_v54 }
 0x3c7   : > { %v2950_v4 = vpop.f32.mrf.mxu1  ;;  %v3017_v26 = vpop.f32.mrf.mxu2 }
 0x3c8   : > { %v3860_v50 = vadd.f32 %v3859_v14, %v3664_v62  ;;  %v3665_v49 = vmul.f32 %v2950_v4, %v8092_v32  ;;  %v3650_v20 = vmul.f32 %v3017_v26, %v8081_v16 }
 0x3c9   : > { %v3086_v46 = vpop.f32.mrf.mxu3 }
 0x3ca   : > { %v3651_v41 = vmul.f32 %v3086_v46, %v8083_v22  ;;  %v3873_v31 = vadd.f32 %v3872_v7, %v3665_v49  ;;  %v3885_v30 = vadd.f32 %v3884_v53, %v3650_v20 }
 0x3cc   : > { %v3898_v21 = vadd.f32 %v3897_v60, %v3651_v41 }
 0x3cd   : > { %v2884_v48 = vpop.f32.mrf.mxu0 }
 0x3ce   : > { %v3680_v63 = vmul.f32 %v2884_v48, %v8113_v37 }
 0x3cf   : > { %v2953_v44 = vpop.f32.mrf.mxu1  ;;  %v3019_v2 = vpop.f32.mrf.mxu2 }
 0x3d0   : > { %v3861_v58 = vadd.f32 %v3860_v50, %v3680_v63  ;;  %v3681_v13 = vmul.f32 %v2953_v44, %v8117_v9  ;;  %v3666_v14 = vmul.f32 %v3019_v2, %v8094_v51 }
 0x3d1   : > { %v3088_v45 = vpop.f32.mrf.mxu3 }
 0x3d2   : > { %v3667_v38 = vmul.f32 %v3088_v45, %v8098_v57  ;;  %v3874_v62 = vadd.f32 %v3873_v31, %v3681_v13  ;;  %v3886_v4 = vadd.f32 %v3885_v30, %v3666_v14 }
 0x3d4   : > { %v3899_v26 = vadd.f32 %v3898_v21, %v3667_v38 }
 0x3d5   : > { %v2886_v46 = vpop.f32.mrf.mxu0 }
 0x3d6   : > { %v3696_v7 = vmul.f32 %v2886_v46, %v8130_v1 }
 0x3d7   : > { %v2955_v53 = vpop.f32.mrf.mxu1  ;;  %v3022_v60 = vpop.f32.mrf.mxu2 }
 0x3d8   : > { %v3862_v49 = vadd.f32 %v3861_v58, %v3696_v7  ;;  %v3697_v20 = vmul.f32 %v2955_v53, %v8132_v12  ;;  %v3682_v50 = vmul.f32 %v3022_v60, %v8126_v6 }
 0x3d9   : > { %v3091_v41 = vpop.f32.mrf.mxu3 }
 0x3da   : > { %v3683_v48 = vmul.f32 %v3091_v41, %v8128_v11  ;;  %v3863_v63 = vrot.slane %v3862_v49, 4  ;;  %v3875_v44 = vadd.f32 %v3874_v62, %v3697_v20  ;;  %v3887_v2 = vadd.f32 %v3886_v4, %v3682_v50 }
 0x3dc   : > { %v3900_v45 = vadd.f32 %v3899_v26, %v3683_v48  ;;  %v3864_v31 = vadd.f32 %v3863_v63, %v3862_v49  ;;  %v3876_v30 = vrot.slane %v3875_v44, 4 }
 0x3dd   : > { %v8192_v21 = vpop.f32.mrf.mxu0 }
 0x3de   : > { %v3865_v13 = vrot.slane %v3864_v31, 2  ;;  %v3877_v14 = vadd.f32 %v3876_v30, %v3875_v44 }
 0x3df   : > { %v8194_v38 = vpop.f32.mrf.mxu1  ;;  %v3024_v7 = vpop.f32.mrf.mxu2 }
 0x3e0   : > { %v3866_v58 = vadd.f32 %v3865_v13, %v3864_v31  ;;  %v3878_v46 = vrot.slane %v3877_v14, 2  ;;  %v3698_v53 = vmul.f32 %v3024_v7, %v8138_v43  ;;  %v5322_v31 = vsel %vm3536_vm4, 1.0, %v8685_v10 }
 0x3e1   : > { %v3093_v60 = vpop.f32.mrf.mxu3 }
 0x3e2   : > { %v3867_v24 = vrot.slane %v3866_v58, 1  ;;  %v3879_v41 = vadd.f32 %v3878_v46, %v3877_v14  ;;  %v3699_v62 = vmul.f32 %v3093_v60, %v8140_v25  ;;  %v3888_v4 = vadd.f32 %v3887_v2, %v3698_v53  ;;  %v8215_v53 = vld [vmem:[%s5824_s20 + $0x30] sm:$0x77] }
 0x3e3   : > { %8702 = vst [vmem:[#allocation46_spill] sm:$0xff] %v8215_v53 }
 0x3e4   : > { %v3868_v26 = vadd.f32 %v3867_v24, %v3866_v58  ;;  %v3880_v49 = vrot.slane %v3879_v41, 1  ;;  %v3901_v20 = vadd.f32 %v3900_v45, %v3699_v62  ;;  %v3889_v50 = vrot.slane %v3888_v4, 4 }
 0x3e5   : > { %v8199_v48 = vpop.f32.mrf.mxu0 }
 0x3e6   : > { %vm4024_vm10 = vcmp.eq.f32.partialorder %v3868_v26, 0.0  ;;  %v3881_v63 = vadd.f32 %v3880_v49, %v3879_v41  ;;  %v3902_v44 = vrot.slane %v3901_v20, 4  ;;  %v3890_v13 = vadd.f32 %v3889_v50, %v3888_v4 }
 0x3e7   : > { %v5346_v30 = vsel %vm4024_vm10, 1.0, %v8685_v10  ;;  %v8204_v2 = vpop.f32.mrf.mxu1  ;;  %v8208_v14 = vpop.f32.mrf.mxu2 }
 0x3e8   : > { %v8206_v33 = vmul.f32 %v5346_v30, %v5322_v31  ;;  %v3930_v24 = vrot.slane %v3881_v63, 4  ;;  %vm4025_vm3 = vcmp.eq.f32.partialorder %v3881_v63, 0.0  ;;  %v3903_v45 = vadd.f32 %v3902_v44, %v3901_v20 }
 0x3e9   : > { %v5347_v58 = vsel %vm4025_vm3, 1.0, %v8685_v10  ;;  %v3891_v46 = vrot.slane %v3890_v13, 2  ;;  %v8212_v7 = vpop.f32.mrf.mxu3  ;;  %v3506_v20 = vsub.f32 %v8215_v53, %v8155_v0  ;;  %v5324_v0 = vsel %vm3538_vm7, 1.0, %v8685_v10 }
 0x3ea   : > { %8701 = vst [vmem:[#allocation43_spill] sm:$0xff] %v8206_v33  ;;  %v3938_v60 = vsel %vm699_vm9, %v3868_v26, %v3930_v24  ;;  %v8218_v41 = vmul.f32 %v5347_v58, %v5323_v34  ;;  %v3904_v62 = vrot.slane %v3903_v45, 2 }
 0x3eb   : > { %v3946_v4 = vrot.slane %v3938_v60, 7  ;;  %v3892_v49 = vadd.f32 %v3891_v46, %v3890_v13  ;;  %v3514_v13 = vand.u32 2147483647, %v3506_v20 }
 0x3ec   : > { %8703 = vst [vmem:[#allocation44_spill] sm:$0xff] %v8218_v41  ;;  %v3905_v50 = vadd.f32 %v3904_v62, %v3903_v45 }
 0x3ed   : > { %v3962_v63 = vsub.f32 %v8215_v53, %v3946_v4  ;;  %v3893_v44 = vrot.slane %v3892_v49, 1  ;;  %v2894_v31 = vpop.f32.mrf.mxu0  ;;  %v8234_v4 = vld [vmem:[%s5824_s20 + $0x38] sm:$0x77] }
 0x3ee   : > { %v3906_v30 = vrot.slane %v3905_v50, 1  ;;  %8706 = vst [vmem:[#allocation34_spill] sm:$0xff] %v8234_v4 }
 0x3ef   : > { %v3970_v35 = vand.u32 2147483647, %v3962_v63  ;;  %v3894_v33 = vadd.f32 %v3893_v44, %v3892_v49  ;;  %v2963_v25 = vpop.f32.mrf.mxu1  ;;  %v3029_v24 = vpop.f32.mrf.mxu2  ;;  %v3507_v63 = vsub.f32 %v8234_v4, %v8170_v15  ;;  %v4104_v15 = vmul.f32 %v8199_v48, %v7961_v28 }
 0x3f0   : > { %v3907_v26 = vadd.f32 %v3906_v30, %v3905_v50 }
 0x3f1   : > { %v5332_v45 = vrot.slane %v3970_v35, 9  ;;  %vm4026_vm13 = vcmp.eq.f32.partialorder %v3894_v33, 0.0  ;;  %v3098_v34 = vpop.f32.mrf.mxu3 }
 0x3f2   : > { %v5348_v58 = vsel %vm4026_vm13, 1.0, %v8685_v10  ;;  %v3931_v46 = vrot.slane %v3907_v26, 4  ;;  %vm4027_vm15 = vcmp.eq.f32.partialorder %v3907_v26, 0.0 }
 0x3f3   : > { %v8228_v60 = vadd.f32 %v5332_v45, %v3514_v13  ;;  %v8230_v62 = vmul.f32 %v5348_v58, %v5324_v0  ;;  %v5349_v47 = vsel %vm4027_vm15, 1.0, %v8685_v10  ;;  %v3515_v0 = vand.u32 2147483647, %v3507_v63 }
 0x3f4   : > { %v3939_v35 = vsel %vm699_vm9, %v3894_v33, %v3931_v46  ;;  %v8237_v49 = vmul.f32 %v5349_v47, %v5325_v19  ;;  %v4105_v63 = vmul.f32 %v8204_v2, %v7978_v56 }
 0x3f5   : > { %8704 = vst [vmem:[#allocation47_spill] sm:$0xff] %v8228_v60  ;;  %v3947_v50 = vrot.slane %v3939_v35, 7  ;;  %v2896_v20 = vpop.f32.mrf.mxu0  ;;  %v4088_v35 = vmul.f32 %v8192_v21, %v7953_v27 }
 0x3f6   : > { %8705 = vst [vmem:[#allocation45_spill] sm:$0xff] %v8230_v62 }
 0x3f7   : > { %8707 = vst [vmem:[#allocation23_spill] sm:$0xff] %v8237_v49  ;;  %v3963_v44 = vsub.f32 %v8234_v4, %v3947_v50  ;;  %v2965_v30 = vpop.f32.mrf.mxu1  ;;  %v3032_v26 = vpop.f32.mrf.mxu2 }
 0x3f8   : > { %v4137_v28 = vmul.f32 %v2965_v30, %v8039_v52  ;;  %v4107_v52 = vmul.f32 %v3098_v34, %v7989_v40 }
 0x3f9   : > { %v3971_v13 = vand.u32 2147483647, %v3963_v44  ;;  %v3101_v45 = vpop.f32.mrf.mxu3  ;;  %v4120_v44 = vmul.f32 %v2894_v31, %v8004_v18 }
 0x3fb   : > { %v5333_v58 = vrot.slane %v3971_v13, 9  ;;  %v4089_v13 = vmul.f32 %v8194_v38, %v7948_v39 }
 0x3fd   : > { %v8242_v62 = vadd.f32 %v5333_v58, %v3515_v0  ;;  %v2899_v60 = vpop.f32.mrf.mxu0  ;;  %v4360_v0 = vadd.f32 %v4104_v15, %v4088_v35  ;;  %v4121_v58 = vmul.f32 %v2963_v25, %v8021_v3  ;;  %v4373_v27 = vadd.f32 %v4105_v63, %v4089_v13 }
 0x3fe   : > { %v4152_v48 = vmul.f32 %v2899_v60, %v8068_v5 }
 0x3ff   : > { %8708 = vst [vmem:[#allocation60_spill] sm:$0xff] %v8242_v62  ;;  %v2968_v53 = vpop.f32.mrf.mxu1  ;;  %v3034_v33 = vpop.f32.mrf.mxu2  ;;  %v4136_v62 = vmul.f32 %v2896_v20, %v8036_v8  ;;  %v4361_v21 = vadd.f32 %v4360_v0, %v4120_v44  ;;  %v4374_v10 = vadd.f32 %v4373_v27, %v4121_v58  ;;  %v4106_v20 = vmul.f32 %v3029_v24, %v7987_v61 }
 0x400   : > { %v4153_v18 = vmul.f32 %v2968_v53, %v8072_v36  ;;  %v4090_v36 = vmul.f32 %v8208_v14, %v7957_v42  ;;  %v4138_v34 = vmul.f32 %v3034_v33, %v8048_v29 }
 0x401   : > { %v3103_v46 = vpop.f32.mrf.mxu3  ;;  %v4362_v56 = vadd.f32 %v4361_v21, %v4136_v62  ;;  %v4375_v31 = vadd.f32 %v4374_v10, %v4137_v28  ;;  %v4122_v10 = vmul.f32 %v3032_v26, %v8025_v55 }
 0x402   : > { %v4386_v40 = vadd.f32 %v4106_v20, %v4090_v36 }
 0x403   : > { %v4363_v3 = vadd.f32 %v4362_v56, %v4152_v48  ;;  %v4376_v5 = vadd.f32 %v4375_v31, %v4153_v18  ;;  %v8709_v56 = vld [vmem:[#allocation38_spill] sm:$0xff] }
 0x404   : > { %v4387_v55 = vadd.f32 %v4386_v40, %v4122_v10  ;;  %v8712_v10 = vld [vmem:[#allocation44_spill] sm:$0xff] }
 0x405   : > { %v2901_v19 = vpop.f32.mrf.mxu0 }
 0x406   : > { %v4168_v2 = vmul.f32 %v2901_v19, %v8085_v54  ;;  %v4091_v54 = vmul.f32 %v8212_v7, %v7950_v23 }
 0x407   : > { %v2970_v47 = vpop.f32.mrf.mxu1  ;;  %v3037_v50 = vpop.f32.mrf.mxu2 }
 0x408   : > { %v4169_v8 = vmul.f32 %v2970_v47, %v8092_v32  ;;  %v4364_v60 = vadd.f32 %v4363_v3, %v4168_v2  ;;  %v4123_v32 = vmul.f32 %v3101_v45, %v8030_v59  ;;  %v4399_v24 = vadd.f32 %v4107_v52, %v4091_v54 }
 0x409   : > { %v3106_v4 = vpop.f32.mrf.mxu3  ;;  %v4154_v7 = vmul.f32 %v3037_v50, %v8081_v16  ;;  %v4388_v47 = vadd.f32 %v4387_v55, %v4138_v34 }
 0x40a   : > { %v4400_v26 = vadd.f32 %v4399_v24, %v4123_v32  ;;  %v4155_v45 = vmul.f32 %v3106_v4, %v8083_v22  ;;  %v8713_v24 = vld [vmem:[#allocation46_spill] sm:$0xff] }
 0x40b   : > { %v4389_v15 = vadd.f32 %v4388_v47, %v4154_v7 }
 0x40d   : > { %v2904_v49 = vpop.f32.mrf.mxu0 }
 0x40e   : > { %v4184_v25 = vmul.f32 %v2904_v49, %v8113_v37  ;;  %v4377_v37 = vadd.f32 %v4376_v5, %v4169_v8  ;;  %v8710_v8 = vmov 0.0  }
 0x40f   : > { %v2973_v41 = vpop.f32.mrf.mxu1  ;;  %v3039_v39 = vpop.f32.mrf.mxu2 }
 0x410   : > { %v4185_v62 = vmul.f32 %v2973_v41, %v8117_v9  ;;  %v4365_v49 = vadd.f32 %v4364_v60, %v4184_v25  ;;  %v4139_v41 = vmul.f32 %v3103_v46, %v8053_v17  ;;  %v4170_v29 = vmul.f32 %v3039_v39, %v8094_v51 }
 0x411   : > { %v3108_v38 = vpop.f32.mrf.mxu3 }
 0x412   : > { %v4378_v42 = vadd.f32 %v4377_v37, %v4185_v62  ;;  %v4401_v33 = vadd.f32 %v4400_v26, %v4139_v41  ;;  %v4171_v17 = vmul.f32 %v3108_v38, %v8098_v57  ;;  %v4390_v13 = vadd.f32 %v4389_v15, %v4170_v29  ;;  %v8711_v62 = vld [vmem:[#allocation43_spill] sm:$0xff]  ;;  %v8715_v29 = vld [vmem:[#allocation45_spill] sm:$0xff] }
 0x414   : > { %v4402_v63 = vadd.f32 %v4401_v33, %v4155_v45 }
 0x415   : > { %v2906_v53 = vpop.f32.mrf.mxu0 }
 0x416   : > { %v4200_v61 = vmul.f32 %v2906_v53, %v8130_v1  ;;  %v4403_v22 = vadd.f32 %v4402_v63, %v4171_v17 }
 0x417   : > { %v2975_v9 = vpop.f32.mrf.mxu1  ;;  %v3042_v14 = vpop.f32.mrf.mxu2 }
 0x418   : > { %v4366_v30 = vadd.f32 %v4365_v49, %v4200_v61  ;;  %v4201_v23 = vmul.f32 %v2975_v9, %v8132_v12  ;;  %v4186_v12 = vmul.f32 %v3042_v14, %v8126_v6 }
 0x419   : > { %v3111_v59 = vpop.f32.mrf.mxu3 }
 0x41a   : > { %v4367_v1 = vrot.slane %v4366_v30, 4  ;;  %v4379_v19 = vadd.f32 %v4378_v42, %v4201_v23  ;;  %v4187_v16 = vmul.f32 %v3111_v59, %v8128_v11  ;;  %v4391_v27 = vadd.f32 %v4390_v13, %v4186_v12 }
 0x41c   : > { %v4368_v46 = vadd.f32 %v4367_v1, %v4366_v30  ;;  %v4380_v35 = vrot.slane %v4379_v19, 4  ;;  %v4404_v57 = vadd.f32 %v4403_v22, %v4187_v16  ;;  %v8714_v1 = vld [vmem:[#allocation47_spill] sm:$0xff]  ;;  %v8717_v16 = vld [vmem:[#allocation34_spill] sm:$0xff] }
 0x41d   : > { %v8718_v22 = vld [vmem:[#allocation42_spill] sm:$0xff] }
 0x41e   : > { %v4369_v50 = vrot.slane %v4368_v46, 2  ;;  %v4381_v44 = vadd.f32 %v4380_v35, %v4379_v19 }
 0x41f   : > { %v3044_v58 = vpop.f32.mrf.mxu2 }
 0x420   : > { %v4370_v4 = vadd.f32 %v4369_v50, %v4368_v46  ;;  %v4382_v0 = vrot.slane %v4381_v44, 2  ;;  %v4202_v51 = vmul.f32 %v3044_v58, %v8138_v43  ;;  %v8716_v46 = vld [vmem:[#allocation23_spill] sm:$0xff] }
 0x421   : > { %v3113_v21 = vpop.f32.mrf.mxu3 }
 0x422   : > { %v4371_v28 = vrot.slane %v4370_v4, 1  ;;  %v4383_v48 = vadd.f32 %v4382_v0, %v4381_v44  ;;  %v4203_v18 = vmul.f32 %v3113_v21, %v8709_v56  ;;  %v4392_v6 = vadd.f32 %v4391_v27, %v4202_v51  ;;  %v8720_v0 = vld [vmem:[#allocation33_spill] sm:$0xff] }
 0x423   : > { %v8722_v56 = vld [vmem:[#allocation41_spill] sm:$0xff] }
 0x424   : > { %v4372_v2 = vadd.f32 %v4371_v28, %v4370_v4  ;;  %v4384_v39 = vrot.slane %v4383_v48, 1  ;;  %v4405_v11 = vadd.f32 %v4404_v57, %v4203_v18  ;;  %v4393_v38 = vrot.slane %v4392_v6, 4  ;;  %v8721_v28 = vld [vmem:[#allocation60_spill] sm:$0xff] }
 0x425   : > { %v8719_v4 = vunpack.c.0.s8 %v8718_v22  ;;  %v8723_v18 = vunpack.c.0.s8 %v8722_v56 }
 0x426   : > { %vm4528_vm0 = vcmp.eq.f32.partialorder %v4372_v2, 0.0  ;;  %v4385_v31 = vadd.f32 %v4384_v39, %v4383_v48  ;;  %v4406_v3 = vrot.slane %v4405_v11, 4  ;;  %v4394_v20 = vadd.f32 %v4393_v38, %v4392_v6 }
 0x427   : > { %v5370_v25 = vsel %vm4528_vm0, 1.0, %v8710_v8  ;;  %v4679_v58 = vperm.slane %v8720_v0, %v8719_v4  ;;  %v4683_v6 = vperm.slane %v8720_v0, %v8723_v18 }
 0x428   : > { %v4434_v52 = vrot.slane %v4385_v31, 4  ;;  %vm4529_vm1 = vcmp.eq.f32.partialorder %v4385_v31, 0.0  ;;  %v4407_v43 = vadd.f32 %v4406_v3, %v4405_v11  ;;  %v4395_v60 = vrot.slane %v4394_v20, 2 }
 0x429   : > { %v5371_v5 = vsel %vm4529_vm1, 1.0, %v8710_v8  ;;  %v4576_v36 = vmul.f32 %v5370_v25, %v8711_v62  ;;  %v4599_v25 = vld [vmem:[#allocation2 + $0x8] sm:$0xff] }
 0x42a   : > { %v4442_v54 = vsel %vm699_vm9, %v4372_v2, %v4434_v52  ;;  %v4577_v53 = vmul.f32 %v5371_v5, %v8712_v10  ;;  %v4408_v32 = vrot.slane %v4407_v43, 2  ;;  %v4396_v49 = vadd.f32 %v4395_v60, %v4394_v20 }
 0x42b   : > { %v4450_v37 = vrot.slane %v4442_v54, 6  ;;  %v4592_v41 = vsub.f32 1.0, %v4576_v36 }
 0x42c   : > { %v4593_v61 = vsub.f32 1.0, %v4577_v53  ;;  %v4409_v40 = vadd.f32 %v4408_v32, %v4407_v43  ;;  %v4397_v9 = vrot.slane %v4396_v49, 1  ;;  %v8724_v43 = vld [vmem:[#allocation40_spill] sm:$0xff] }
 0x42d   : > { %v4466_v34 = vsub.f32 %v8713_v24, %v4450_v37 }
 0x42e   : > { %v4622_v42 = vrot.slane %v4593_v61, 4  ;;  %v4410_v14 = vrot.slane %v4409_v40, 1  ;;  %v4398_v23 = vadd.f32 %v4397_v9, %v4396_v49 }
 0x42f   : > { %v4474_v30 = vand.u32 2147483647, %v4466_v34 }
 0x430   : > { %v4630_v55 = vsel %vm699_vm9, %v4592_v41, %v4622_v42  ;;  %v4411_v7 = vadd.f32 %v4410_v14, %v4409_v40  ;;  %vm4530_vm2 = vcmp.eq.f32.partialorder %v4398_v23, 0.0 }
 0x431   : > { %v5356_v59 = vrot.slane %v4474_v30, 10  ;;  %v5372_v26 = vsel %vm4530_vm2, 1.0, %v8710_v8 }
 0x432   : > { %v4435_v45 = vrot.slane %v4411_v7, 4  ;;  %vm4531_vm4 = vcmp.eq.f32.partialorder %v4411_v7, 0.0  ;;  %v4578_v33 = vmul.f32 %v5372_v26, %v8715_v29 }
 0x433   : > { %v4514_v19 = vadd.f32 %v5356_v59, %v8714_v1  ;;  %v5373_v47 = vsel %vm4531_vm4, 1.0, %v8710_v8 }
 0x434   : > { %v4443_v17 = vsel %vm699_vm9, %v4398_v23, %v4435_v45  ;;  %v4579_v35 = vmul.f32 %v5373_v47, %v8716_v46  ;;  %v4594_v44 = vsub.f32 1.0, %v4578_v33 }
 0x435   : > { %v4646_v15 = vmul.f32 %v4630_v55, %v4514_v19  ;;  %v4451_v12 = vrot.slane %v4443_v17, 6 }
 0x436   : > { %v4595_v63 = vsub.f32 1.0, %v4579_v35 }
 0x437   : > { %v4467_v50 = vsub.f32 %v8717_v16, %v4451_v12  ;;  %v4698_v57 = vmul.f32 %v4679_v58, %v4646_v15 }
 0x438   : > { %v4623_v13 = vrot.slane %v4595_v63, 4 }
 0x439   : > { %v4475_v27 = vand.u32 2147483647, %v4467_v50  ;;  %v4718_v39 = vrot.slane %v4698_v57, 4  ;;  %v4719_v11 = vrot.slane %v4698_v57, 7 }
 0x43a   : > { %v4631_v51 = vsel %vm699_vm9, %v4594_v44, %v4623_v13 }
 0x43b   : > { %v5357_v21 = vrot.slane %v4475_v27, 10  ;;  %v4735_v8 = vsel %vm4726_vm11, %v4718_v39, %v4719_v11 }
 0x43d   : > { %v4515_v48 = vadd.f32 %v5357_v21, %v8721_v28 }
 0x43f   : > { %v4647_v2 = vmul.f32 %v4631_v51, %v4515_v48 }
 0x441   : > { %v4699_v38 = vmul.f32 %v4683_v6, %v4647_v2 }
 0x443   : > { %v4720_v31 = vrot.slane %v4699_v38, 2  ;;  %v4721_v3 = vrot.slane %v4699_v38, 5 }
 0x445   : > { %v4736_v20 = vsel %vm4728_vm14, %v4720_v31, %v4721_v3 }
 0x446   : > { %v4737_v52 = vsel %vm697_vm6, %v4735_v8, %v4736_v20  ;;  %4748 = sbr.rel (%p5374_p3) target bundleno = 1315 (0x523), region = 48 }
 0x447   : > { %v4738_v5 = vsel %vm699_vm9, %v8724_v43, %v4737_v52 }
 0x448   : > { %v4742_v60 = vadd.f32 %v4738_v5, %v4599_v25 }
 0x44a   : > { %4744 = vst [vmem:[#allocation2 + $0x8] sm:$0xff] %v4742_v60 }
 0x44b   : > { %v4749_v62 = vld [vmem:[#allocation2] sm:$0xff]  ;;  %vm4827_vm9 = vcmask 0  }
 0x44c   : > { %v4753_v36 = vperm.slane %v4749_v62, 0  ;;  %v4754_v54 = vperm.slane %v4749_v62, 1  ;;  %v4755_v10 = vperm.slane %v4749_v62, 2  ;;  %v4756_v53 = vperm.slane %v4749_v62, 3 }
 0x44d   : > { %v4757_v32 = vperm.slane %v4749_v62, 4  ;;  %v4758_v24 = vperm.slane %v4749_v62, 5  ;;  %v4759_v41 = vperm.slane %v4749_v62, 6  ;;  %v4760_v23 = vperm.slane %v4749_v62, 7 }
 0x44e   : > { %v4785_v37 = vsel %vm650_vm5, %v4753_v36, 0.0  ;;  %v4786_v49 = vsel %vm650_vm5, %v4754_v54, 0.0  ;;  %v4788_v61 = vsel %vm650_vm5, %v4755_v10, 0.0  ;;  %v4790_v34 = vsel %vm650_vm5, %v4756_v53, 0.0 }
 0x44f   : > { %v4787_v40 = vadd.f32 %v4786_v49, %v4785_v37  ;;  %v4792_v42 = vsel %vm650_vm5, %v4757_v32, 0.0  ;;  %v4794_v55 = vsel %vm650_vm5, %v4758_v24, 0.0  ;;  %v4796_v26 = vsel %vm650_vm5, %v4759_v41, 0.0 }
 0x450   : > { %v4798_v19 = vsel %vm650_vm5, %v4760_v23, 0.0 }
 0x451   : > { %v4789_v9 = vadd.f32 %v4788_v61, %v4787_v40  ;;  %v4750_v14 = vld [vmem:[#allocation2 + $0x8] sm:$0xff] }
 0x452   : > { %v4761_v59 = vperm.slane %v4750_v14, 0  ;;  %v4762_v1 = vperm.slane %v4750_v14, 1  ;;  %v4763_v29 = vperm.slane %v4750_v14, 2  ;;  %v4764_v46 = vperm.slane %v4750_v14, 3 }
 0x453   : > { %v4791_v30 = vadd.f32 %v4790_v34, %v4789_v9  ;;  %v4765_v12 = vperm.slane %v4750_v14, 4  ;;  %v4766_v50 = vperm.slane %v4750_v14, 5  ;;  %v4767_v22 = vperm.slane %v4750_v14, 6 }
 0x454   : > { %v4800_v33 = vsel %vm650_vm5, %v4761_v59, 0.0  ;;  %v4802_v35 = vsel %vm650_vm5, %v4762_v1, 0.0  ;;  %v4804_v63 = vsel %vm650_vm5, %v4763_v29, 0.0  ;;  %v4806_v44 = vsel %vm650_vm5, %v4764_v46, 0.0 }
 0x455   : > { %v4793_v7 = vadd.f32 %v4792_v42, %v4791_v30  ;;  %v4808_v4 = vsel %vm650_vm5, %v4765_v12, 0.0  ;;  %v4768_v58 = vperm.slane %v4750_v14, 7  ;;  %v4810_v27 = vsel %vm650_vm5, %v4766_v50, 0.0 }
 0x456   : > { %v4812_v21 = vsel %vm650_vm5, %v4767_v22, 0.0 }
 0x457   : > { %v4795_v45 = vadd.f32 %v4794_v55, %v4793_v7  ;;  %v4814_v28 = vsel %vm650_vm5, %v4768_v58, 0.0 }
 0x459   : > { %v4797_v47 = vadd.f32 %v4796_v26, %v4795_v45 }
 0x45b   : > { %v4799_v17 = vadd.f32 %v4798_v19, %v4797_v47 }
 0x45d   : > { %v4801_v15 = vadd.f32 %v4800_v33, %v4799_v17 }
 0x45f   : > { %v4803_v16 = vadd.f32 %v4802_v35, %v4801_v15 }
 0x461   : > { %v4805_v13 = vadd.f32 %v4804_v63, %v4803_v16 }
 0x463   : > { %v4807_v0 = vadd.f32 %v4806_v44, %v4805_v13 }
 0x465   : > { %v4809_v51 = vadd.f32 %v4808_v4, %v4807_v0 }
 0x467   : > { %v4811_v57 = vadd.f32 %v4810_v27, %v4809_v51 }
 0x469   : > { %v4813_v48 = vadd.f32 %v4812_v21, %v4811_v57 }
 0x46b   : > { %v4815_v56 = vadd.f32 %v4814_v28, %v4813_v48 }
 0x46d   : > { %4816 = vadd.xlane.f32.xlu0 %v4815_v56 }
 0x4e0   : > { %v4817_v18 = vpop.xlane.xlu0 %4816 }
 0x4e1   : > { %v4818_v6 = vrot.slane %v4817_v18, 4 }
 0x4e3   : > { %v4819_v2 = vadd.f32 %v4818_v6, %v4817_v18 }
 0x4e5   : > { %v4820_v39 = vrot.slane %v4819_v2, 2 }
 0x4e7   : > { %v4821_v11 = vadd.f32 %v4820_v39, %v4819_v2 }
 0x4e9   : > { %v4822_v38 = vrot.slane %v4821_v11, 1 }
 0x4eb   : > { %v4823_v31 = vadd.f32 %v4822_v38, %v4821_v11 }
 0x4ed   : > { %5396 = vpush %v4823_v31 }
 0x51e   : > { %s5397_s4 = spop %5396 }
 0x51f   : > { %s4825_s8 = smul.f32 8.138021e-05, %s5397_s4 }
 0x521   : > { %v4826_v3 = vstv %s4825_s8 }
 0x522   : > { %4828 = vst.msk [vmem:[%s452_s22] sm:$0x1] %vm4827_vm9, %v4826_v3 }
 0x523 PF: > { %s8725_s27 = sld [smem:[#allocation10_spill]]  ;;  %s5377_s29 = sshll.u32 %s5641_s9, 5 }
 0x524   : > { %s4851_s24 = sadd.s32 %s5377_s29, %s5802_s17  ;;  %s5378_s16 = sshll.u32 %s5645_s10, 6 }
 0x525   : > { %s4853_s11 = sadd.s32 %s5378_s16, %s4851_s24  ;;  %s4857_s30 = sshll.u32 %s5843_s13, 4  ;;  %s4858_s30 = int_to_ptr.vmem [resolvable:$true] %s4857_s30 }
 0x526   : > { %s5379_s23 = sshll.u32 %s4853_s11, 1  ;;  %s8727_s19 = sld [smem:[#allocation64_spill]] }
 0x529   : > { %s8728_s22 = sand.u32 1, %s8725_s27  }
 0x52a   : > { %s4837_s26 = scalar_lea.sflag [#allocation6], %s8728_s22 }
 0x52c   : > { %s4855_s25 = scalar_lea.hbm %s8727_s19, %s5379_s23  ;;  %s5569_s17 = scalar_lea.hbm %s8727_s19, 256 }
 0x52d   : > { %s4859_s1 = sshll.u32 %s4855_s25, 4  ;;  %s4860_s1 = int_to_ptr.hbm [resolvable:$true] %s4859_s1 }
 0x52e   : > { %s5563_s0 = sshra.s32 %s4860_s1, 4  ;;  %s5564_s0 = int_to_ptr.hbm [resolvable:$true] %s5563_s0 }
 0x52f   : > { %s5565_s15 = scalar_lea.hbm %s5564_s0, 32  ;;  %p5570_p9 = scmp.lt.s32.totalorder %s5564_s0, %s8727_s19 }
 0x530   : > { %p5566_p4 = scmp.ne.s32.totalorder %s5564_s0, %s5565_s15  ;;  %p5571_p10 = scmp.lt.s32.totalorder %s5569_s17, %s5565_s15 }
 0x532   : > { %p5567_p6 = pnand %p5566_p4, %p5775_p5  ;;  %p5572_p11 = por %p5571_p10, %p5570_p9 }
 0x534   : > { %p5568_p8 = pneg %p5567_p6 }
 0x536   : > { %p5573_p12 = pnand %p5572_p11, %p5568_p8 }
 0x538   : > { %5576 = shalt.err (!%p5573_p12)
}
 0x539   : > { %5398 = dma.vmem_to_hbm [thread:$0]  (%p5775_p5), %s4858_s30, 512, %s4860_s1, %s4837_s26  }
 0x53a PF: > { %s8729_s12 = sld [smem:[#allocation15_spill]] }
 0x53b   : > { %s8730_s21 = sld [smem:[#allocation9_spill]] }
 0x540   : > { %p5404_p13 = scmp.ge.s32.totalorder %s8729_s12, 2 }
 0x541   : > { %s4881_s8 = sand.u32 1, %s8730_s21  }
 0x542   : > { %p5401_p0 = pnand %p5404_p13, %p5782_p7  ;;  %s4882_s18 = scalar_lea.sflag [#allocation6], %s4881_s8 }
 0x544   : > { %p5402_p1 = pneg %p5401_p0 }
 0x546   : > { %5620 = dma.done.wait (%p5402_p1), %s4882_s18, 512  }
 0x547   : > { %5622 = vsyncadd (%p5402_p1), %s4882_s18, 4294966784  ;;  %s29_s13 = sadd.s32 1, %s8729_s12   ;;  %s8732_s28 = sld [smem:[#allocation10_spill]] }
 0x548   : > { %p26_p2 = scmp.ge.s32.totalorder %s29_s13, 10   ;;  %s8733_s29 = sld [smem:[#allocation11_spill]] }
 0x549   : > { %s8734_s30 = sld [smem:[#allocation21_spill]] }
 0x54a   : > { %s8735_s8 = sld [smem:[#allocation12_spill]] }
 0x54b   : > { %s8736_s9 = sld [smem:[#allocation13_spill]]  ;;  %28 = sbr.rel (!%p26_p2) target bundleno = 15 (0xf), region = 110 }
 0x54c   : > { %s8737_s10 = sld [smem:[#allocation14_spill]] }
 0x54d   : > { %s8738_s0 = sld [smem:[#allocation16_spill]] }
 0x54e   : > { %s8739_s11 = sld [smem:[#allocation18_spill]] }
 0x54f   : > { %s8740_s12 = sld [smem:[#allocation20_spill]] }
 0x550   :  { %4888 = vsyncpa [#allocation6], 1 }
 0x551   :  { %4890 = vsyncpa [#allocation6 + $0x1], 1 }

</bundles_post_ra>
